<compile_context>
chip_gen: v7x
topology: tpu7x:2x2x1
jax: 0.10.0
libtpu: 0.0.40
codegen_flags: <defaults>
</compile_context>

<pallas_src>
import jax
import jax.numpy as jnp
from jax import lax
from jax.experimental import pallas as pl
from jax.experimental.pallas import tpu as pltpu

# ----------------------------- configuration --------------------------------
WIDTH = 32                 # `width` (144 in the real config; small here)
DEPTH = 2                  # `depth`
BOTTLENECK = 2             # `bottleneck_ratio`
INPUT_DIM = 4              # `input_features_dim`
NUM_CLASSES = 4            # `num_classes` (shape categories)
NUM_PARTS = [2, 3, 4, 2]   # `num_parts` per shape category
NSAMPLES = 8               # `nsamples` (neighbors per point)
N_POINTS = 128             # `npoints` at full resolution
N_POINTS_2 = 64            # coarse resolution after the strided block
BN_EPS = 1e-5

HEAD_HID = WIDTH // 2                  # per-class hidden width
HEAD_HID_ALL = NUM_CLASSES * HEAD_HID  # merged head-conv output width
P_PAD = 128                            # classifier output padded to 128 lanes


# ----------------------------- fused Pallas kernel ---------------------------
def make_kernel(weight_names):
    n_w = len(weight_names)

    def kernel(feats_ref, gfull_ref, gdown_ref, gcoarse_ref, gup_ref, *rest):
        out_ref = rest[n_w]
        wref = dict(zip(weight_names, rest[:n_w]))

        def bf16(a):
            return a.astype(jnp.bfloat16)

        def mm(a, b):
            # bf16 MXU matmul with f32 accumulation.
            return jnp.dot(bf16(a), bf16(b), preferred_element_type=jnp.float32)

        def linear(x, name, relu=False, residual=None):
            # 1x1 Conv1d with BN already folded into the weight; shift-only epilogue.
            y = mm(x, wref[name + '/w'][...]) + wref[name + '/shift'][...]
            if residual is not None:
                y = y + residual
            if relu:
                y = jnp.maximum(y, 0.0)
            return y

        def gather_max(g_ref, x):
            # out[i] = max_k x[idx[i, k]]  via K one-hot MXU matmuls + VPU max.
            xb = bf16(x)
            acc = jnp.dot(g_ref[0], xb, preferred_element_type=jnp.float32)
            for kk in range(1, NSAMPLES):
                acc = jnp.maximum(
                    acc, jnp.dot(g_ref[kk], xb, preferred_element_type=jnp.float32))
            return acc

        def bottleneck(x, name, g_ref, strided=False, shortcut=False):
            y = linear(x, f'{name}/c1', relu=True)
            y = gather_max(g_ref, y)                       # local max-pool (+ downsample)
            if shortcut:
                sc_in = gather_max(g_ref, x) if strided else x
                sc = linear(sc_in, f'{name}/sc', relu=False)
            else:
                sc = x
            return linear(y, f'{name}/c2', relu=True, residual=sc)

        # stem
        x = linear(feats_ref[...], 'stem', relu=True)                  # (N, W/2)

        # stage 1 (full resolution)
        x = bottleneck(x, 's1_b0', gfull_ref, shortcut=True)
        for d in range(1, DEPTH):
            x = bottleneck(x, f's1_b{d}', gfull_ref)
        res1 = x                                                       # (N, W)

        # stage 2 (strided / downsampled)
        x = bottleneck(x, 's2_b0', gdown_ref, strided=True, shortcut=True)
        for d in range(1, DEPTH):
            x = bottleneck(x, f's2_b{d}', gcoarse_ref)
        res2 = x                                                       # (N2, 2W)

        # head: nearest upsample (k=1 one-hot matmul), concat realized as a
        # split-weight sum, merged per-class heads, padded 128-lane classifier.
        up = jnp.dot(gup_ref[...], bf16(res2),
                     preferred_element_type=jnp.float32)               # (N, 2W)
        h = (mm(res1, wref['up_a/w'][...]) + mm(up, wref['up_b/w'][...])
             + wref['up/shift'][...])
        h = jnp.maximum(h, 0.0)                                        # (N, W)
        y_all = jnp.maximum(
            mm(h, wref['head/conv_w'][...]) + wref['head/conv_shift'][...], 0.0)
        logits = mm(y_all, wref['head/cls_w'][...]) + wref['head/cls_b'][...]
        out_ref[...] = logits                                          # (N, P_PAD)

    return kernel


# ----------------------------- parameter init --------------------------------
def kaiming(key, cin, cout):
    # kaiming_normal_ for a 1x1 conv: std = sqrt(2 / fan_in), fan_in = cin.
    return jax.random.normal(key, (cin, cout), jnp.float32) * jnp.sqrt(2.0 / cin)


def fold_bn(w, gamma=None, beta=None, mean=None, var=None):
    """Fold eval-mode BatchNorm1d into the conv weight: w' = w*s, shift = beta - mean*s."""
    cout = w.shape[1]
    gamma = jnp.ones((cout,), jnp.float32) if gamma is None else gamma
    beta = jnp.zeros((cout,), jnp.float32) if beta is None else beta
    mean = jnp.zeros((cout,), jnp.float32) if mean is None else mean
    var = jnp.ones((cout,), jnp.float32) if var is None else var
    scale = gamma / jnp.sqrt(var + BN_EPS)
    return w * scale[None, :], beta - mean * scale


def init_params(key):
    keys = iter(jax.random.split(key, 64))
    p = {}

    def conv_bn(name, cin, cout):
        w, s = fold_bn(kaiming(next(keys), cin, cout))
        p[name + '/w'] = w
        p[name + '/shift'] = s.reshape(1, cout)

    conv_bn('stem', INPUT_DIM, WIDTH // 2)
    # stage 1
    conv_bn('s1_b0/c1', WIDTH // 2, WIDTH // BOTTLENECK)
    conv_bn('s1_b0/c2', WIDTH // BOTTLENECK, WIDTH)
    conv_bn('s1_b0/sc', WIDTH // 2, WIDTH)
    for d in range(1, DEPTH):
        conv_bn(f's1_b{d}/c1', WIDTH, WIDTH // BOTTLENECK)
        conv_bn(f's1_b{d}/c2', WIDTH // BOTTLENECK, WIDTH)
    # stage 2
    conv_bn('s2_b0/c1', WIDTH, (2 * WIDTH) // BOTTLENECK)
    conv_bn('s2_b0/c2', (2 * WIDTH) // BOTTLENECK, 2 * WIDTH)
    conv_bn('s2_b0/sc', WIDTH, 2 * WIDTH)
    for d in range(1, DEPTH):
        conv_bn(f's2_b{d}/c1', 2 * WIDTH, (2 * WIDTH) // BOTTLENECK)
        conv_bn(f's2_b{d}/c2', (2 * WIDTH) // BOTTLENECK, 2 * WIDTH)

    # head up-conv; split into the res1 part and the upsampled-res2 part so the
    # kernel avoids an in-kernel lane concat.
    w_up, s_up = fold_bn(kaiming(next(keys), WIDTH + 2 * WIDTH, WIDTH))
    p['up_a/w'] = w_up[:WIDTH, :]
    p['up_b/w'] = w_up[WIDTH:, :]
    p['up/shift'] = s_up.reshape(1, WIDTH)

    # merged per-class heads: one wide conv + block-diagonal padded classifier.
    hw, hs, cw = [], [], []
    for _ in range(NUM_CLASSES):
        w1, s1 = fold_bn(kaiming(next(keys), WIDTH, HEAD_HID))
        hw.append(w1)
        hs.append(s1)
        cw.append(kaiming(next(keys), HEAD_HID, 1))  # placeholder, resized below
    p['head/conv_w'] = jnp.concatenate(hw, axis=1)                      # (W, 4*W/2)
    p['head/conv_shift'] = jnp.concatenate(hs).reshape(1, HEAD_HID_ALL)

    cls_w = jnp.zeros((HEAD_HID_ALL, P_PAD), jnp.float32)
    cls_b = jnp.zeros((P_PAD,), jnp.float32)                            # zero-init bias
    off = 0
    cls_keys = jax.random.split(next(keys), NUM_CLASSES)
    for c in range(NUM_CLASSES):
        wc = kaiming(cls_keys[c], HEAD_HID, NUM_PARTS[c])
        cls_w = cls_w.at[c * HEAD_HID:(c + 1) * HEAD_HID,
                         off:off + NUM_PARTS[c]].set(wc)
        off += NUM_PARTS[c]
    p['head/cls_w'] = cls_w
    p['head/cls_b'] = cls_b.reshape(1, P_PAD)
    return p


# ----------------------------- glue (plain JAX) -------------------------------
def knn_idx(query_xyz, support_xyz, k, support_mask):
    """k nearest supports for each query (masked-out supports excluded)."""
    d2 = (jnp.sum(query_xyz ** 2, axis=-1, keepdims=True)
          - 2.0 * query_xyz @ support_xyz.T
          + jnp.sum(support_xyz ** 2, axis=-1)[None, :])
    d2 = jnp.where(support_mask[None, :], d2, jnp.inf)
    _, idx = lax.top_k(-d2, k)
    return idx.astype(jnp.int32)


def onehot_kmn(idx, n_support):
    """(M, K) neighbor indices -> (K, M, n_support) bf16 one-hot gather matrices."""
    oh = jax.nn.one_hot(idx, n_support, dtype=jnp.bfloat16)   # (M, K, S)
    return jnp.transpose(oh, (1, 0, 2))


# ----------------------------- model forward ---------------------------------
def model_forward(params, xyz, mask, features):
    """xyz: (B,N,3), mask: (B,N) bool, features: (B, INPUT_DIM, N) [NCW].

    Returns a list of NUM_CLASSES arrays, each (B, num_parts[c], N)."""
    B = xyz.shape[0]
    maskf = mask.astype(jnp.float32)
    feats = (jnp.transpose(features, (0, 2, 1)) * maskf[..., None]).astype(jnp.bfloat16)

    def prep_one(xyz_b, mask_b):
        idx_full = knn_idx(xyz_b, xyz_b, NSAMPLES, mask_b)               # (N, K)
        sub = jnp.arange(0, N_POINTS, N_POINTS // N_POINTS_2)
        xyz2, mask2 = xyz_b[sub], mask_b[sub]
        idx_down = knn_idx(xyz2, xyz_b, NSAMPLES, mask_b)                # (N2, K)
        idx_coarse = knn_idx(xyz2, xyz2, NSAMPLES, mask2)                # (N2, K)
        idx_up = knn_idx(xyz_b, xyz2, 1, mask2)                          # (N, 1)
        g_full = onehot_kmn(idx_full, N_POINTS)
        g_down = onehot_kmn(idx_down, N_POINTS)
        g_coarse = onehot_kmn(idx_coarse, N_POINTS_2)
        g_up = jax.nn.one_hot(idx_up[:, 0], N_POINTS_2, dtype=jnp.bfloat16)
        return g_full, g_down, g_coarse, g_up

    g_full, g_down, g_coarse, g_up = jax.vmap(prep_one)(xyz, mask)

    names = sorted(params.keys())
    weight_arrays = [
        params[n].astype(jnp.bfloat16) if (n.endswith('/w') or n.endswith('_w'))
        else params[n].astype(jnp.float32)
        for n in names
    ]

    def const_spec(arr):
        nd = arr.ndim
        return pl.BlockSpec(arr.shape, lambda b, _nd=nd: (0,) * _nd)

    in_specs = [
        pl.BlockSpec((None, N_POINTS, INPUT_DIM), lambda b: (b, 0, 0)),
        pl.BlockSpec((None, NSAMPLES, N_POINTS, N_POINTS), lambda b: (b, 0, 0, 0)),
        pl.BlockSpec((None, NSAMPLES, N_POINTS_2, N_POINTS), lambda b: (b, 0, 0, 0)),
        pl.BlockSpec((None, NSAMPLES, N_POINTS_2, N_POINTS_2), lambda b: (b, 0, 0, 0)),
        pl.BlockSpec((None, N_POINTS, N_POINTS_2), lambda b: (b, 0, 0)),
    ] + [const_spec(a) for a in weight_arrays]

    logits_pad = pl.pallas_call(
        make_kernel(names),
        grid=(B,),
        in_specs=in_specs,
        out_specs=pl.BlockSpec((None, N_POINTS, P_PAD), lambda b: (b, 0, 0)),
        out_shape=jax.ShapeDtypeStruct((B, N_POINTS, P_PAD), jnp.float32),
        compiler_params=pltpu.CompilerParams(dimension_semantics=("parallel",)),
    )(feats, g_full, g_down, g_coarse, g_up, *weight_arrays)

    # slice the padded lane-dense classifier slab back into per-class (B, P_c, N)
    out, off = [], 0
    for c in range(NUM_CLASSES):
        out.append(jnp.transpose(
            logits_pad[:, :, off:off + NUM_PARTS[c]], (0, 2, 1)))
        off += NUM_PARTS[c]
    return out


# ----------------------------------- main -------------------------------------
if __name__ == "__main__":
    key = jax.random.PRNGKey(0)
    k_xyz, k_feat, k_par = jax.random.split(key, 3)

    B = 2
    xyz = jax.random.normal(k_xyz, (B, N_POINTS, 3), jnp.float32)
    mask = jnp.ones((B, N_POINTS), dtype=bool)
    features = jax.random.normal(k_feat, (B, INPUT_DIM, N_POINTS), jnp.float32)

    params = init_params(k_par)

    fwd = jax.jit(model_forward)
    out = fwd(params, xyz, mask, features)
    out = jax.block_until_ready(out)

    # sanity: one logit tensor per shape class, shaped (B, num_parts[c], N)
    assert len(out) == NUM_CLASSES
    for c, o in enumerate(out):
        assert o.shape == (B, NUM_PARTS[c], N_POINTS), o.shape
        assert bool(jnp.all(jnp.isfinite(o)))

    print("KERNEL_OK")
</pallas_src>

<mosaic_0001>
module attributes {stable_mosaic.version = 11 : i64} {
  func.func @kernel(%arg0: i32, %arg1: memref<1x128x4xbf16, #tpu.memory_space<vmem>>, %arg2: memref<1x8x128x128xbf16, #tpu.memory_space<vmem>>, %arg3: memref<1x8x64x128xbf16, #tpu.memory_space<vmem>>, %arg4: memref<1x8x64x64xbf16, #tpu.memory_space<vmem>>, %arg5: memref<1x128x64xbf16, #tpu.memory_space<vmem>>, %arg6: memref<1x128xf32, #tpu.memory_space<vmem>>, %arg7: memref<64x128xbf16, #tpu.memory_space<vmem>>, %arg8: memref<1x64xf32, #tpu.memory_space<vmem>>, %arg9: memref<32x64xbf16, #tpu.memory_space<vmem>>, %arg10: memref<1x16xf32, #tpu.memory_space<vmem>>, %arg11: memref<16x16xbf16, #tpu.memory_space<vmem>>, %arg12: memref<1x32xf32, #tpu.memory_space<vmem>>, %arg13: memref<16x32xbf16, #tpu.memory_space<vmem>>, %arg14: memref<1x32xf32, #tpu.memory_space<vmem>>, %arg15: memref<16x32xbf16, #tpu.memory_space<vmem>>, %arg16: memref<1x16xf32, #tpu.memory_space<vmem>>, %arg17: memref<32x16xbf16, #tpu.memory_space<vmem>>, %arg18: memref<1x32xf32, #tpu.memory_space<vmem>>, %arg19: memref<16x32xbf16, #tpu.memory_space<vmem>>, %arg20: memref<1x32xf32, #tpu.memory_space<vmem>>, %arg21: memref<32x32xbf16, #tpu.memory_space<vmem>>, %arg22: memref<1x64xf32, #tpu.memory_space<vmem>>, %arg23: memref<32x64xbf16, #tpu.memory_space<vmem>>, %arg24: memref<1x64xf32, #tpu.memory_space<vmem>>, %arg25: memref<32x64xbf16, #tpu.memory_space<vmem>>, %arg26: memref<1x32xf32, #tpu.memory_space<vmem>>, %arg27: memref<64x32xbf16, #tpu.memory_space<vmem>>, %arg28: memref<1x64xf32, #tpu.memory_space<vmem>>, %arg29: memref<32x64xbf16, #tpu.memory_space<vmem>>, %arg30: memref<1x16xf32, #tpu.memory_space<vmem>>, %arg31: memref<4x16xbf16, #tpu.memory_space<vmem>>, %arg32: memref<1x32xf32, #tpu.memory_space<vmem>>, %arg33: memref<32x32xbf16, #tpu.memory_space<vmem>>, %arg34: memref<64x32xbf16, #tpu.memory_space<vmem>>, %arg35: memref<1x128x128xf32, #tpu.memory_space<vmem>>) attributes {dimension_semantics = [#tpu.dimension_semantics<parallel>], iteration_bounds = array<i64: 2>, scalar_prefetch = 0 : i64, scratch_operands = 0 : i64, tpu.core_type = #tpu.core_type<tc>, window_params = [{transform_indices = @transform_0, window_bounds = array<i64: 1, 128, 4>}, {transform_indices = @transform_1, window_bounds = array<i64: 1, 8, 128, 128>}, {transform_indices = @transform_2, window_bounds = array<i64: 1, 8, 64, 128>}, {transform_indices = @transform_3, window_bounds = array<i64: 1, 8, 64, 64>}, {transform_indices = @transform_4, window_bounds = array<i64: 1, 128, 64>}, {pipeline_mode = #tpu.pipeline_mode<synchronous>, transform_indices = @transform_5, window_bounds = array<i64: 1, 128>}, {pipeline_mode = #tpu.pipeline_mode<synchronous>, transform_indices = @transform_6, window_bounds = array<i64: 64, 128>}, {pipeline_mode = #tpu.pipeline_mode<synchronous>, transform_indices = @transform_7, window_bounds = array<i64: 1, 64>}, {pipeline_mode = #tpu.pipeline_mode<synchronous>, transform_indices = @transform_8, window_bounds = array<i64: 32, 64>}, {pipeline_mode = #tpu.pipeline_mode<synchronous>, transform_indices = @transform_9, window_bounds = array<i64: 1, 16>}, {pipeline_mode = #tpu.pipeline_mode<synchronous>, transform_indices = @transform_10, window_bounds = array<i64: 16, 16>}, {pipeline_mode = #tpu.pipeline_mode<synchronous>, transform_indices = @transform_11, window_bounds = array<i64: 1, 32>}, {pipeline_mode = #tpu.pipeline_mode<synchronous>, transform_indices = @transform_12, window_bounds = array<i64: 16, 32>}, {pipeline_mode = #tpu.pipeline_mode<synchronous>, transform_indices = @transform_13, window_bounds = array<i64: 1, 32>}, {pipeline_mode = #tpu.pipeline_mode<synchronous>, transform_indices = @transform_14, window_bounds = array<i64: 16, 32>}, {pipeline_mode = #tpu.pipeline_mode<synchronous>, transform_indices = @transform_15, window_bounds = array<i64: 1, 16>}, {pipeline_mode = #tpu.pipeline_mode<synchronous>, transform_indices = @transform_16, window_bounds = array<i64: 32, 16>}, {pipeline_mode = #tpu.pipeline_mode<synchronous>, transform_indices = @transform_17, window_bounds = array<i64: 1, 32>}, {pipeline_mode = #tpu.pipeline_mode<synchronous>, transform_indices = @transform_18, window_bounds = array<i64: 16, 32>}, {pipeline_mode = #tpu.pipeline_mode<synchronous>, transform_indices = @transform_19, window_bounds = array<i64: 1, 32>}, {pipeline_mode = #tpu.pipeline_mode<synchronous>, transform_indices = @transform_20, window_bounds = array<i64: 32, 32>}, {pipeline_mode = #tpu.pipeline_mode<synchronous>, transform_indices = @transform_21, window_bounds = array<i64: 1, 64>}, {pipeline_mode = #tpu.pipeline_mode<synchronous>, transform_indices = @transform_22, window_bounds = array<i64: 32, 64>}, {pipeline_mode = #tpu.pipeline_mode<synchronous>, transform_indices = @transform_23, window_bounds = array<i64: 1, 64>}, {pipeline_mode = #tpu.pipeline_mode<synchronous>, transform_indices = @transform_24, window_bounds = array<i64: 32, 64>}, {pipeline_mode = #tpu.pipeline_mode<synchronous>, transform_indices = @transform_25, window_bounds = array<i64: 1, 32>}, {pipeline_mode = #tpu.pipeline_mode<synchronous>, transform_indices = @transform_26, window_bounds = array<i64: 64, 32>}, {pipeline_mode = #tpu.pipeline_mode<synchronous>, transform_indices = @transform_27, window_bounds = array<i64: 1, 64>}, {pipeline_mode = #tpu.pipeline_mode<synchronous>, transform_indices = @transform_28, window_bounds = array<i64: 32, 64>}, {pipeline_mode = #tpu.pipeline_mode<synchronous>, transform_indices = @transform_29, window_bounds = array<i64: 1, 16>}, {pipeline_mode = #tpu.pipeline_mode<synchronous>, transform_indices = @transform_30, window_bounds = array<i64: 4, 16>}, {pipeline_mode = #tpu.pipeline_mode<synchronous>, transform_indices = @transform_31, window_bounds = array<i64: 1, 32>}, {pipeline_mode = #tpu.pipeline_mode<synchronous>, transform_indices = @transform_32, window_bounds = array<i64: 32, 32>}, {pipeline_mode = #tpu.pipeline_mode<synchronous>, transform_indices = @transform_33, window_bounds = array<i64: 64, 32>}, {transform_indices = @transform_34, window_bounds = array<i64: 1, 128, 128>}]} {
    %c0 = arith.constant 0 : index
    %c0_0 = arith.constant 0 : index
    %c0_1 = arith.constant 0 : index
    %0 = vector.load %arg1[%c0, %c0_0, %c0_1] : memref<1x128x4xbf16, #tpu.memory_space<vmem>>, vector<1x128x4xbf16>
    %1 = vector.shape_cast %0 : vector<1x128x4xbf16> to vector<128x4xbf16>
    %c0_2 = arith.constant 0 : index
    %c0_3 = arith.constant 0 : index
    %2 = vector.load %arg31[%c0_2, %c0_3] : memref<4x16xbf16, #tpu.memory_space<vmem>>, vector<4x16xbf16>
    %cst = arith.constant dense<0.000000e+00> : vector<128x16xf32>
    %3 = tpu.matmul %1, %2, %cst {dimension_numbers = #tpu.dot_dimension_numbers<[1], [0], [0], [1], [0, 0, 1, 1], [], []>} : vector<128x4xbf16>, vector<4x16xbf16>, vector<128x16xf32> -> vector<128x16xf32>
    %c0_4 = arith.constant 0 : index
    %c0_5 = arith.constant 0 : index
    %4 = vector.load %arg30[%c0_4, %c0_5] : memref<1x16xf32, #tpu.memory_space<vmem>>, vector<1x16xf32>
    %5 = vector.broadcast %4 : vector<1x16xf32> to vector<128x16xf32>
    %6 = arith.addf %3, %5 : vector<128x16xf32>
    %cst_6 = arith.constant 0.000000e+00 : f32
    %7 = vector.broadcast %cst_6 : f32 to vector<128x16xf32>
    %8 = arith.maximumf %6, %7 : vector<128x16xf32>
    %c0_7 = arith.constant 0 : index
    %c0_8 = arith.constant 0 : index
    %9 = vector.load %arg11[%c0_7, %c0_8] : memref<16x16xbf16, #tpu.memory_space<vmem>>, vector<16x16xbf16>
    %10 = arith.truncf %8 : vector<128x16xf32> to vector<128x16xbf16>
    %cst_9 = arith.constant dense<0.000000e+00> : vector<128x16xf32>
    %11 = tpu.matmul %10, %9, %cst_9 {dimension_numbers = #tpu.dot_dimension_numbers<[1], [0], [0], [1], [0, 0, 1, 1], [], []>} : vector<128x16xbf16>, vector<16x16xbf16>, vector<128x16xf32> -> vector<128x16xf32>
    %c0_10 = arith.constant 0 : index
    %c0_11 = arith.constant 0 : index
    %12 = vector.load %arg10[%c0_10, %c0_11] : memref<1x16xf32, #tpu.memory_space<vmem>>, vector<1x16xf32>
    %13 = vector.broadcast %12 : vector<1x16xf32> to vector<128x16xf32>
    %14 = arith.addf %11, %13 : vector<128x16xf32>
    %cst_12 = arith.constant 0.000000e+00 : f32
    %15 = vector.broadcast %cst_12 : f32 to vector<128x16xf32>
    %16 = arith.maximumf %14, %15 : vector<128x16xf32>
    %17 = arith.truncf %16 : vector<128x16xf32> to vector<128x16xbf16>
    %c0_13 = arith.constant 0 : index
    %c0_14 = arith.constant 0 : index
    %c0_15 = arith.constant 0 : index
    %c0_16 = arith.constant 0 : index
    %18 = vector.load %arg2[%c0_13, %c0_14, %c0_15, %c0_16] : memref<1x8x128x128xbf16, #tpu.memory_space<vmem>>, vector<1x1x128x128xbf16>
    %19 = vector.shape_cast %18 : vector<1x1x128x128xbf16> to vector<128x128xbf16>
    %cst_17 = arith.constant dense<0.000000e+00> : vector<128x16xf32>
    %20 = tpu.matmul %19, %17, %cst_17 {dimension_numbers = #tpu.dot_dimension_numbers<[1], [0], [0], [1], [0, 0, 1, 1], [], []>} : vector<128x128xbf16>, vector<128x16xbf16>, vector<128x16xf32> -> vector<128x16xf32>
    %c0_18 = arith.constant 0 : index
    %c1 = arith.constant 1 : index
    %c0_19 = arith.constant 0 : index
    %c0_20 = arith.constant 0 : index
    %21 = vector.load %arg2[%c0_18, %c1, %c0_19, %c0_20] : memref<1x8x128x128xbf16, #tpu.memory_space<vmem>>, vector<1x1x128x128xbf16>
    %22 = vector.shape_cast %21 : vector<1x1x128x128xbf16> to vector<128x128xbf16>
    %cst_21 = arith.constant dense<0.000000e+00> : vector<128x16xf32>
    %23 = tpu.matmul %22, %17, %cst_21 {dimension_numbers = #tpu.dot_dimension_numbers<[1], [0], [0], [1], [0, 0, 1, 1], [], []>} : vector<128x128xbf16>, vector<128x16xbf16>, vector<128x16xf32> -> vector<128x16xf32>
    %24 = arith.maximumf %20, %23 : vector<128x16xf32>
    %c0_22 = arith.constant 0 : index
    %c2 = arith.constant 2 : index
    %c0_23 = arith.constant 0 : index
    %c0_24 = arith.constant 0 : index
    %25 = vector.load %arg2[%c0_22, %c2, %c0_23, %c0_24] : memref<1x8x128x128xbf16, #tpu.memory_space<vmem>>, vector<1x1x128x128xbf16>
    %26 = vector.shape_cast %25 : vector<1x1x128x128xbf16> to vector<128x128xbf16>
    %cst_25 = arith.constant dense<0.000000e+00> : vector<128x16xf32>
    %27 = tpu.matmul %26, %17, %cst_25 {dimension_numbers = #tpu.dot_dimension_numbers<[1], [0], [0], [1], [0, 0, 1, 1], [], []>} : vector<128x128xbf16>, vector<128x16xbf16>, vector<128x16xf32> -> vector<128x16xf32>
    %28 = arith.maximumf %24, %27 : vector<128x16xf32>
    %c0_26 = arith.constant 0 : index
    %c3 = arith.constant 3 : index
    %c0_27 = arith.constant 0 : index
    %c0_28 = arith.constant 0 : index
    %29 = vector.load %arg2[%c0_26, %c3, %c0_27, %c0_28] : memref<1x8x128x128xbf16, #tpu.memory_space<vmem>>, vector<1x1x128x128xbf16>
    %30 = vector.shape_cast %29 : vector<1x1x128x128xbf16> to vector<128x128xbf16>
    %cst_29 = arith.constant dense<0.000000e+00> : vector<128x16xf32>
    %31 = tpu.matmul %30, %17, %cst_29 {dimension_numbers = #tpu.dot_dimension_numbers<[1], [0], [0], [1], [0, 0, 1, 1], [], []>} : vector<128x128xbf16>, vector<128x16xbf16>, vector<128x16xf32> -> vector<128x16xf32>
    %32 = arith.maximumf %28, %31 : vector<128x16xf32>
    %c0_30 = arith.constant 0 : index
    %c4 = arith.constant 4 : index
    %c0_31 = arith.constant 0 : index
    %c0_32 = arith.constant 0 : index
    %33 = vector.load %arg2[%c0_30, %c4, %c0_31, %c0_32] : memref<1x8x128x128xbf16, #tpu.memory_space<vmem>>, vector<1x1x128x128xbf16>
    %34 = vector.shape_cast %33 : vector<1x1x128x128xbf16> to vector<128x128xbf16>
    %cst_33 = arith.constant dense<0.000000e+00> : vector<128x16xf32>
    %35 = tpu.matmul %34, %17, %cst_33 {dimension_numbers = #tpu.dot_dimension_numbers<[1], [0], [0], [1], [0, 0, 1, 1], [], []>} : vector<128x128xbf16>, vector<128x16xbf16>, vector<128x16xf32> -> vector<128x16xf32>
    %36 = arith.maximumf %32, %35 : vector<128x16xf32>
    %c0_34 = arith.constant 0 : index
    %c5 = arith.constant 5 : index
    %c0_35 = arith.constant 0 : index
    %c0_36 = arith.constant 0 : index
    %37 = vector.load %arg2[%c0_34, %c5, %c0_35, %c0_36] : memref<1x8x128x128xbf16, #tpu.memory_space<vmem>>, vector<1x1x128x128xbf16>
    %38 = vector.shape_cast %37 : vector<1x1x128x128xbf16> to vector<128x128xbf16>
    %cst_37 = arith.constant dense<0.000000e+00> : vector<128x16xf32>
    %39 = tpu.matmul %38, %17, %cst_37 {dimension_numbers = #tpu.dot_dimension_numbers<[1], [0], [0], [1], [0, 0, 1, 1], [], []>} : vector<128x128xbf16>, vector<128x16xbf16>, vector<128x16xf32> -> vector<128x16xf32>
    %40 = arith.maximumf %36, %39 : vector<128x16xf32>
    %c0_38 = arith.constant 0 : index
    %c6 = arith.constant 6 : index
    %c0_39 = arith.constant 0 : index
    %c0_40 = arith.constant 0 : index
    %41 = vector.load %arg2[%c0_38, %c6, %c0_39, %c0_40] : memref<1x8x128x128xbf16, #tpu.memory_space<vmem>>, vector<1x1x128x128xbf16>
    %42 = vector.shape_cast %41 : vector<1x1x128x128xbf16> to vector<128x128xbf16>
    %cst_41 = arith.constant dense<0.000000e+00> : vector<128x16xf32>
    %43 = tpu.matmul %42, %17, %cst_41 {dimension_numbers = #tpu.dot_dimension_numbers<[1], [0], [0], [1], [0, 0, 1, 1], [], []>} : vector<128x128xbf16>, vector<128x16xbf16>, vector<128x16xf32> -> vector<128x16xf32>
    %44 = arith.maximumf %40, %43 : vector<128x16xf32>
    %c0_42 = arith.constant 0 : index
    %c7 = arith.constant 7 : index
    %c0_43 = arith.constant 0 : index
    %c0_44 = arith.constant 0 : index
    %45 = vector.load %arg2[%c0_42, %c7, %c0_43, %c0_44] : memref<1x8x128x128xbf16, #tpu.memory_space<vmem>>, vector<1x1x128x128xbf16>
    %46 = vector.shape_cast %45 : vector<1x1x128x128xbf16> to vector<128x128xbf16>
    %cst_45 = arith.constant dense<0.000000e+00> : vector<128x16xf32>
    %47 = tpu.matmul %46, %17, %cst_45 {dimension_numbers = #tpu.dot_dimension_numbers<[1], [0], [0], [1], [0, 0, 1, 1], [], []>} : vector<128x128xbf16>, vector<128x16xbf16>, vector<128x16xf32> -> vector<128x16xf32>
    %48 = arith.maximumf %44, %47 : vector<128x16xf32>
    %c0_46 = arith.constant 0 : index
    %c0_47 = arith.constant 0 : index
    %49 = vector.load %arg15[%c0_46, %c0_47] : memref<16x32xbf16, #tpu.memory_space<vmem>>, vector<16x32xbf16>
    %50 = arith.truncf %8 : vector<128x16xf32> to vector<128x16xbf16>
    %cst_48 = arith.constant dense<0.000000e+00> : vector<128x32xf32>
    %51 = tpu.matmul %50, %49, %cst_48 {dimension_numbers = #tpu.dot_dimension_numbers<[1], [0], [0], [1], [0, 0, 1, 1], [], []>} : vector<128x16xbf16>, vector<16x32xbf16>, vector<128x32xf32> -> vector<128x32xf32>
    %c0_49 = arith.constant 0 : index
    %c0_50 = arith.constant 0 : index
    %52 = vector.load %arg14[%c0_49, %c0_50] : memref<1x32xf32, #tpu.memory_space<vmem>>, vector<1x32xf32>
    %53 = vector.broadcast %52 : vector<1x32xf32> to vector<128x32xf32>
    %54 = arith.addf %51, %53 : vector<128x32xf32>
    %c0_51 = arith.constant 0 : index
    %c0_52 = arith.constant 0 : index
    %55 = vector.load %arg13[%c0_51, %c0_52] : memref<16x32xbf16, #tpu.memory_space<vmem>>, vector<16x32xbf16>
    %56 = arith.truncf %48 : vector<128x16xf32> to vector<128x16xbf16>
    %cst_53 = arith.constant dense<0.000000e+00> : vector<128x32xf32>
    %57 = tpu.matmul %56, %55, %cst_53 {dimension_numbers = #tpu.dot_dimension_numbers<[1], [0], [0], [1], [0, 0, 1, 1], [], []>} : vector<128x16xbf16>, vector<16x32xbf16>, vector<128x32xf32> -> vector<128x32xf32>
    %c0_54 = arith.constant 0 : index
    %c0_55 = arith.constant 0 : index
    %58 = vector.load %arg12[%c0_54, %c0_55] : memref<1x32xf32, #tpu.memory_space<vmem>>, vector<1x32xf32>
    %59 = vector.broadcast %58 : vector<1x32xf32> to vector<128x32xf32>
    %60 = arith.addf %57, %59 : vector<128x32xf32>
    %61 = arith.addf %60, %54 : vector<128x32xf32>
    %cst_56 = arith.constant 0.000000e+00 : f32
    %62 = vector.broadcast %cst_56 : f32 to vector<128x32xf32>
    %63 = arith.maximumf %61, %62 : vector<128x32xf32>
    %c0_57 = arith.constant 0 : index
    %c0_58 = arith.constant 0 : index
    %64 = vector.load %arg17[%c0_57, %c0_58] : memref<32x16xbf16, #tpu.memory_space<vmem>>, vector<32x16xbf16>
    %65 = arith.truncf %63 : vector<128x32xf32> to vector<128x32xbf16>
    %cst_59 = arith.constant dense<0.000000e+00> : vector<128x16xf32>
    %66 = tpu.matmul %65, %64, %cst_59 {dimension_numbers = #tpu.dot_dimension_numbers<[1], [0], [0], [1], [0, 0, 1, 1], [], []>} : vector<128x32xbf16>, vector<32x16xbf16>, vector<128x16xf32> -> vector<128x16xf32>
    %c0_60 = arith.constant 0 : index
    %c0_61 = arith.constant 0 : index
    %67 = vector.load %arg16[%c0_60, %c0_61] : memref<1x16xf32, #tpu.memory_space<vmem>>, vector<1x16xf32>
    %68 = vector.broadcast %67 : vector<1x16xf32> to vector<128x16xf32>
    %69 = arith.addf %66, %68 : vector<128x16xf32>
    %cst_62 = arith.constant 0.000000e+00 : f32
    %70 = vector.broadcast %cst_62 : f32 to vector<128x16xf32>
    %71 = arith.maximumf %69, %70 : vector<128x16xf32>
    %72 = arith.truncf %71 : vector<128x16xf32> to vector<128x16xbf16>
    %c0_63 = arith.constant 0 : index
    %c0_64 = arith.constant 0 : index
    %c0_65 = arith.constant 0 : index
    %c0_66 = arith.constant 0 : index
    %73 = vector.load %arg2[%c0_63, %c0_64, %c0_65, %c0_66] : memref<1x8x128x128xbf16, #tpu.memory_space<vmem>>, vector<1x1x128x128xbf16>
    %74 = vector.shape_cast %73 : vector<1x1x128x128xbf16> to vector<128x128xbf16>
    %cst_67 = arith.constant dense<0.000000e+00> : vector<128x16xf32>
    %75 = tpu.matmul %74, %72, %cst_67 {dimension_numbers = #tpu.dot_dimension_numbers<[1], [0], [0], [1], [0, 0, 1, 1], [], []>} : vector<128x128xbf16>, vector<128x16xbf16>, vector<128x16xf32> -> vector<128x16xf32>
    %c0_68 = arith.constant 0 : index
    %c1_69 = arith.constant 1 : index
    %c0_70 = arith.constant 0 : index
    %c0_71 = arith.constant 0 : index
    %76 = vector.load %arg2[%c0_68, %c1_69, %c0_70, %c0_71] : memref<1x8x128x128xbf16, #tpu.memory_space<vmem>>, vector<1x1x128x128xbf16>
    %77 = vector.shape_cast %76 : vector<1x1x128x128xbf16> to vector<128x128xbf16>
    %cst_72 = arith.constant dense<0.000000e+00> : vector<128x16xf32>
    %78 = tpu.matmul %77, %72, %cst_72 {dimension_numbers = #tpu.dot_dimension_numbers<[1], [0], [0], [1], [0, 0, 1, 1], [], []>} : vector<128x128xbf16>, vector<128x16xbf16>, vector<128x16xf32> -> vector<128x16xf32>
    %79 = arith.maximumf %75, %78 : vector<128x16xf32>
    %c0_73 = arith.constant 0 : index
    %c2_74 = arith.constant 2 : index
    %c0_75 = arith.constant 0 : index
    %c0_76 = arith.constant 0 : index
    %80 = vector.load %arg2[%c0_73, %c2_74, %c0_75, %c0_76] : memref<1x8x128x128xbf16, #tpu.memory_space<vmem>>, vector<1x1x128x128xbf16>
    %81 = vector.shape_cast %80 : vector<1x1x128x128xbf16> to vector<128x128xbf16>
    %cst_77 = arith.constant dense<0.000000e+00> : vector<128x16xf32>
    %82 = tpu.matmul %81, %72, %cst_77 {dimension_numbers = #tpu.dot_dimension_numbers<[1], [0], [0], [1], [0, 0, 1, 1], [], []>} : vector<128x128xbf16>, vector<128x16xbf16>, vector<128x16xf32> -> vector<128x16xf32>
    %83 = arith.maximumf %79, %82 : vector<128x16xf32>
    %c0_78 = arith.constant 0 : index
    %c3_79 = arith.constant 3 : index
    %c0_80 = arith.constant 0 : index
    %c0_81 = arith.constant 0 : index
    %84 = vector.load %arg2[%c0_78, %c3_79, %c0_80, %c0_81] : memref<1x8x128x128xbf16, #tpu.memory_space<vmem>>, vector<1x1x128x128xbf16>
    %85 = vector.shape_cast %84 : vector<1x1x128x128xbf16> to vector<128x128xbf16>
    %cst_82 = arith.constant dense<0.000000e+00> : vector<128x16xf32>
    %86 = tpu.matmul %85, %72, %cst_82 {dimension_numbers = #tpu.dot_dimension_numbers<[1], [0], [0], [1], [0, 0, 1, 1], [], []>} : vector<128x128xbf16>, vector<128x16xbf16>, vector<128x16xf32> -> vector<128x16xf32>
    %87 = arith.maximumf %83, %86 : vector<128x16xf32>
    %c0_83 = arith.constant 0 : index
    %c4_84 = arith.constant 4 : index
    %c0_85 = arith.constant 0 : index
    %c0_86 = arith.constant 0 : index
    %88 = vector.load %arg2[%c0_83, %c4_84, %c0_85, %c0_86] : memref<1x8x128x128xbf16, #tpu.memory_space<vmem>>, vector<1x1x128x128xbf16>
    %89 = vector.shape_cast %88 : vector<1x1x128x128xbf16> to vector<128x128xbf16>
    %cst_87 = arith.constant dense<0.000000e+00> : vector<128x16xf32>
    %90 = tpu.matmul %89, %72, %cst_87 {dimension_numbers = #tpu.dot_dimension_numbers<[1], [0], [0], [1], [0, 0, 1, 1], [], []>} : vector<128x128xbf16>, vector<128x16xbf16>, vector<128x16xf32> -> vector<128x16xf32>
    %91 = arith.maximumf %87, %90 : vector<128x16xf32>
    %c0_88 = arith.constant 0 : index
    %c5_89 = arith.constant 5 : index
    %c0_90 = arith.constant 0 : index
    %c0_91 = arith.constant 0 : index
    %92 = vector.load %arg2[%c0_88, %c5_89, %c0_90, %c0_91] : memref<1x8x128x128xbf16, #tpu.memory_space<vmem>>, vector<1x1x128x128xbf16>
    %93 = vector.shape_cast %92 : vector<1x1x128x128xbf16> to vector<128x128xbf16>
    %cst_92 = arith.constant dense<0.000000e+00> : vector<128x16xf32>
    %94 = tpu.matmul %93, %72, %cst_92 {dimension_numbers = #tpu.dot_dimension_numbers<[1], [0], [0], [1], [0, 0, 1, 1], [], []>} : vector<128x128xbf16>, vector<128x16xbf16>, vector<128x16xf32> -> vector<128x16xf32>
    %95 = arith.maximumf %91, %94 : vector<128x16xf32>
    %c0_93 = arith.constant 0 : index
    %c6_94 = arith.constant 6 : index
    %c0_95 = arith.constant 0 : index
    %c0_96 = arith.constant 0 : index
    %96 = vector.load %arg2[%c0_93, %c6_94, %c0_95, %c0_96] : memref<1x8x128x128xbf16, #tpu.memory_space<vmem>>, vector<1x1x128x128xbf16>
    %97 = vector.shape_cast %96 : vector<1x1x128x128xbf16> to vector<128x128xbf16>
    %cst_97 = arith.constant dense<0.000000e+00> : vector<128x16xf32>
    %98 = tpu.matmul %97, %72, %cst_97 {dimension_numbers = #tpu.dot_dimension_numbers<[1], [0], [0], [1], [0, 0, 1, 1], [], []>} : vector<128x128xbf16>, vector<128x16xbf16>, vector<128x16xf32> -> vector<128x16xf32>
    %99 = arith.maximumf %95, %98 : vector<128x16xf32>
    %c0_98 = arith.constant 0 : index
    %c7_99 = arith.constant 7 : index
    %c0_100 = arith.constant 0 : index
    %c0_101 = arith.constant 0 : index
    %100 = vector.load %arg2[%c0_98, %c7_99, %c0_100, %c0_101] : memref<1x8x128x128xbf16, #tpu.memory_space<vmem>>, vector<1x1x128x128xbf16>
    %101 = vector.shape_cast %100 : vector<1x1x128x128xbf16> to vector<128x128xbf16>
    %cst_102 = arith.constant dense<0.000000e+00> : vector<128x16xf32>
    %102 = tpu.matmul %101, %72, %cst_102 {dimension_numbers = #tpu.dot_dimension_numbers<[1], [0], [0], [1], [0, 0, 1, 1], [], []>} : vector<128x128xbf16>, vector<128x16xbf16>, vector<128x16xf32> -> vector<128x16xf32>
    %103 = arith.maximumf %99, %102 : vector<128x16xf32>
    %c0_103 = arith.constant 0 : index
    %c0_104 = arith.constant 0 : index
    %104 = vector.load %arg19[%c0_103, %c0_104] : memref<16x32xbf16, #tpu.memory_space<vmem>>, vector<16x32xbf16>
    %105 = arith.truncf %103 : vector<128x16xf32> to vector<128x16xbf16>
    %cst_105 = arith.constant dense<0.000000e+00> : vector<128x32xf32>
    %106 = tpu.matmul %105, %104, %cst_105 {dimension_numbers = #tpu.dot_dimension_numbers<[1], [0], [0], [1], [0, 0, 1, 1], [], []>} : vector<128x16xbf16>, vector<16x32xbf16>, vector<128x32xf32> -> vector<128x32xf32>
    %c0_106 = arith.constant 0 : index
    %c0_107 = arith.constant 0 : index
    %107 = vector.load %arg18[%c0_106, %c0_107] : memref<1x32xf32, #tpu.memory_space<vmem>>, vector<1x32xf32>
    %108 = vector.broadcast %107 : vector<1x32xf32> to vector<128x32xf32>
    %109 = arith.addf %106, %108 : vector<128x32xf32>
    %110 = arith.addf %109, %63 : vector<128x32xf32>
    %cst_108 = arith.constant 0.000000e+00 : f32
    %111 = vector.broadcast %cst_108 : f32 to vector<128x32xf32>
    %112 = arith.maximumf %110, %111 : vector<128x32xf32>
    %c0_109 = arith.constant 0 : index
    %c0_110 = arith.constant 0 : index
    %113 = vector.load %arg21[%c0_109, %c0_110] : memref<32x32xbf16, #tpu.memory_space<vmem>>, vector<32x32xbf16>
    %114 = arith.truncf %112 : vector<128x32xf32> to vector<128x32xbf16>
    %cst_111 = arith.constant dense<0.000000e+00> : vector<128x32xf32>
    %115 = tpu.matmul %114, %113, %cst_111 {dimension_numbers = #tpu.dot_dimension_numbers<[1], [0], [0], [1], [0, 0, 1, 1], [], []>} : vector<128x32xbf16>, vector<32x32xbf16>, vector<128x32xf32> -> vector<128x32xf32>
    %c0_112 = arith.constant 0 : index
    %c0_113 = arith.constant 0 : index
    %116 = vector.load %arg20[%c0_112, %c0_113] : memref<1x32xf32, #tpu.memory_space<vmem>>, vector<1x32xf32>
    %117 = vector.broadcast %116 : vector<1x32xf32> to vector<128x32xf32>
    %118 = arith.addf %115, %117 : vector<128x32xf32>
    %cst_114 = arith.constant 0.000000e+00 : f32
    %119 = vector.broadcast %cst_114 : f32 to vector<128x32xf32>
    %120 = arith.maximumf %118, %119 : vector<128x32xf32>
    %121 = arith.truncf %120 : vector<128x32xf32> to vector<128x32xbf16>
    %c0_115 = arith.constant 0 : index
    %c0_116 = arith.constant 0 : index
    %c0_117 = arith.constant 0 : index
    %c0_118 = arith.constant 0 : index
    %122 = vector.load %arg3[%c0_115, %c0_116, %c0_117, %c0_118] : memref<1x8x64x128xbf16, #tpu.memory_space<vmem>>, vector<1x1x64x128xbf16>
    %123 = vector.shape_cast %122 : vector<1x1x64x128xbf16> to vector<64x128xbf16>
    %cst_119 = arith.constant dense<0.000000e+00> : vector<64x32xf32>
    %124 = tpu.matmul %123, %121, %cst_119 {dimension_numbers = #tpu.dot_dimension_numbers<[1], [0], [0], [1], [0, 0, 1, 1], [], []>} : vector<64x128xbf16>, vector<128x32xbf16>, vector<64x32xf32> -> vector<64x32xf32>
    %c0_120 = arith.constant 0 : index
    %c1_121 = arith.constant 1 : index
    %c0_122 = arith.constant 0 : index
    %c0_123 = arith.constant 0 : index
    %125 = vector.load %arg3[%c0_120, %c1_121, %c0_122, %c0_123] : memref<1x8x64x128xbf16, #tpu.memory_space<vmem>>, vector<1x1x64x128xbf16>
    %126 = vector.shape_cast %125 : vector<1x1x64x128xbf16> to vector<64x128xbf16>
    %cst_124 = arith.constant dense<0.000000e+00> : vector<64x32xf32>
    %127 = tpu.matmul %126, %121, %cst_124 {dimension_numbers = #tpu.dot_dimension_numbers<[1], [0], [0], [1], [0, 0, 1, 1], [], []>} : vector<64x128xbf16>, vector<128x32xbf16>, vector<64x32xf32> -> vector<64x32xf32>
    %128 = arith.maximumf %124, %127 : vector<64x32xf32>
    %c0_125 = arith.constant 0 : index
    %c2_126 = arith.constant 2 : index
    %c0_127 = arith.constant 0 : index
    %c0_128 = arith.constant 0 : index
    %129 = vector.load %arg3[%c0_125, %c2_126, %c0_127, %c0_128] : memref<1x8x64x128xbf16, #tpu.memory_space<vmem>>, vector<1x1x64x128xbf16>
    %130 = vector.shape_cast %129 : vector<1x1x64x128xbf16> to vector<64x128xbf16>
    %cst_129 = arith.constant dense<0.000000e+00> : vector<64x32xf32>
    %131 = tpu.matmul %130, %121, %cst_129 {dimension_numbers = #tpu.dot_dimension_numbers<[1], [0], [0], [1], [0, 0, 1, 1], [], []>} : vector<64x128xbf16>, vector<128x32xbf16>, vector<64x32xf32> -> vector<64x32xf32>
    %132 = arith.maximumf %128, %131 : vector<64x32xf32>
    %c0_130 = arith.constant 0 : index
    %c3_131 = arith.constant 3 : index
    %c0_132 = arith.constant 0 : index
    %c0_133 = arith.constant 0 : index
    %133 = vector.load %arg3[%c0_130, %c3_131, %c0_132, %c0_133] : memref<1x8x64x128xbf16, #tpu.memory_space<vmem>>, vector<1x1x64x128xbf16>
    %134 = vector.shape_cast %133 : vector<1x1x64x128xbf16> to vector<64x128xbf16>
    %cst_134 = arith.constant dense<0.000000e+00> : vector<64x32xf32>
    %135 = tpu.matmul %134, %121, %cst_134 {dimension_numbers = #tpu.dot_dimension_numbers<[1], [0], [0], [1], [0, 0, 1, 1], [], []>} : vector<64x128xbf16>, vector<128x32xbf16>, vector<64x32xf32> -> vector<64x32xf32>
    %136 = arith.maximumf %132, %135 : vector<64x32xf32>
    %c0_135 = arith.constant 0 : index
    %c4_136 = arith.constant 4 : index
    %c0_137 = arith.constant 0 : index
    %c0_138 = arith.constant 0 : index
    %137 = vector.load %arg3[%c0_135, %c4_136, %c0_137, %c0_138] : memref<1x8x64x128xbf16, #tpu.memory_space<vmem>>, vector<1x1x64x128xbf16>
    %138 = vector.shape_cast %137 : vector<1x1x64x128xbf16> to vector<64x128xbf16>
    %cst_139 = arith.constant dense<0.000000e+00> : vector<64x32xf32>
    %139 = tpu.matmul %138, %121, %cst_139 {dimension_numbers = #tpu.dot_dimension_numbers<[1], [0], [0], [1], [0, 0, 1, 1], [], []>} : vector<64x128xbf16>, vector<128x32xbf16>, vector<64x32xf32> -> vector<64x32xf32>
    %140 = arith.maximumf %136, %139 : vector<64x32xf32>
    %c0_140 = arith.constant 0 : index
    %c5_141 = arith.constant 5 : index
    %c0_142 = arith.constant 0 : index
    %c0_143 = arith.constant 0 : index
    %141 = vector.load %arg3[%c0_140, %c5_141, %c0_142, %c0_143] : memref<1x8x64x128xbf16, #tpu.memory_space<vmem>>, vector<1x1x64x128xbf16>
    %142 = vector.shape_cast %141 : vector<1x1x64x128xbf16> to vector<64x128xbf16>
    %cst_144 = arith.constant dense<0.000000e+00> : vector<64x32xf32>
    %143 = tpu.matmul %142, %121, %cst_144 {dimension_numbers = #tpu.dot_dimension_numbers<[1], [0], [0], [1], [0, 0, 1, 1], [], []>} : vector<64x128xbf16>, vector<128x32xbf16>, vector<64x32xf32> -> vector<64x32xf32>
    %144 = arith.maximumf %140, %143 : vector<64x32xf32>
    %c0_145 = arith.constant 0 : index
    %c6_146 = arith.constant 6 : index
    %c0_147 = arith.constant 0 : index
    %c0_148 = arith.constant 0 : index
    %145 = vector.load %arg3[%c0_145, %c6_146, %c0_147, %c0_148] : memref<1x8x64x128xbf16, #tpu.memory_space<vmem>>, vector<1x1x64x128xbf16>
    %146 = vector.shape_cast %145 : vector<1x1x64x128xbf16> to vector<64x128xbf16>
    %cst_149 = arith.constant dense<0.000000e+00> : vector<64x32xf32>
    %147 = tpu.matmul %146, %121, %cst_149 {dimension_numbers = #tpu.dot_dimension_numbers<[1], [0], [0], [1], [0, 0, 1, 1], [], []>} : vector<64x128xbf16>, vector<128x32xbf16>, vector<64x32xf32> -> vector<64x32xf32>
    %148 = arith.maximumf %144, %147 : vector<64x32xf32>
    %c0_150 = arith.constant 0 : index
    %c7_151 = arith.constant 7 : index
    %c0_152 = arith.constant 0 : index
    %c0_153 = arith.constant 0 : index
    %149 = vector.load %arg3[%c0_150, %c7_151, %c0_152, %c0_153] : memref<1x8x64x128xbf16, #tpu.memory_space<vmem>>, vector<1x1x64x128xbf16>
    %150 = vector.shape_cast %149 : vector<1x1x64x128xbf16> to vector<64x128xbf16>
    %cst_154 = arith.constant dense<0.000000e+00> : vector<64x32xf32>
    %151 = tpu.matmul %150, %121, %cst_154 {dimension_numbers = #tpu.dot_dimension_numbers<[1], [0], [0], [1], [0, 0, 1, 1], [], []>} : vector<64x128xbf16>, vector<128x32xbf16>, vector<64x32xf32> -> vector<64x32xf32>
    %152 = arith.maximumf %148, %151 : vector<64x32xf32>
    %153 = arith.truncf %112 : vector<128x32xf32> to vector<128x32xbf16>
    %c0_155 = arith.constant 0 : index
    %c0_156 = arith.constant 0 : index
    %c0_157 = arith.constant 0 : index
    %c0_158 = arith.constant 0 : index
    %154 = vector.load %arg3[%c0_155, %c0_156, %c0_157, %c0_158] : memref<1x8x64x128xbf16, #tpu.memory_space<vmem>>, vector<1x1x64x128xbf16>
    %155 = vector.shape_cast %154 : vector<1x1x64x128xbf16> to vector<64x128xbf16>
    %cst_159 = arith.constant dense<0.000000e+00> : vector<64x32xf32>
    %156 = tpu.matmul %155, %153, %cst_159 {dimension_numbers = #tpu.dot_dimension_numbers<[1], [0], [0], [1], [0, 0, 1, 1], [], []>} : vector<64x128xbf16>, vector<128x32xbf16>, vector<64x32xf32> -> vector<64x32xf32>
    %c0_160 = arith.constant 0 : index
    %c1_161 = arith.constant 1 : index
    %c0_162 = arith.constant 0 : index
    %c0_163 = arith.constant 0 : index
    %157 = vector.load %arg3[%c0_160, %c1_161, %c0_162, %c0_163] : memref<1x8x64x128xbf16, #tpu.memory_space<vmem>>, vector<1x1x64x128xbf16>
    %158 = vector.shape_cast %157 : vector<1x1x64x128xbf16> to vector<64x128xbf16>
    %cst_164 = arith.constant dense<0.000000e+00> : vector<64x32xf32>
    %159 = tpu.matmul %158, %153, %cst_164 {dimension_numbers = #tpu.dot_dimension_numbers<[1], [0], [0], [1], [0, 0, 1, 1], [], []>} : vector<64x128xbf16>, vector<128x32xbf16>, vector<64x32xf32> -> vector<64x32xf32>
    %160 = arith.maximumf %156, %159 : vector<64x32xf32>
    %c0_165 = arith.constant 0 : index
    %c2_166 = arith.constant 2 : index
    %c0_167 = arith.constant 0 : index
    %c0_168 = arith.constant 0 : index
    %161 = vector.load %arg3[%c0_165, %c2_166, %c0_167, %c0_168] : memref<1x8x64x128xbf16, #tpu.memory_space<vmem>>, vector<1x1x64x128xbf16>
    %162 = vector.shape_cast %161 : vector<1x1x64x128xbf16> to vector<64x128xbf16>
    %cst_169 = arith.constant dense<0.000000e+00> : vector<64x32xf32>
    %163 = tpu.matmul %162, %153, %cst_169 {dimension_numbers = #tpu.dot_dimension_numbers<[1], [0], [0], [1], [0, 0, 1, 1], [], []>} : vector<64x128xbf16>, vector<128x32xbf16>, vector<64x32xf32> -> vector<64x32xf32>
    %164 = arith.maximumf %160, %163 : vector<64x32xf32>
    %c0_170 = arith.constant 0 : index
    %c3_171 = arith.constant 3 : index
    %c0_172 = arith.constant 0 : index
    %c0_173 = arith.constant 0 : index
    %165 = vector.load %arg3[%c0_170, %c3_171, %c0_172, %c0_173] : memref<1x8x64x128xbf16, #tpu.memory_space<vmem>>, vector<1x1x64x128xbf16>
    %166 = vector.shape_cast %165 : vector<1x1x64x128xbf16> to vector<64x128xbf16>
    %cst_174 = arith.constant dense<0.000000e+00> : vector<64x32xf32>
    %167 = tpu.matmul %166, %153, %cst_174 {dimension_numbers = #tpu.dot_dimension_numbers<[1], [0], [0], [1], [0, 0, 1, 1], [], []>} : vector<64x128xbf16>, vector<128x32xbf16>, vector<64x32xf32> -> vector<64x32xf32>
    %168 = arith.maximumf %164, %167 : vector<64x32xf32>
    %c0_175 = arith.constant 0 : index
    %c4_176 = arith.constant 4 : index
    %c0_177 = arith.constant 0 : index
    %c0_178 = arith.constant 0 : index
    %169 = vector.load %arg3[%c0_175, %c4_176, %c0_177, %c0_178] : memref<1x8x64x128xbf16, #tpu.memory_space<vmem>>, vector<1x1x64x128xbf16>
    %170 = vector.shape_cast %169 : vector<1x1x64x128xbf16> to vector<64x128xbf16>
    %cst_179 = arith.constant dense<0.000000e+00> : vector<64x32xf32>
    %171 = tpu.matmul %170, %153, %cst_179 {dimension_numbers = #tpu.dot_dimension_numbers<[1], [0], [0], [1], [0, 0, 1, 1], [], []>} : vector<64x128xbf16>, vector<128x32xbf16>, vector<64x32xf32> -> vector<64x32xf32>
    %172 = arith.maximumf %168, %171 : vector<64x32xf32>
    %c0_180 = arith.constant 0 : index
    %c5_181 = arith.constant 5 : index
    %c0_182 = arith.constant 0 : index
    %c0_183 = arith.constant 0 : index
    %173 = vector.load %arg3[%c0_180, %c5_181, %c0_182, %c0_183] : memref<1x8x64x128xbf16, #tpu.memory_space<vmem>>, vector<1x1x64x128xbf16>
    %174 = vector.shape_cast %173 : vector<1x1x64x128xbf16> to vector<64x128xbf16>
    %cst_184 = arith.constant dense<0.000000e+00> : vector<64x32xf32>
    %175 = tpu.matmul %174, %153, %cst_184 {dimension_numbers = #tpu.dot_dimension_numbers<[1], [0], [0], [1], [0, 0, 1, 1], [], []>} : vector<64x128xbf16>, vector<128x32xbf16>, vector<64x32xf32> -> vector<64x32xf32>
    %176 = arith.maximumf %172, %175 : vector<64x32xf32>
    %c0_185 = arith.constant 0 : index
    %c6_186 = arith.constant 6 : index
    %c0_187 = arith.constant 0 : index
    %c0_188 = arith.constant 0 : index
    %177 = vector.load %arg3[%c0_185, %c6_186, %c0_187, %c0_188] : memref<1x8x64x128xbf16, #tpu.memory_space<vmem>>, vector<1x1x64x128xbf16>
    %178 = vector.shape_cast %177 : vector<1x1x64x128xbf16> to vector<64x128xbf16>
    %cst_189 = arith.constant dense<0.000000e+00> : vector<64x32xf32>
    %179 = tpu.matmul %178, %153, %cst_189 {dimension_numbers = #tpu.dot_dimension_numbers<[1], [0], [0], [1], [0, 0, 1, 1], [], []>} : vector<64x128xbf16>, vector<128x32xbf16>, vector<64x32xf32> -> vector<64x32xf32>
    %180 = arith.maximumf %176, %179 : vector<64x32xf32>
    %c0_190 = arith.constant 0 : index
    %c7_191 = arith.constant 7 : index
    %c0_192 = arith.constant 0 : index
    %c0_193 = arith.constant 0 : index
    %181 = vector.load %arg3[%c0_190, %c7_191, %c0_192, %c0_193] : memref<1x8x64x128xbf16, #tpu.memory_space<vmem>>, vector<1x1x64x128xbf16>
    %182 = vector.shape_cast %181 : vector<1x1x64x128xbf16> to vector<64x128xbf16>
    %cst_194 = arith.constant dense<0.000000e+00> : vector<64x32xf32>
    %183 = tpu.matmul %182, %153, %cst_194 {dimension_numbers = #tpu.dot_dimension_numbers<[1], [0], [0], [1], [0, 0, 1, 1], [], []>} : vector<64x128xbf16>, vector<128x32xbf16>, vector<64x32xf32> -> vector<64x32xf32>
    %184 = arith.maximumf %180, %183 : vector<64x32xf32>
    %c0_195 = arith.constant 0 : index
    %c0_196 = arith.constant 0 : index
    %185 = vector.load %arg25[%c0_195, %c0_196] : memref<32x64xbf16, #tpu.memory_space<vmem>>, vector<32x64xbf16>
    %186 = arith.truncf %184 : vector<64x32xf32> to vector<64x32xbf16>
    %cst_197 = arith.constant dense<0.000000e+00> : vector<64x64xf32>
    %187 = tpu.matmul %186, %185, %cst_197 {dimension_numbers = #tpu.dot_dimension_numbers<[1], [0], [0], [1], [0, 0, 1, 1], [], []>} : vector<64x32xbf16>, vector<32x64xbf16>, vector<64x64xf32> -> vector<64x64xf32>
    %c0_198 = arith.constant 0 : index
    %c0_199 = arith.constant 0 : index
    %188 = vector.load %arg24[%c0_198, %c0_199] : memref<1x64xf32, #tpu.memory_space<vmem>>, vector<1x64xf32>
    %189 = vector.broadcast %188 : vector<1x64xf32> to vector<64x64xf32>
    %190 = arith.addf %187, %189 : vector<64x64xf32>
    %c0_200 = arith.constant 0 : index
    %c0_201 = arith.constant 0 : index
    %191 = vector.load %arg23[%c0_200, %c0_201] : memref<32x64xbf16, #tpu.memory_space<vmem>>, vector<32x64xbf16>
    %192 = arith.truncf %152 : vector<64x32xf32> to vector<64x32xbf16>
    %cst_202 = arith.constant dense<0.000000e+00> : vector<64x64xf32>
    %193 = tpu.matmul %192, %191, %cst_202 {dimension_numbers = #tpu.dot_dimension_numbers<[1], [0], [0], [1], [0, 0, 1, 1], [], []>} : vector<64x32xbf16>, vector<32x64xbf16>, vector<64x64xf32> -> vector<64x64xf32>
    %c0_203 = arith.constant 0 : index
    %c0_204 = arith.constant 0 : index
    %194 = vector.load %arg22[%c0_203, %c0_204] : memref<1x64xf32, #tpu.memory_space<vmem>>, vector<1x64xf32>
    %195 = vector.broadcast %194 : vector<1x64xf32> to vector<64x64xf32>
    %196 = arith.addf %193, %195 : vector<64x64xf32>
    %197 = arith.addf %196, %190 : vector<64x64xf32>
    %cst_205 = arith.constant 0.000000e+00 : f32
    %198 = vector.broadcast %cst_205 : f32 to vector<64x64xf32>
    %199 = arith.maximumf %197, %198 : vector<64x64xf32>
    %c0_206 = arith.constant 0 : index
    %c0_207 = arith.constant 0 : index
    %200 = vector.load %arg27[%c0_206, %c0_207] : memref<64x32xbf16, #tpu.memory_space<vmem>>, vector<64x32xbf16>
    %201 = arith.truncf %199 : vector<64x64xf32> to vector<64x64xbf16>
    %cst_208 = arith.constant dense<0.000000e+00> : vector<64x32xf32>
    %202 = tpu.matmul %201, %200, %cst_208 {dimension_numbers = #tpu.dot_dimension_numbers<[1], [0], [0], [1], [0, 0, 1, 1], [], []>} : vector<64x64xbf16>, vector<64x32xbf16>, vector<64x32xf32> -> vector<64x32xf32>
    %c0_209 = arith.constant 0 : index
    %c0_210 = arith.constant 0 : index
    %203 = vector.load %arg26[%c0_209, %c0_210] : memref<1x32xf32, #tpu.memory_space<vmem>>, vector<1x32xf32>
    %204 = vector.broadcast %203 : vector<1x32xf32> to vector<64x32xf32>
    %205 = arith.addf %202, %204 : vector<64x32xf32>
    %cst_211 = arith.constant 0.000000e+00 : f32
    %206 = vector.broadcast %cst_211 : f32 to vector<64x32xf32>
    %207 = arith.maximumf %205, %206 : vector<64x32xf32>
    %208 = arith.truncf %207 : vector<64x32xf32> to vector<64x32xbf16>
    %c0_212 = arith.constant 0 : index
    %c0_213 = arith.constant 0 : index
    %c0_214 = arith.constant 0 : index
    %c0_215 = arith.constant 0 : index
    %209 = vector.load %arg4[%c0_212, %c0_213, %c0_214, %c0_215] : memref<1x8x64x64xbf16, #tpu.memory_space<vmem>>, vector<1x1x64x64xbf16>
    %210 = vector.shape_cast %209 : vector<1x1x64x64xbf16> to vector<64x64xbf16>
    %cst_216 = arith.constant dense<0.000000e+00> : vector<64x32xf32>
    %211 = tpu.matmul %210, %208, %cst_216 {dimension_numbers = #tpu.dot_dimension_numbers<[1], [0], [0], [1], [0, 0, 1, 1], [], []>} : vector<64x64xbf16>, vector<64x32xbf16>, vector<64x32xf32> -> vector<64x32xf32>
    %c0_217 = arith.constant 0 : index
    %c1_218 = arith.constant 1 : index
    %c0_219 = arith.constant 0 : index
    %c0_220 = arith.constant 0 : index
    %212 = vector.load %arg4[%c0_217, %c1_218, %c0_219, %c0_220] : memref<1x8x64x64xbf16, #tpu.memory_space<vmem>>, vector<1x1x64x64xbf16>
    %213 = vector.shape_cast %212 : vector<1x1x64x64xbf16> to vector<64x64xbf16>
    %cst_221 = arith.constant dense<0.000000e+00> : vector<64x32xf32>
    %214 = tpu.matmul %213, %208, %cst_221 {dimension_numbers = #tpu.dot_dimension_numbers<[1], [0], [0], [1], [0, 0, 1, 1], [], []>} : vector<64x64xbf16>, vector<64x32xbf16>, vector<64x32xf32> -> vector<64x32xf32>
    %215 = arith.maximumf %211, %214 : vector<64x32xf32>
    %c0_222 = arith.constant 0 : index
    %c2_223 = arith.constant 2 : index
    %c0_224 = arith.constant 0 : index
    %c0_225 = arith.constant 0 : index
    %216 = vector.load %arg4[%c0_222, %c2_223, %c0_224, %c0_225] : memref<1x8x64x64xbf16, #tpu.memory_space<vmem>>, vector<1x1x64x64xbf16>
    %217 = vector.shape_cast %216 : vector<1x1x64x64xbf16> to vector<64x64xbf16>
    %cst_226 = arith.constant dense<0.000000e+00> : vector<64x32xf32>
    %218 = tpu.matmul %217, %208, %cst_226 {dimension_numbers = #tpu.dot_dimension_numbers<[1], [0], [0], [1], [0, 0, 1, 1], [], []>} : vector<64x64xbf16>, vector<64x32xbf16>, vector<64x32xf32> -> vector<64x32xf32>
    %219 = arith.maximumf %215, %218 : vector<64x32xf32>
    %c0_227 = arith.constant 0 : index
    %c3_228 = arith.constant 3 : index
    %c0_229 = arith.constant 0 : index
    %c0_230 = arith.constant 0 : index
    %220 = vector.load %arg4[%c0_227, %c3_228, %c0_229, %c0_230] : memref<1x8x64x64xbf16, #tpu.memory_space<vmem>>, vector<1x1x64x64xbf16>
    %221 = vector.shape_cast %220 : vector<1x1x64x64xbf16> to vector<64x64xbf16>
    %cst_231 = arith.constant dense<0.000000e+00> : vector<64x32xf32>
    %222 = tpu.matmul %221, %208, %cst_231 {dimension_numbers = #tpu.dot_dimension_numbers<[1], [0], [0], [1], [0, 0, 1, 1], [], []>} : vector<64x64xbf16>, vector<64x32xbf16>, vector<64x32xf32> -> vector<64x32xf32>
    %223 = arith.maximumf %219, %222 : vector<64x32xf32>
    %c0_232 = arith.constant 0 : index
    %c4_233 = arith.constant 4 : index
    %c0_234 = arith.constant 0 : index
    %c0_235 = arith.constant 0 : index
    %224 = vector.load %arg4[%c0_232, %c4_233, %c0_234, %c0_235] : memref<1x8x64x64xbf16, #tpu.memory_space<vmem>>, vector<1x1x64x64xbf16>
    %225 = vector.shape_cast %224 : vector<1x1x64x64xbf16> to vector<64x64xbf16>
    %cst_236 = arith.constant dense<0.000000e+00> : vector<64x32xf32>
    %226 = tpu.matmul %225, %208, %cst_236 {dimension_numbers = #tpu.dot_dimension_numbers<[1], [0], [0], [1], [0, 0, 1, 1], [], []>} : vector<64x64xbf16>, vector<64x32xbf16>, vector<64x32xf32> -> vector<64x32xf32>
    %227 = arith.maximumf %223, %226 : vector<64x32xf32>
    %c0_237 = arith.constant 0 : index
    %c5_238 = arith.constant 5 : index
    %c0_239 = arith.constant 0 : index
    %c0_240 = arith.constant 0 : index
    %228 = vector.load %arg4[%c0_237, %c5_238, %c0_239, %c0_240] : memref<1x8x64x64xbf16, #tpu.memory_space<vmem>>, vector<1x1x64x64xbf16>
    %229 = vector.shape_cast %228 : vector<1x1x64x64xbf16> to vector<64x64xbf16>
    %cst_241 = arith.constant dense<0.000000e+00> : vector<64x32xf32>
    %230 = tpu.matmul %229, %208, %cst_241 {dimension_numbers = #tpu.dot_dimension_numbers<[1], [0], [0], [1], [0, 0, 1, 1], [], []>} : vector<64x64xbf16>, vector<64x32xbf16>, vector<64x32xf32> -> vector<64x32xf32>
    %231 = arith.maximumf %227, %230 : vector<64x32xf32>
    %c0_242 = arith.constant 0 : index
    %c6_243 = arith.constant 6 : index
    %c0_244 = arith.constant 0 : index
    %c0_245 = arith.constant 0 : index
    %232 = vector.load %arg4[%c0_242, %c6_243, %c0_244, %c0_245] : memref<1x8x64x64xbf16, #tpu.memory_space<vmem>>, vector<1x1x64x64xbf16>
    %233 = vector.shape_cast %232 : vector<1x1x64x64xbf16> to vector<64x64xbf16>
    %cst_246 = arith.constant dense<0.000000e+00> : vector<64x32xf32>
    %234 = tpu.matmul %233, %208, %cst_246 {dimension_numbers = #tpu.dot_dimension_numbers<[1], [0], [0], [1], [0, 0, 1, 1], [], []>} : vector<64x64xbf16>, vector<64x32xbf16>, vector<64x32xf32> -> vector<64x32xf32>
    %235 = arith.maximumf %231, %234 : vector<64x32xf32>
    %c0_247 = arith.constant 0 : index
    %c7_248 = arith.constant 7 : index
    %c0_249 = arith.constant 0 : index
    %c0_250 = arith.constant 0 : index
    %236 = vector.load %arg4[%c0_247, %c7_248, %c0_249, %c0_250] : memref<1x8x64x64xbf16, #tpu.memory_space<vmem>>, vector<1x1x64x64xbf16>
    %237 = vector.shape_cast %236 : vector<1x1x64x64xbf16> to vector<64x64xbf16>
    %cst_251 = arith.constant dense<0.000000e+00> : vector<64x32xf32>
    %238 = tpu.matmul %237, %208, %cst_251 {dimension_numbers = #tpu.dot_dimension_numbers<[1], [0], [0], [1], [0, 0, 1, 1], [], []>} : vector<64x64xbf16>, vector<64x32xbf16>, vector<64x32xf32> -> vector<64x32xf32>
    %239 = arith.maximumf %235, %238 : vector<64x32xf32>
    %c0_252 = arith.constant 0 : index
    %c0_253 = arith.constant 0 : index
    %240 = vector.load %arg29[%c0_252, %c0_253] : memref<32x64xbf16, #tpu.memory_space<vmem>>, vector<32x64xbf16>
    %241 = arith.truncf %239 : vector<64x32xf32> to vector<64x32xbf16>
    %cst_254 = arith.constant dense<0.000000e+00> : vector<64x64xf32>
    %242 = tpu.matmul %241, %240, %cst_254 {dimension_numbers = #tpu.dot_dimension_numbers<[1], [0], [0], [1], [0, 0, 1, 1], [], []>} : vector<64x32xbf16>, vector<32x64xbf16>, vector<64x64xf32> -> vector<64x64xf32>
    %c0_255 = arith.constant 0 : index
    %c0_256 = arith.constant 0 : index
    %243 = vector.load %arg28[%c0_255, %c0_256] : memref<1x64xf32, #tpu.memory_space<vmem>>, vector<1x64xf32>
    %244 = vector.broadcast %243 : vector<1x64xf32> to vector<64x64xf32>
    %245 = arith.addf %242, %244 : vector<64x64xf32>
    %246 = arith.addf %245, %199 : vector<64x64xf32>
    %cst_257 = arith.constant 0.000000e+00 : f32
    %247 = vector.broadcast %cst_257 : f32 to vector<64x64xf32>
    %248 = arith.maximumf %246, %247 : vector<64x64xf32>
    %c0_258 = arith.constant 0 : index
    %c0_259 = arith.constant 0 : index
    %c0_260 = arith.constant 0 : index
    %249 = vector.load %arg5[%c0_258, %c0_259, %c0_260] : memref<1x128x64xbf16, #tpu.memory_space<vmem>>, vector<1x128x64xbf16>
    %250 = vector.shape_cast %249 : vector<1x128x64xbf16> to vector<128x64xbf16>
    %251 = arith.truncf %248 : vector<64x64xf32> to vector<64x64xbf16>
    %cst_261 = arith.constant dense<0.000000e+00> : vector<128x64xf32>
    %252 = tpu.matmul %250, %251, %cst_261 {dimension_numbers = #tpu.dot_dimension_numbers<[1], [0], [0], [1], [0, 0, 1, 1], [], []>} : vector<128x64xbf16>, vector<64x64xbf16>, vector<128x64xf32> -> vector<128x64xf32>
    %c0_262 = arith.constant 0 : index
    %c0_263 = arith.constant 0 : index
    %253 = vector.load %arg33[%c0_262, %c0_263] : memref<32x32xbf16, #tpu.memory_space<vmem>>, vector<32x32xbf16>
    %254 = arith.truncf %112 : vector<128x32xf32> to vector<128x32xbf16>
    %cst_264 = arith.constant dense<0.000000e+00> : vector<128x32xf32>
    %255 = tpu.matmul %254, %253, %cst_264 {dimension_numbers = #tpu.dot_dimension_numbers<[1], [0], [0], [1], [0, 0, 1, 1], [], []>} : vector<128x32xbf16>, vector<32x32xbf16>, vector<128x32xf32> -> vector<128x32xf32>
    %c0_265 = arith.constant 0 : index
    %c0_266 = arith.constant 0 : index
    %256 = vector.load %arg34[%c0_265, %c0_266] : memref<64x32xbf16, #tpu.memory_space<vmem>>, vector<64x32xbf16>
    %257 = arith.truncf %252 : vector<128x64xf32> to vector<128x64xbf16>
    %cst_267 = arith.constant dense<0.000000e+00> : vector<128x32xf32>
    %258 = tpu.matmul %257, %256, %cst_267 {dimension_numbers = #tpu.dot_dimension_numbers<[1], [0], [0], [1], [0, 0, 1, 1], [], []>} : vector<128x64xbf16>, vector<64x32xbf16>, vector<128x32xf32> -> vector<128x32xf32>
    %259 = arith.addf %255, %258 : vector<128x32xf32>
    %c0_268 = arith.constant 0 : index
    %c0_269 = arith.constant 0 : index
    %260 = vector.load %arg32[%c0_268, %c0_269] : memref<1x32xf32, #tpu.memory_space<vmem>>, vector<1x32xf32>
    %261 = vector.broadcast %260 : vector<1x32xf32> to vector<128x32xf32>
    %262 = arith.addf %259, %261 : vector<128x32xf32>
    %cst_270 = arith.constant 0.000000e+00 : f32
    %263 = vector.broadcast %cst_270 : f32 to vector<128x32xf32>
    %264 = arith.maximumf %262, %263 : vector<128x32xf32>
    %c0_271 = arith.constant 0 : index
    %c0_272 = arith.constant 0 : index
    %265 = vector.load %arg9[%c0_271, %c0_272] : memref<32x64xbf16, #tpu.memory_space<vmem>>, vector<32x64xbf16>
    %266 = arith.truncf %264 : vector<128x32xf32> to vector<128x32xbf16>
    %cst_273 = arith.constant dense<0.000000e+00> : vector<128x64xf32>
    %267 = tpu.matmul %266, %265, %cst_273 {dimension_numbers = #tpu.dot_dimension_numbers<[1], [0], [0], [1], [0, 0, 1, 1], [], []>} : vector<128x32xbf16>, vector<32x64xbf16>, vector<128x64xf32> -> vector<128x64xf32>
    %c0_274 = arith.constant 0 : index
    %c0_275 = arith.constant 0 : index
    %268 = vector.load %arg8[%c0_274, %c0_275] : memref<1x64xf32, #tpu.memory_space<vmem>>, vector<1x64xf32>
    %269 = vector.broadcast %268 : vector<1x64xf32> to vector<128x64xf32>
    %270 = arith.addf %267, %269 : vector<128x64xf32>
    %cst_276 = arith.constant 0.000000e+00 : f32
    %271 = vector.broadcast %cst_276 : f32 to vector<128x64xf32>
    %272 = arith.maximumf %270, %271 : vector<128x64xf32>
    %c0_277 = arith.constant 0 : index
    %c0_278 = arith.constant 0 : index
    %273 = vector.load %arg7[%c0_277, %c0_278] : memref<64x128xbf16, #tpu.memory_space<vmem>>, vector<64x128xbf16>
    %274 = arith.truncf %272 : vector<128x64xf32> to vector<128x64xbf16>
    %cst_279 = arith.constant dense<0.000000e+00> : vector<128x128xf32>
    %275 = tpu.matmul %274, %273, %cst_279 {dimension_numbers = #tpu.dot_dimension_numbers<[1], [0], [0], [1], [0, 0, 1, 1], [], []>} : vector<128x64xbf16>, vector<64x128xbf16>, vector<128x128xf32> -> vector<128x128xf32>
    %c0_280 = arith.constant 0 : index
    %c0_281 = arith.constant 0 : index
    %276 = vector.load %arg6[%c0_280, %c0_281] : memref<1x128xf32, #tpu.memory_space<vmem>>, vector<1x128xf32>
    %277 = vector.broadcast %276 : vector<1x128xf32> to vector<128x128xf32>
    %278 = arith.addf %275, %277 : vector<128x128xf32>
    %c0_282 = arith.constant 0 : index
    %c0_283 = arith.constant 0 : index
    %c0_284 = arith.constant 0 : index
    %279 = vector.load %arg35[%c0_282, %c0_283, %c0_284] : memref<1x128x128xf32, #tpu.memory_space<vmem>>, vector<1x128x128xf32>
    %280 = vector.shape_cast %279 : vector<1x128x128xf32> to vector<128x128xf32>
    %281 = vector.shape_cast %278 : vector<128x128xf32> to vector<1x128x128xf32>
    tpu.vector_store %arg35[%c0_282, %c0_283, %c0_284], %281 {strides = array<i32>} : memref<1x128x128xf32, #tpu.memory_space<vmem>>, vector<1x128x128xf32>,
    return
  }
  func.func @transform_0(%arg0: i32) -> (i32, i32, i32) {
    %c0_i32 = arith.constant 0 : i32
    %c0_i32_0 = arith.constant 0 : i32
    %c0_i32_1 = arith.constant 0 : i32
    return %arg0, %c0_i32, %c0_i32_0 : i32, i32, i32
  }
  func.func @transform_1(%arg0: i32) -> (i32, i32, i32, i32) {
    %c0_i32 = arith.constant 0 : i32
    %c0_i32_0 = arith.constant 0 : i32
    %c0_i32_1 = arith.constant 0 : i32
    %c0_i32_2 = arith.constant 0 : i32
    return %arg0, %c0_i32, %c0_i32_0, %c0_i32_1 : i32, i32, i32, i32
  }
  func.func @transform_2(%arg0: i32) -> (i32, i32, i32, i32) {
    %c0_i32 = arith.constant 0 : i32
    %c0_i32_0 = arith.constant 0 : i32
    %c0_i32_1 = arith.constant 0 : i32
    %c0_i32_2 = arith.constant 0 : i32
    return %arg0, %c0_i32, %c0_i32_0, %c0_i32_1 : i32, i32, i32, i32
  }
  func.func @transform_3(%arg0: i32) -> (i32, i32, i32, i32) {
    %c0_i32 = arith.constant 0 : i32
    %c0_i32_0 = arith.constant 0 : i32
    %c0_i32_1 = arith.constant 0 : i32
    %c0_i32_2 = arith.constant 0 : i32
    return %arg0, %c0_i32, %c0_i32_0, %c0_i32_1 : i32, i32, i32, i32
  }
  func.func @transform_4(%arg0: i32) -> (i32, i32, i32) {
    %c0_i32 = arith.constant 0 : i32
    %c0_i32_0 = arith.constant 0 : i32
    %c0_i32_1 = arith.constant 0 : i32
    return %arg0, %c0_i32, %c0_i32_0 : i32, i32, i32
  }
  func.func @transform_5(%arg0: i32) -> (i32, i32) {
    %c0_i32 = arith.constant 0 : i32
    %c0_i32_0 = arith.constant 0 : i32
    %c0_i32_1 = arith.constant 0 : i32
    return %c0_i32, %c0_i32_0 : i32, i32
  }
  func.func @transform_6(%arg0: i32) -> (i32, i32) {
    %c0_i32 = arith.constant 0 : i32
    %c0_i32_0 = arith.constant 0 : i32
    %c0_i32_1 = arith.constant 0 : i32
    return %c0_i32, %c0_i32_0 : i32, i32
  }
  func.func @transform_7(%arg0: i32) -> (i32, i32) {
    %c0_i32 = arith.constant 0 : i32
    %c0_i32_0 = arith.constant 0 : i32
    %c0_i32_1 = arith.constant 0 : i32
    return %c0_i32, %c0_i32_0 : i32, i32
  }
  func.func @transform_8(%arg0: i32) -> (i32, i32) {
    %c0_i32 = arith.constant 0 : i32
    %c0_i32_0 = arith.constant 0 : i32
    %c0_i32_1 = arith.constant 0 : i32
    return %c0_i32, %c0_i32_0 : i32, i32
  }
  func.func @transform_9(%arg0: i32) -> (i32, i32) {
    %c0_i32 = arith.constant 0 : i32
    %c0_i32_0 = arith.constant 0 : i32
    %c0_i32_1 = arith.constant 0 : i32
    return %c0_i32, %c0_i32_0 : i32, i32
  }
  func.func @transform_10(%arg0: i32) -> (i32, i32) {
    %c0_i32 = arith.constant 0 : i32
    %c0_i32_0 = arith.constant 0 : i32
    %c0_i32_1 = arith.constant 0 : i32
    return %c0_i32, %c0_i32_0 : i32, i32
  }
  func.func @transform_11(%arg0: i32) -> (i32, i32) {
    %c0_i32 = arith.constant 0 : i32
    %c0_i32_0 = arith.constant 0 : i32
    %c0_i32_1 = arith.constant 0 : i32
    return %c0_i32, %c0_i32_0 : i32, i32
  }
  func.func @transform_12(%arg0: i32) -> (i32, i32) {
    %c0_i32 = arith.constant 0 : i32
    %c0_i32_0 = arith.constant 0 : i32
    %c0_i32_1 = arith.constant 0 : i32
    return %c0_i32, %c0_i32_0 : i32, i32
  }
  func.func @transform_13(%arg0: i32) -> (i32, i32) {
    %c0_i32 = arith.constant 0 : i32
    %c0_i32_0 = arith.constant 0 : i32
    %c0_i32_1 = arith.constant 0 : i32
    return %c0_i32, %c0_i32_0 : i32, i32
  }
  func.func @transform_14(%arg0: i32) -> (i32, i32) {
    %c0_i32 = arith.constant 0 : i32
    %c0_i32_0 = arith.constant 0 : i32
    %c0_i32_1 = arith.constant 0 : i32
    return %c0_i32, %c0_i32_0 : i32, i32
  }
  func.func @transform_15(%arg0: i32) -> (i32, i32) {
    %c0_i32 = arith.constant 0 : i32
    %c0_i32_0 = arith.constant 0 : i32
    %c0_i32_1 = arith.constant 0 : i32
    return %c0_i32, %c0_i32_0 : i32, i32
  }
  func.func @transform_16(%arg0: i32) -> (i32, i32) {
    %c0_i32 = arith.constant 0 : i32
    %c0_i32_0 = arith.constant 0 : i32
    %c0_i32_1 = arith.constant 0 : i32
    return %c0_i32, %c0_i32_0 : i32, i32
  }
  func.func @transform_17(%arg0: i32) -> (i32, i32) {
    %c0_i32 = arith.constant 0 : i32
    %c0_i32_0 = arith.constant 0 : i32
    %c0_i32_1 = arith.constant 0 : i32
    return %c0_i32, %c0_i32_0 : i32, i32
  }
  func.func @transform_18(%arg0: i32) -> (i32, i32) {
    %c0_i32 = arith.constant 0 : i32
    %c0_i32_0 = arith.constant 0 : i32
    %c0_i32_1 = arith.constant 0 : i32
    return %c0_i32, %c0_i32_0 : i32, i32
  }
  func.func @transform_19(%arg0: i32) -> (i32, i32) {
    %c0_i32 = arith.constant 0 : i32
    %c0_i32_0 = arith.constant 0 : i32
    %c0_i32_1 = arith.constant 0 : i32
    return %c0_i32, %c0_i32_0 : i32, i32
  }
  func.func @transform_20(%arg0: i32) -> (i32, i32) {
    %c0_i32 = arith.constant 0 : i32
    %c0_i32_0 = arith.constant 0 : i32
    %c0_i32_1 = arith.constant 0 : i32
    return %c0_i32, %c0_i32_0 : i32, i32
  }
  func.func @transform_21(%arg0: i32) -> (i32, i32) {
    %c0_i32 = arith.constant 0 : i32
    %c0_i32_0 = arith.constant 0 : i32
    %c0_i32_1 = arith.constant 0 : i32
    return %c0_i32, %c0_i32_0 : i32, i32
  }
  func.func @transform_22(%arg0: i32) -> (i32, i32) {
    %c0_i32 = arith.constant 0 : i32
    %c0_i32_0 = arith.constant 0 : i32
    %c0_i32_1 = arith.constant 0 : i32
    return %c0_i32, %c0_i32_0 : i32, i32
  }
  func.func @transform_23(%arg0: i32) -> (i32, i32) {
    %c0_i32 = arith.constant 0 : i32
    %c0_i32_0 = arith.constant 0 : i32
    %c0_i32_1 = arith.constant 0 : i32
    return %c0_i32, %c0_i32_0 : i32, i32
  }
  func.func @transform_24(%arg0: i32) -> (i32, i32) {
    %c0_i32 = arith.constant 0 : i32
    %c0_i32_0 = arith.constant 0 : i32
    %c0_i32_1 = arith.constant 0 : i32
    return %c0_i32, %c0_i32_0 : i32, i32
  }
  func.func @transform_25(%arg0: i32) -> (i32, i32) {
    %c0_i32 = arith.constant 0 : i32
    %c0_i32_0 = arith.constant 0 : i32
    %c0_i32_1 = arith.constant 0 : i32
    return %c0_i32, %c0_i32_0 : i32, i32
  }
  func.func @transform_26(%arg0: i32) -> (i32, i32) {
    %c0_i32 = arith.constant 0 : i32
    %c0_i32_0 = arith.constant 0 : i32
    %c0_i32_1 = arith.constant 0 : i32
    return %c0_i32, %c0_i32_0 : i32, i32
  }
  func.func @transform_27(%arg0: i32) -> (i32, i32) {
    %c0_i32 = arith.constant 0 : i32
    %c0_i32_0 = arith.constant 0 : i32
    %c0_i32_1 = arith.constant 0 : i32
    return %c0_i32, %c0_i32_0 : i32, i32
  }
  func.func @transform_28(%arg0: i32) -> (i32, i32) {
    %c0_i32 = arith.constant 0 : i32
    %c0_i32_0 = arith.constant 0 : i32
    %c0_i32_1 = arith.constant 0 : i32
    return %c0_i32, %c0_i32_0 : i32, i32
  }
  func.func @transform_29(%arg0: i32) -> (i32, i32) {
    %c0_i32 = arith.constant 0 : i32
    %c0_i32_0 = arith.constant 0 : i32
    %c0_i32_1 = arith.constant 0 : i32
    return %c0_i32, %c0_i32_0 : i32, i32
  }
  func.func @transform_30(%arg0: i32) -> (i32, i32) {
    %c0_i32 = arith.constant 0 : i32
    %c0_i32_0 = arith.constant 0 : i32
    %c0_i32_1 = arith.constant 0 : i32
    return %c0_i32, %c0_i32_0 : i32, i32
  }
  func.func @transform_31(%arg0: i32) -> (i32, i32) {
    %c0_i32 = arith.constant 0 : i32
    %c0_i32_0 = arith.constant 0 : i32
    %c0_i32_1 = arith.constant 0 : i32
    return %c0_i32, %c0_i32_0 : i32, i32
  }
  func.func @transform_32(%arg0: i32) -> (i32, i32) {
    %c0_i32 = arith.constant 0 : i32
    %c0_i32_0 = arith.constant 0 : i32
    %c0_i32_1 = arith.constant 0 : i32
    return %c0_i32, %c0_i32_0 : i32, i32
  }
  func.func @transform_33(%arg0: i32) -> (i32, i32) {
    %c0_i32 = arith.constant 0 : i32
    %c0_i32_0 = arith.constant 0 : i32
    %c0_i32_1 = arith.constant 0 : i32
    return %c0_i32, %c0_i32_0 : i32, i32
  }
  func.func @transform_34(%arg0: i32) -> (i32, i32, i32) {
    %c0_i32 = arith.constant 0 : i32
    %c0_i32_0 = arith.constant 0 : i32
    %c0_i32_1 = arith.constant 0 : i32
    return %arg0, %c0_i32, %c0_i32_0 : i32, i32, i32
  }
}

</mosaic_0001>

<bundles_post_ra>
// kernel: model_forward.1
= control target key start
LH: loop header
LB: loop body
LE: loop exit
PB: predicated region body
PF: predicated region fallthrough
CT: control target
= control target key end

     0   :  { %s11326_s6 = smov 1   ;;  %s11327_s10 = smov 2   ;;  %s13560_s0 = inlined_call_operand.smem [shape: u32[35], index: -1, kind: input, shape index: {}] }
   0x1   :  { %s11368_s5 = sld [smem:[%s13560_s0]]   ;;  %s11328_s14 = smov 3  }
   0x2   :  { %s11373_s9 = sld [smem:[%s13560_s0 + %s11326_s6]]   ;;  %s11329_s18 = smov 4  }
   0x3   :  { %s11378_s13 = sld [smem:[%s13560_s0 + %s11327_s10]]   ;;  %s11330_s22 = smov 5  }
   0x4   :  { %s11383_s17 = sld [smem:[%s13560_s0 + %s11328_s14]]   ;;  %s11331_s26 = smov 6  }
   0x5   :  { %s11388_s21 = sld [smem:[%s13560_s0 + %s11329_s18]]   ;;  %s11332_s30 = smov 7  }
   0x6   :  { %s11393_s25 = sld [smem:[%s13560_s0 + %s11330_s22]]   ;;  %s11333_s4 = smov 8  }
   0x7   :  { %s11398_s29 = sld [smem:[%s13560_s0 + %s11331_s26]]   ;;  %s11334_s10 = smov 9  }
   0x8   :  { %s11403_s3 = sld [smem:[%s13560_s0 + %s11332_s30]]   ;;  %s11335_s15 = smov 10  }
   0x9   :  { %s11408_s8 = sld [smem:[%s13560_s0 + %s11333_s4]]   ;;  %s11336_s20 = smov 11  }
   0xa   :  { %s11413_s14 = sld [smem:[%s13560_s0 + %s11334_s10]]   ;;  %s11337_s26 = smov 12  }
   0xb   :  { %s11418_s19 = sld [smem:[%s13560_s0 + %s11335_s15]]   ;;  %s11338_s1 = smov 13  }
   0xc   :  { %13584 = sst [smem:[#allocation2_spill]] %s11393_s25  ;;  %s11339_s7 = smov 14  }
   0xd   :  { %13585 = sst [smem:[#allocation3_spill]] %s11398_s29  ;;  %s11340_s15 = smov 15  }
   0xe   :  { %13586 = sst [smem:[#allocation4_spill]] %s11403_s3  ;;  %s11341_s22 = smov 16  }
   0xf   :  { %13587 = sst [smem:[#allocation5_spill]] %s11408_s8  ;;  %s11342_s28 = smov 17  }
  0x10   :  { %s11423_s24 = sld [smem:[%s13560_s0 + %s11336_s20]]  }
  0x11   :  { %s11428_s30 = sld [smem:[%s13560_s0 + %s11337_s26]]  }
  0x12   :  { %s11433_s6 = sld [smem:[%s13560_s0 + %s11338_s1]]  }
  0x13   :  { %s11438_s12 = sld [smem:[%s13560_s0 + %s11339_s7]]   ;;  %s11343_s7 = smov 18  }
  0x14   :  { %s11443_s20 = sld [smem:[%s13560_s0 + %s11340_s15]]   ;;  %s11344_s15 = smov 19  }
  0x15   :  { %s11448_s27 = sld [smem:[%s13560_s0 + %s11341_s22]]   ;;  %s11345_s22 = smov 20  }
  0x16   :  { %s11453_s4 = sld [smem:[%s13560_s0 + %s11342_s28]]   ;;  %s11346_s28 = smov 21  }
  0x17   :  { %s11458_s25 = sld [smem:[%s13560_s0 + %s11343_s7]]   ;;  %s11347_s7 = smov 22  }
  0x18   :  { %s11463_s3 = sld [smem:[%s13560_s0 + %s11344_s15]]   ;;  %s11348_s15 = smov 23  }
  0x19   :  { %s11468_s29 = sld [smem:[%s13560_s0 + %s11345_s22]]   ;;  %s11349_s22 = smov 24  }
  0x1a   :  { %13588 = sst [smem:[#allocation6_spill]] %s11443_s20 }
  0x1b   :  { %s11473_s8 = sld [smem:[%s13560_s0 + %s11346_s28]]   ;;  %s11350_s28 = smov 25  }
  0x1c   :  { %13589 = sst [smem:[#allocation7_spill]] %s11453_s4 }
  0x1d   :  { %13590 = sst [smem:[#allocation8_spill]] %s11458_s25 }
  0x1e   :  { %13591 = sst [smem:[#allocation9_spill]] %s11463_s3 }
  0x1f   :  { %13592 = sst [smem:[#allocation10_spill]] %s11468_s29 }
  0x20   :  { %s11478_s4 = sld [smem:[%s13560_s0 + %s11347_s7]]   ;;  %s11351_s7 = smov 26  }
  0x21   :  { %13593 = sst [smem:[#allocation11_spill]] %s11473_s8 }
  0x22   :  { %s11483_s3 = sld [smem:[%s13560_s0 + %s11348_s15]]   ;;  %s11352_s15 = smov 27  }
  0x23   :  { %s11488_s29 = sld [smem:[%s13560_s0 + %s11349_s22]]   ;;  %s11353_s22 = smov 28  }
  0x24   :  { %s11493_s8 = sld [smem:[%s13560_s0 + %s11350_s28]]   ;;  %s11354_s28 = smov 29  }
  0x26   :  { %13594 = sst [smem:[#allocation12_spill]] %s11478_s4 }
  0x27   :  { %s11498_s4 = sld [smem:[%s13560_s0 + %s11351_s7]]   ;;  %s11355_s7 = smov 30  }
  0x28   :  { %13595 = sst [smem:[#allocation13_spill]] %s11483_s3 }
  0x29   :  { %13596 = sst [smem:[#allocation14_spill]] %s11488_s29 }
  0x2a   :  { %13597 = sst [smem:[#allocation15_spill]] %s11493_s8 }
  0x2b   :  { %s11503_s3 = sld [smem:[%s13560_s0 + %s11352_s15]]   ;;  %s11356_s15 = smov 31  }
  0x2c   :  { %s11508_s29 = sld [smem:[%s13560_s0 + %s11353_s22]]   ;;  %s11357_s22 = smov 32  }
  0x2d   :  { %13598 = sst [smem:[#allocation16_spill]] %s11498_s4 }
  0x2e   :  { %s11513_s8 = sld [smem:[%s13560_s0 + %s11354_s28]]   ;;  %s11358_s28 = smov 33  }
  0x2f   :  { %s11518_s4 = sld [smem:[%s13560_s0 + %s11355_s7]]   ;;  %s11359_s7 = smov 34  }
  0x30   :  { %s11533_s25 = sld [smem:[%s13560_s0 + %s11358_s28]]  }
  0x31   :  { %13599 = sst [smem:[#allocation17_spill]] %s11503_s3 }
  0x32   :  { %13600 = sst [smem:[#allocation18_spill]] %s11508_s29 }
  0x33   :  { %s11523_s3 = sld [smem:[%s13560_s0 + %s11356_s15]]   ;;  %s11540_s15 = smov 0  }
  0x34   :  { %s11528_s29 = sld [smem:[%s13560_s0 + %s11357_s22]]  }
  0x35   :  { %s11538_s20 = sld [smem:[%s13560_s0 + %s11359_s7]]  }
  0x36 LB: > { %s8389_s16 = sadd.s32 4294967295, %s11324_s15   ;;  %p8393_p0 = scmp.ge.s32.totalorder %s11324_s15, 1  ;;  %s11324_s15 = sphi %s11540_s15, %s79_s15  }
  0x37   : > { %p987_p1 = scmp.lt.s32.totalorder %s11324_s15, 3 }
  0x39   : > { %p988_p2 = pnand %p8393_p0, %p987_p1 }
  0x3a   : > { %v1140_v0 = vld [vmem:[%s11518_s4] sm:$0x3] (!%p988_p2)  ;;  %vm1213_vm0 = vcmask (!%p988_p2), 1041408   ;;  %p1093_p3 = scmp.lt.s32.totalorder (!%p988_p2), %s8389_s16, 1  ;;  %vm1188_vm1 = vcmask (!%p988_p2), 31744   ;;  %vm1353_vm2 = vcmask (!%p988_p2), 130048  }
  0x3b   : > { %991 = sbr.rel (%p988_p2) target bundleno = 4500 (0x1194), region = 156  ;;  %11037 = vmatprep.subr.msk.bf16.mxu0 (!%p988_p2), %vm1213_vm0, %v1140_v0  ;;  %v1215_v1 = vsel (!%p988_p2), %vm1213_vm0, %v1140_v0, 0  ;;  %v11088_v10 = vld [vmem:[%s11418_s19] sm:$0xff] (!%p988_p2)   ;;  %vm3225_vm3 = vcmask (!%p988_p2), 261120   ;;  %s13601_s7 = sld [smem:[#allocation6_spill]] (!%p988_p2)  ;;  %vm6293_vm4 = vcmask (!%p988_p2), 523264  }
  0x3c   : > { %9630 = vmatpush3.bf16.msra.mxu0 (!%p988_p2), %v1215_v1  ;;  %9647 = vmatprep.subr.bf16.mxu1 (!%p988_p2), %v11088_v10  ;;  %v8406_v11 = vld [vmem:[%s11513_s8] ss:$0 sm:$0xff] (!%p988_p2)  ;;  %s13602_s10 = sld [smem:[#allocation8_spill]] (!%p988_p2)  ;;  %s13603_s11 = sld [smem:[#allocation10_spill]] (!%p988_p2) }
  0x3d   : > { %9648 = vmatpush3.bf16.msra.mxu1 (!%p988_p2), %v11088_v10 }
  0x42   : > { %s13644_s16 = smov (!%p1093_p3, %s8389_s16), 1 }
  0x43   : > { %s8964_s0 = sshll.u32 %s13644_s16, 6  ;;  %s8965_s22 = sshll.u32 %s13644_s16, 9 }
  0x44   : > { %s1097_s18 = scalar_lea.vmem %s11368_s5, %s8964_s0  ;;  %s11558_s23 = scalar_lea.vmem %s11373_s9, %s8965_s22 }
  0x45   : > { %v11080_v2 = vld [vmem:[%s1097_s18] sm:$0xff]   ;;  %v11081_v3 = vld [vmem:[%s1097_s18 + $0x8] sm:$0xff]   ;;  %v11082_v4 = vld [vmem:[%s1097_s18 + $0x10] sm:$0xff]   ;;  %s8966_s26 = sshll.u32 %s13644_s16, 8  ;;  %s11574_s2 = scalar_lea.vmem %s11388_s21, %s8964_s0 }
  0x46   : > { %9631 = vmatprep.mubr.msk.bf16.mxu0 %vm1188_vm1, %v11080_v2  ;;  %v11083_v5 = vld [vmem:[%s1097_s18 + $0x18] sm:$0xff]   ;;  %v11084_v6 = vld [vmem:[%s1097_s18 + $0x20] sm:$0xff]   ;;  %v11085_v7 = vld [vmem:[%s1097_s18 + $0x28] sm:$0xff]   ;;  %s11567_s28 = scalar_lea.vmem %s11378_s13, %s8966_s26  ;;  %s11570_s1 = scalar_lea.vmem %s11383_s17, %s8966_s26 }
  0x47   : > { %9632 = vmatmul.mubr.msk.bf16.vlgmr.msra.gmra.mrb[0].mxu0 %vm1188_vm1, %v11081_v3  ;;  %v11086_v8 = vld [vmem:[%s1097_s18 + $0x30] sm:$0xff]   ;;  %v11087_v9 = vld [vmem:[%s1097_s18 + $0x38] sm:$0xff]   ;;  %s13611_s0 = sld [smem:[#allocation7_spill]]  ;;  %s13629_s18 = sld [smem:[#allocation9_spill]] }
  0x48   : > { %9635 = vmatprep.mubr.msk.bf16.mxu0 %vm1188_vm1, %v11082_v4  ;;  %v11089_v4 = vld [vmem:[%s11558_s23] sm:$0xff]   ;;  %s13631_s22 = sld [smem:[#allocation14_spill]]  ;;  %s13633_s26 = sld [smem:[#allocation16_spill]] }
  0x4f   : > { %9636 = vmatmul.mubr.msk.bf16.gmra.mrb[4].mxu0 %vm1188_vm1, %v11083_v5  ;;  %v11090_v5 = vld [vmem:[%s11558_s23 + $0x40] sm:$0xff]  }
  0x50   : > { %9639 = vmatprep.mubr.msk.bf16.mxu0 %vm1188_vm1, %v11084_v6  ;;  %v11612_v6 = vld [vmem:[%s11413_s14] ss:$0 sm:$0xff] }
  0x57   : > { %9640 = vmatmul.mubr.msk.bf16.gmra.mrb[8].mxu0 %vm1188_vm1, %v11085_v7 }
  0x58   : > { %9643 = vmatprep.mubr.msk.bf16.mxu0 %vm1188_vm1, %v11086_v8 }
  0x5f   : > { %9644 = vmatmul.mubr.msk.bf16.gmra.mrb[12].mxu0 %vm1188_vm1, %v11087_v9 }
  0x60   : > { %9681 = vmatprep.mubr.bf16.mxu0 %v11089_v4 }
 0x11a   : > { %v9633_v12 = vpop.f32.mrb[0].mxu0 }
 0x11b   : > { %v1260_v13 = vadd.f32 %v9633_v12, %v8406_v11  ;;  %v1251_v14 = vpop.f32.mrb[1].mxu0 }
 0x11c   : > { %v1252_v15 = vadd.f32 %v8406_v11, %v1251_v14  ;;  %v9634_v16 = vpop.f32.mrb[2].mxu0 }
 0x11d   : > { %v1263_v17 = vadd.f32 %v9634_v16, %v8406_v11  ;;  %v1254_v18 = vpop.f32.mrb[3].mxu0  ;;  %v1316_v20 = vmax.f32 %v1260_v13, 0.0 }
 0x11e   : > { %v1255_v19 = vadd.f32 %v8406_v11, %v1254_v18  ;;  %v1314_v22 = vmax.f32 %v1252_v15, 0.0 }
 0x11f   : > { %v1317_v21 = vmax.f32 %v1263_v17, 0.0 }
 0x120   : > { %v1315_v23 = vmax.f32 %v1255_v19, 0.0 }
 0x121   : > { %v11577_v24 = vpack.c.bf16 %v1317_v21, %v1316_v20 }
 0x122   : > { %v9637_v25 = vpop.f32.mrb[4].mxu0  ;;  %v11579_v26 = vpack.c.bf16 %v1315_v23, %v1314_v22 }
 0x123   : > { %v1276_v27 = vadd.f32 %v9637_v25, %v8406_v11  ;;  %v1267_v28 = vpop.f32.mrb[5].mxu0 }
 0x124   : > { %v1268_v29 = vadd.f32 %v8406_v11, %v1267_v28  ;;  %v9638_v30 = vpop.f32.mrb[6].mxu0  ;;  %9649 = vmatprep.mubr.msk.bf16.mxu1 %vm1353_vm2, %v11579_v26 }
 0x125   : > { %v1279_v31 = vadd.f32 %v9638_v30, %v8406_v11  ;;  %v1270_v32 = vpop.f32.mrb[7].mxu0  ;;  %9650 = vmatmul.mubr.msk.bf16.vlgmr.msra.gmra.mrb[0].mxu1 %vm1353_vm2, %v11577_v24  ;;  %v1320_v34 = vmax.f32 %v1276_v27, 0.0 }
 0x126   : > { %v1271_v33 = vadd.f32 %v8406_v11, %v1270_v32  ;;  %v1318_v36 = vmax.f32 %v1268_v29, 0.0 }
 0x127   : > { %v1321_v35 = vmax.f32 %v1279_v31, 0.0 }
 0x128   : > { %v1319_v37 = vmax.f32 %v1271_v33, 0.0 }
 0x129   : > { %v11585_v38 = vpack.c.bf16 %v1321_v35, %v1320_v34 }
 0x12a   : > { %v11587_v39 = vpack.c.bf16 %v1319_v37, %v1318_v36  ;;  %v9641_v40 = vpop.f32.mrb[8].mxu0 }
 0x12b   : > { %v1292_v41 = vadd.f32 %v9641_v40, %v8406_v11  ;;  %v1283_v42 = vpop.f32.mrb[9].mxu0 }
 0x12c   : > { %v1284_v43 = vadd.f32 %v8406_v11, %v1283_v42  ;;  %v9642_v44 = vpop.f32.mrb[10].mxu0  ;;  %9653 = vmatprep.mubr.msk.bf16.mxu1 %vm1353_vm2, %v11587_v39 }
 0x12d   : > { %v1295_v45 = vadd.f32 %v9642_v44, %v8406_v11  ;;  %v1286_v46 = vpop.f32.mrb[11].mxu0  ;;  %9654 = vmatmul.mubr.msk.bf16.gmra.mrb[4].mxu1 %vm1353_vm2, %v11585_v38  ;;  %v1324_v48 = vmax.f32 %v1292_v41, 0.0 }
 0x12e   : > { %v1287_v47 = vadd.f32 %v8406_v11, %v1286_v46  ;;  %v1322_v50 = vmax.f32 %v1284_v43, 0.0 }
 0x12f   : > { %v1325_v49 = vmax.f32 %v1295_v45, 0.0 }
 0x130   : > { %v1323_v51 = vmax.f32 %v1287_v47, 0.0 }
 0x131   : > { %v11593_v52 = vpack.c.bf16 %v1325_v49, %v1324_v48 }
 0x132   : > { %v11595_v53 = vpack.c.bf16 %v1323_v51, %v1322_v50  ;;  %v9645_v54 = vpop.f32.mrb[12].mxu0 }
 0x133   : > { %v1308_v55 = vadd.f32 %v9645_v54, %v8406_v11  ;;  %v1299_v56 = vpop.f32.mrb[13].mxu0 }
 0x134   : > { %v1300_v57 = vadd.f32 %v8406_v11, %v1299_v56  ;;  %v9646_v58 = vpop.f32.mrb[14].mxu0  ;;  %9657 = vmatprep.mubr.msk.bf16.mxu1 %vm1353_vm2, %v11595_v53 }
 0x135   : > { %v1311_v59 = vadd.f32 %v9646_v58, %v8406_v11  ;;  %v1302_v60 = vpop.f32.mrb[15].mxu0  ;;  %9658 = vmatmul.mubr.msk.bf16.gmra.mrb[8].mxu1 %vm1353_vm2, %v11593_v52  ;;  %v1328_v62 = vmax.f32 %v1308_v55, 0.0 }
 0x136   : > { %v1303_v61 = vadd.f32 %v8406_v11, %v1302_v60  ;;  %v1326_v0 = vmax.f32 %v1300_v57, 0.0 }
 0x137   : > { %v1329_v63 = vmax.f32 %v1311_v59, 0.0 }
 0x138   : > { %v1327_v1 = vmax.f32 %v1303_v61, 0.0 }
 0x139   : > { %v11601_v2 = vpack.c.bf16 %v1329_v63, %v1328_v62 }
 0x13a   : > { %v11603_v3 = vpack.c.bf16 %v1327_v1, %v1326_v0 }
 0x13c   : > { %9661 = vmatprep.mubr.msk.bf16.mxu1 %vm1353_vm2, %v11603_v3 }
 0x13d   : > { %9662 = vmatmul.mubr.msk.bf16.gmra.mrb[12].mxu1 %vm1353_vm2, %v11601_v2 }
 0x13e   : > { %9713 = vmatprep.mubr.bf16.mxu1 %v11090_v5 }
 0x1f8   : > { %v9651_v7 = vpop.f32.mrb[0].mxu1 }
 0x1f9   : > { %v1421_v8 = vadd.f32 %v9651_v7, %v11612_v6  ;;  %v1412_v9 = vpop.f32.mrb[1].mxu1 }
 0x1fa   : > { %v1413_v10 = vadd.f32 %v11612_v6, %v1412_v9  ;;  %v9652_v11 = vpop.f32.mrb[2].mxu1  ;;  %v11093_v9 = vld [vmem:[%s11558_s23 + $0x10] sm:$0xff]  }
 0x1fb   : > { %v1424_v12 = vadd.f32 %v9652_v11, %v11612_v6  ;;  %v1415_v13 = vpop.f32.mrb[3].mxu1  ;;  %v1477_v15 = vmax.f32 %v1421_v8, 0.0  ;;  %v11092_v8 = vld [vmem:[%s11558_s23 + $0x48] sm:$0xff]   ;;  %v11095_v11 = vld [vmem:[%s11558_s23 + $0x18] sm:$0xff]  }
 0x1fc   : > { %v1416_v14 = vadd.f32 %v11612_v6, %v1415_v13  ;;  %v1475_v17 = vmax.f32 %v1413_v10, 0.0  ;;  %v11094_v10 = vld [vmem:[%s11558_s23 + $0x50] sm:$0xff]   ;;  %v11097_v13 = vld [vmem:[%s11558_s23 + $0x20] sm:$0xff]  }
 0x1fd   : > { %v1478_v16 = vmax.f32 %v1424_v12, 0.0  ;;  %v11096_v12 = vld [vmem:[%s11558_s23 + $0x58] sm:$0xff]  }
 0x1fe   : > { %v1476_v18 = vmax.f32 %v1416_v14, 0.0  ;;  %v11098_v14 = vld [vmem:[%s11558_s23 + $0x60] sm:$0xff]  }
 0x1ff   : > { %v11618_v19 = vpack.c.bf16 %v1478_v16, %v1477_v15  ;;  %v11099_v15 = vld [vmem:[%s11558_s23 + $0x28] sm:$0xff]  }
 0x200   : > { %v11620_v20 = vpack.c.bf16 %v1476_v18, %v1475_v17  ;;  %v9655_v21 = vpop.f32.mrb[4].mxu1  ;;  %v11100_v16 = vld [vmem:[%s11558_s23 + $0x68] sm:$0xff]   ;;  %v11101_v17 = vld [vmem:[%s11558_s23 + $0x30] sm:$0xff]  }
 0x201   : > { %v1437_v22 = vadd.f32 %v9655_v21, %v11612_v6  ;;  %v1428_v23 = vpop.f32.mrb[5].mxu1  ;;  %v11102_v18 = vld [vmem:[%s11558_s23 + $0x70] sm:$0xff]   ;;  %v11103_v21 = vld [vmem:[%s11558_s23 + $0x38] sm:$0xff]  }
 0x202   : > { %v1429_v25 = vadd.f32 %v11612_v6, %v1428_v23  ;;  %v9656_v27 = vpop.f32.mrb[6].mxu1  ;;  %9665 = vmatprep.subr.bf16.mxu0 %v11620_v20  ;;  %9697 = vmatprep.subr.bf16.mxu1 %v11620_v20  ;;  %v11105_v23 = vld [vmem:[%s11558_s23 + $0x80] sm:$0xff]  }
 0x203   : > { %v1440_v28 = vadd.f32 %v9656_v27, %v11612_v6  ;;  %v1431_v29 = vpop.f32.mrb[7].mxu1  ;;  %9666 = vmatpush3.bf16.msra.mxu0 %v11620_v20  ;;  %9698 = vmatpush3.bf16.msra.mxu1 %v11620_v20  ;;  %v1481_v31 = vmax.f32 %v1437_v22, 0.0  ;;  %v11104_v22 = vld [vmem:[%s11558_s23 + $0x78] sm:$0xff]   ;;  %v11107_v27 = vld [vmem:[%s11558_s23 + $0x88] sm:$0xff]  }
 0x204   : > { %v1432_v30 = vadd.f32 %v11612_v6, %v1431_v29  ;;  %9667 = vmatprep.subr.bf16.mxu0 %v11618_v19  ;;  %9699 = vmatprep.subr.bf16.mxu1 %v11618_v19  ;;  %v1479_v33 = vmax.f32 %v1429_v25, 0.0  ;;  %v11106_v25 = vld [vmem:[%s11558_s23 + $0xc0] sm:$0xff]   ;;  %v11109_v29 = vld [vmem:[%s11558_s23 + $0x90] sm:$0xff]  }
 0x205   : > { %v1482_v32 = vmax.f32 %v1440_v28, 0.0  ;;  %v11108_v28 = vld [vmem:[%s11558_s23 + $0xc8] sm:$0xff]  }
 0x206   : > { %v1480_v34 = vmax.f32 %v1432_v30, 0.0  ;;  %v11110_v30 = vld [vmem:[%s11558_s23 + $0xd0] sm:$0xff]  }
 0x207   : > { %v11632_v35 = vpack.c.bf16 %v1482_v32, %v1481_v31  ;;  %9668 = vmatpush3.bf16.msra.mxu0 %v11618_v19  ;;  %9700 = vmatpush3.bf16.msra.mxu1 %v11618_v19  ;;  %v11111_v31 = vld [vmem:[%s11558_s23 + $0x98] sm:$0xff]  }
 0x208   : > { %v11636_v36 = vpack.c.bf16 %v1480_v34, %v1479_v33  ;;  %v9659_v37 = vpop.f32.mrb[8].mxu1  ;;  %v11112_v32 = vld [vmem:[%s11558_s23 + $0xd8] sm:$0xff]   ;;  %v11113_v33 = vld [vmem:[%s11558_s23 + $0xa0] sm:$0xff]  }
 0x209   : > { %v1453_v40 = vadd.f32 %v9659_v37, %v11612_v6  ;;  %v1444_v41 = vpop.f32.mrb[9].mxu1  ;;  %v11114_v34 = vld [vmem:[%s11558_s23 + $0xe0] sm:$0xff]   ;;  %v11115_v37 = vld [vmem:[%s11558_s23 + $0xa8] sm:$0xff]  }
 0x20a   : > { %v1445_v42 = vadd.f32 %v11612_v6, %v1444_v41  ;;  %v9660_v43 = vpop.f32.mrb[10].mxu1  ;;  %9669 = vmatprep.subr.bf16.mxu0 %v11636_v36  ;;  %9701 = vmatprep.subr.bf16.mxu1 %v11636_v36  ;;  %v11117_v41 = vld [vmem:[%s11558_s23 + $0xb0] sm:$0xff]  }
 0x20b   : > { %v1456_v44 = vadd.f32 %v9660_v43, %v11612_v6  ;;  %v1447_v45 = vpop.f32.mrb[11].mxu1  ;;  %9670 = vmatpush3.bf16.msra.mxu0 %v11636_v36  ;;  %9702 = vmatpush3.bf16.msra.mxu1 %v11636_v36  ;;  %v1485_v47 = vmax.f32 %v1453_v40, 0.0  ;;  %v11116_v40 = vld [vmem:[%s11558_s23 + $0xe8] sm:$0xff]   ;;  %v11119_v43 = vld [vmem:[%s11558_s23 + $0xb8] sm:$0xff]  }
 0x20c   : > { %v1448_v46 = vadd.f32 %v11612_v6, %v1447_v45  ;;  %9671 = vmatprep.subr.bf16.mxu0 %v11632_v35  ;;  %9703 = vmatprep.subr.bf16.mxu1 %v11632_v35  ;;  %v1483_v49 = vmax.f32 %v1445_v42, 0.0  ;;  %v11118_v42 = vld [vmem:[%s11558_s23 + $0xf0] sm:$0xff]   ;;  %v11121_v45 = vld [vmem:[%s11558_s23 + $0x100] sm:$0xff]  }
 0x20d   : > { %v1486_v48 = vmax.f32 %v1456_v44, 0.0  ;;  %v11120_v44 = vld [vmem:[%s11558_s23 + $0xf8] sm:$0xff]  }
 0x20e   : > { %v1484_v50 = vmax.f32 %v1448_v46, 0.0  ;;  %v11122_v46 = vld [vmem:[%s11558_s23 + $0x140] sm:$0xff]  }
 0x20f   : > { %v11648_v51 = vpack.c.bf16 %v1486_v48, %v1485_v47  ;;  %9672 = vmatpush3.bf16.msra.mxu0 %v11632_v35  ;;  %9704 = vmatpush3.bf16.msra.mxu1 %v11632_v35  ;;  %v11123_v47 = vld [vmem:[%s11558_s23 + $0x108] sm:$0xff]  }
 0x210   : > { %v11652_v54 = vpack.c.bf16 %v1484_v50, %v1483_v49  ;;  %v9663_v55 = vpop.f32.mrb[12].mxu1  ;;  %v11124_v48 = vld [vmem:[%s11558_s23 + $0x148] sm:$0xff]   ;;  %v11125_v49 = vld [vmem:[%s11558_s23 + $0x110] sm:$0xff]  }
 0x211   : > { %v1469_v56 = vadd.f32 %v9663_v55, %v11612_v6  ;;  %v1460_v57 = vpop.f32.mrb[13].mxu1  ;;  %v11126_v50 = vld [vmem:[%s11558_s23 + $0x150] sm:$0xff]   ;;  %v11127_v55 = vld [vmem:[%s11558_s23 + $0x118] sm:$0xff]  }
 0x212   : > { %v1461_v58 = vadd.f32 %v11612_v6, %v1460_v57  ;;  %v9664_v59 = vpop.f32.mrb[14].mxu1  ;;  %9673 = vmatprep.subr.bf16.mxu0 %v11652_v54  ;;  %9705 = vmatprep.subr.bf16.mxu1 %v11652_v54  ;;  %v11129_v57 = vld [vmem:[%s11558_s23 + $0x120] sm:$0xff]  }
 0x213   : > { %v1472_v60 = vadd.f32 %v9664_v59, %v11612_v6  ;;  %v1463_v61 = vpop.f32.mrb[15].mxu1  ;;  %9674 = vmatpush3.bf16.msra.mxu0 %v11652_v54  ;;  %9706 = vmatpush3.bf16.msra.mxu1 %v11652_v54  ;;  %v1489_v63 = vmax.f32 %v1469_v56, 0.0  ;;  %v11128_v56 = vld [vmem:[%s11558_s23 + $0x158] sm:$0xff]   ;;  %v11133_v59 = vld [vmem:[%s11558_s23 + $0x130] sm:$0xff]  }
 0x214   : > { %v1464_v62 = vadd.f32 %v11612_v6, %v1463_v61  ;;  %9675 = vmatprep.subr.bf16.mxu0 %v11648_v51  ;;  %9707 = vmatprep.subr.bf16.mxu1 %v11648_v51  ;;  %v1487_v1 = vmax.f32 %v1461_v58, 0.0  ;;  %v11091_v6 = vld [vmem:[%s11558_s23 + $0x8] sm:$0xff]   ;;  %v11138_v61 = vld [vmem:[%s11558_s23 + $0x1c0] sm:$0xff]  }
 0x215   : > { %v1490_v0 = vmax.f32 %v1472_v60, 0.0  ;;  %v11132_v58 = vld [vmem:[%s11558_s23 + $0x168] sm:$0xff]   ;;  %v11136_v60 = vld [vmem:[%s11558_s23 + $0x178] sm:$0xff]  }
 0x216   : > { %v1488_v4 = vmax.f32 %v1464_v62, 0.0  ;;  %v11153_v62 = vld [vmem:[%s11438_s12] sm:$0xff]  }
 0x217   : > { %v11664_v5 = vpack.c.bf16 %v1490_v0, %v1489_v63  ;;  %9676 = vmatpush3.bf16.msra.mxu0 %v11648_v51  ;;  %9708 = vmatpush3.bf16.msra.mxu1 %v11648_v51  ;;  %v11140_v63 = vld [vmem:[%s11558_s23 + $0x1c8] sm:$0xff]   ;;  %v11141_v0 = vld [vmem:[%s11558_s23 + $0x190] sm:$0xff]  }
 0x218   : > { %v11668_v7 = vpack.c.bf16 %v1488_v4, %v1487_v1  ;;  %v11142_v1 = vld [vmem:[%s11558_s23 + $0x1d0] sm:$0xff]   ;;  %v11143_v4 = vld [vmem:[%s11558_s23 + $0x198] sm:$0xff]  }
 0x21a   : > { %9677 = vmatprep.subr.bf16.mxu0 %v11668_v7  ;;  %9709 = vmatprep.subr.bf16.mxu1 %v11668_v7 }
 0x21b   : > { %9678 = vmatpush3.bf16.msra.mxu0 %v11668_v7  ;;  %9710 = vmatpush3.bf16.msra.mxu1 %v11668_v7 }
 0x21c   : > { %9679 = vmatprep.subr.bf16.mxu0 %v11664_v5  ;;  %9711 = vmatprep.subr.bf16.mxu1 %v11664_v5 }
 0x21f   : > { %9680 = vmatpush3.bf16.msra.mxu0 %v11664_v5  ;;  %9712 = vmatpush3.bf16.msra.mxu1 %v11664_v5 }
 0x220   : > { %9729 = vmatprep.subr.bf16.mxu0 %v11620_v20  ;;  %9761 = vmatprep.subr.bf16.mxu1 %v11620_v20 }
 0x222   : > { %9682 = vmatmul.mubr.bf16.vlgmr.msra.gmra.mrb[16].mxu0 %v11091_v6  ;;  %9714 = vmatmul.mubr.bf16.vlgmr.msra.gmra.mrb[16].mxu1 %v11092_v8  ;;  %v11145_v6 = vld [vmem:[%s11558_s23 + $0x1a0] sm:$0xff]   ;;  %v11147_v8 = vld [vmem:[%s11558_s23 + $0x1a8] sm:$0xff]  }
 0x223   : > { %9730 = vmatpush3.bf16.msra.mxu0 %v11620_v20  ;;  %9762 = vmatpush3.bf16.msra.mxu1 %v11620_v20 }
 0x224   : > { %9731 = vmatprep.subr.bf16.mxu0 %v11618_v19  ;;  %9763 = vmatprep.subr.bf16.mxu1 %v11618_v19 }
 0x225   : > { %9685 = vmatprep.mubr.bf16.mxu0 %v11093_v9  ;;  %9717 = vmatprep.mubr.bf16.mxu1 %v11094_v10  ;;  %v11148_v9 = vld [vmem:[%s11558_s23 + $0x1e8] sm:$0xff]   ;;  %v11149_v10 = vld [vmem:[%s11558_s23 + $0x1b0] sm:$0xff]  }
 0x227   : > { %9732 = vmatpush3.bf16.msra.mxu0 %v11618_v19  ;;  %9764 = vmatpush3.bf16.msra.mxu1 %v11618_v19 }
 0x228   : > { %9733 = vmatprep.subr.bf16.mxu0 %v11636_v36  ;;  %9765 = vmatprep.subr.bf16.mxu1 %v11636_v36 }
 0x22a   : > { %9686 = vmatmul.mubr.bf16.gmra.mrb[20].mxu0 %v11095_v11  ;;  %9718 = vmatmul.mubr.bf16.gmra.mrb[20].mxu1 %v11096_v12  ;;  %v11150_v11 = vld [vmem:[%s11558_s23 + $0x1f0] sm:$0xff]   ;;  %v11151_v12 = vld [vmem:[%s11558_s23 + $0x1b8] sm:$0xff]  }
 0x22b   : > { %9734 = vmatpush3.bf16.msra.mxu0 %v11636_v36  ;;  %9766 = vmatpush3.bf16.msra.mxu1 %v11636_v36 }
 0x22c   : > { %9735 = vmatprep.subr.bf16.mxu0 %v11632_v35  ;;  %9767 = vmatprep.subr.bf16.mxu1 %v11632_v35 }
 0x22d   : > { %9689 = vmatprep.mubr.bf16.mxu0 %v11097_v13  ;;  %9721 = vmatprep.mubr.bf16.mxu1 %v11098_v14  ;;  %v11152_v13 = vld [vmem:[%s11558_s23 + $0x1f8] sm:$0xff]  }
 0x22f   : > { %9736 = vmatpush3.bf16.msra.mxu0 %v11632_v35  ;;  %9768 = vmatpush3.bf16.msra.mxu1 %v11632_v35 }
 0x230   : > { %9737 = vmatprep.subr.bf16.mxu0 %v11652_v54  ;;  %9769 = vmatprep.subr.bf16.mxu1 %v11652_v54 }
 0x232   : > { %9690 = vmatmul.mubr.bf16.gmra.mrb[24].mxu0 %v11099_v15  ;;  %9722 = vmatmul.mubr.bf16.gmra.mrb[24].mxu1 %v11100_v16 }
 0x233   : > { %9738 = vmatpush3.bf16.msra.mxu0 %v11652_v54  ;;  %9770 = vmatpush3.bf16.msra.mxu1 %v11652_v54 }
 0x234   : > { %9739 = vmatprep.subr.bf16.mxu0 %v11648_v51  ;;  %9771 = vmatprep.subr.bf16.mxu1 %v11648_v51 }
 0x235   : > { %9693 = vmatprep.mubr.bf16.mxu0 %v11101_v17  ;;  %9725 = vmatprep.mubr.bf16.mxu1 %v11102_v18 }
 0x237   : > { %9740 = vmatpush3.bf16.msra.mxu0 %v11648_v51  ;;  %9772 = vmatpush3.bf16.msra.mxu1 %v11648_v51 }
 0x238   : > { %9741 = vmatprep.subr.bf16.mxu0 %v11668_v7  ;;  %9773 = vmatprep.subr.bf16.mxu1 %v11668_v7 }
 0x23a   : > { %9694 = vmatmul.mubr.bf16.gmra.mrb[28].mxu0 %v11103_v21  ;;  %9726 = vmatmul.mubr.bf16.gmra.mrb[28].mxu1 %v11104_v22 }
 0x23b   : > { %9742 = vmatpush3.bf16.msra.mxu0 %v11668_v7  ;;  %9774 = vmatpush3.bf16.msra.mxu1 %v11668_v7 }
 0x23c   : > { %9743 = vmatprep.subr.bf16.mxu0 %v11664_v5  ;;  %9775 = vmatprep.subr.bf16.mxu1 %v11664_v5 }
 0x23d   : > { %9745 = vmatprep.mubr.bf16.mxu0 %v11105_v23  ;;  %9777 = vmatprep.mubr.bf16.mxu1 %v11106_v25 }
 0x23f   : > { %9744 = vmatpush3.bf16.msra.mxu0 %v11664_v5  ;;  %9776 = vmatpush3.bf16.msra.mxu1 %v11664_v5 }
 0x240   : > { %9793 = vmatprep.subr.bf16.mxu0 %v11620_v20  ;;  %9825 = vmatprep.subr.bf16.mxu1 %v11620_v20 }
 0x242   : > { %9746 = vmatmul.mubr.bf16.vlgmr.msra.gmra.mrb[32].mxu0 %v11107_v27  ;;  %9778 = vmatmul.mubr.bf16.vlgmr.msra.gmra.mrb[32].mxu1 %v11108_v28 }
 0x243   : > { %9794 = vmatpush3.bf16.msra.mxu0 %v11620_v20  ;;  %9826 = vmatpush3.bf16.msra.mxu1 %v11620_v20 }
 0x244   : > { %9795 = vmatprep.subr.bf16.mxu0 %v11618_v19  ;;  %9827 = vmatprep.subr.bf16.mxu1 %v11618_v19 }
 0x245   : > { %9749 = vmatprep.mubr.bf16.mxu0 %v11109_v29  ;;  %9781 = vmatprep.mubr.bf16.mxu1 %v11110_v30 }
 0x247   : > { %9796 = vmatpush3.bf16.msra.mxu0 %v11618_v19  ;;  %9828 = vmatpush3.bf16.msra.mxu1 %v11618_v19 }
 0x248   : > { %9797 = vmatprep.subr.bf16.mxu0 %v11636_v36  ;;  %9829 = vmatprep.subr.bf16.mxu1 %v11636_v36 }
 0x24a   : > { %9750 = vmatmul.mubr.bf16.gmra.mrb[36].mxu0 %v11111_v31  ;;  %9782 = vmatmul.mubr.bf16.gmra.mrb[36].mxu1 %v11112_v32 }
 0x24b   : > { %9798 = vmatpush3.bf16.msra.mxu0 %v11636_v36  ;;  %9830 = vmatpush3.bf16.msra.mxu1 %v11636_v36 }
 0x24c   : > { %9799 = vmatprep.subr.bf16.mxu0 %v11632_v35  ;;  %9831 = vmatprep.subr.bf16.mxu1 %v11632_v35 }
 0x24d   : > { %9753 = vmatprep.mubr.bf16.mxu0 %v11113_v33  ;;  %9785 = vmatprep.mubr.bf16.mxu1 %v11114_v34 }
 0x24f   : > { %9800 = vmatpush3.bf16.msra.mxu0 %v11632_v35  ;;  %9832 = vmatpush3.bf16.msra.mxu1 %v11632_v35 }
 0x250   : > { %9801 = vmatprep.subr.bf16.mxu0 %v11652_v54  ;;  %9833 = vmatprep.subr.bf16.mxu1 %v11652_v54 }
 0x252   : > { %9754 = vmatmul.mubr.bf16.gmra.mrb[40].mxu0 %v11115_v37  ;;  %9786 = vmatmul.mubr.bf16.gmra.mrb[40].mxu1 %v11116_v40  ;;  %v11155_v37 = vld [vmem:[%s11448_s27] sm:$0xff]  }
 0x253   : > { %9802 = vmatpush3.bf16.msra.mxu0 %v11652_v54  ;;  %9834 = vmatpush3.bf16.msra.mxu1 %v11652_v54 }
 0x254   : > { %9803 = vmatprep.subr.bf16.mxu0 %v11648_v51  ;;  %9835 = vmatprep.subr.bf16.mxu1 %v11648_v51 }
 0x255   : > { %9757 = vmatprep.mubr.bf16.mxu0 %v11117_v41  ;;  %9789 = vmatprep.mubr.bf16.mxu1 %v11118_v42 }
 0x257   : > { %9804 = vmatpush3.bf16.msra.mxu0 %v11648_v51  ;;  %9836 = vmatpush3.bf16.msra.mxu1 %v11648_v51 }
 0x258   : > { %9805 = vmatprep.subr.bf16.mxu0 %v11668_v7  ;;  %9837 = vmatprep.subr.bf16.mxu1 %v11668_v7 }
 0x25a   : > { %9758 = vmatmul.mubr.bf16.gmra.mrb[44].mxu0 %v11119_v43  ;;  %9790 = vmatmul.mubr.bf16.gmra.mrb[44].mxu1 %v11120_v44 }
 0x25b   : > { %9806 = vmatpush3.bf16.msra.mxu0 %v11668_v7  ;;  %9838 = vmatpush3.bf16.msra.mxu1 %v11668_v7 }
 0x25c   : > { %9807 = vmatprep.subr.bf16.mxu0 %v11664_v5  ;;  %9839 = vmatprep.subr.bf16.mxu1 %v11664_v5 }
 0x25d   : > { %9809 = vmatprep.mubr.bf16.mxu0 %v11121_v45  ;;  %9841 = vmatprep.mubr.bf16.mxu1 %v11122_v46 }
 0x25f   : > { %9808 = vmatpush3.bf16.msra.mxu0 %v11664_v5  ;;  %9840 = vmatpush3.bf16.msra.mxu1 %v11664_v5 }
 0x260   : > { %9857 = vmatprep.subr.bf16.mxu0 %v11620_v20  ;;  %9889 = vmatprep.subr.bf16.mxu1 %v11620_v20 }
 0x262   : > { %9810 = vmatmul.mubr.bf16.vlgmr.msra.gmra.mrb[48].mxu0 %v11123_v47  ;;  %9842 = vmatmul.mubr.bf16.vlgmr.msra.gmra.mrb[48].mxu1 %v11124_v48 }
 0x263   : > { %9858 = vmatpush3.bf16.msra.mxu0 %v11620_v20  ;;  %9890 = vmatpush3.bf16.msra.mxu1 %v11620_v20  ;;  %v11130_v20 = vld [vmem:[%s11558_s23 + $0x160] sm:$0xff]  }
 0x264   : > { %9859 = vmatprep.subr.bf16.mxu0 %v11618_v19  ;;  %9891 = vmatprep.subr.bf16.mxu1 %v11618_v19 }
 0x265   : > { %9813 = vmatprep.mubr.bf16.mxu0 %v11125_v49  ;;  %9845 = vmatprep.mubr.bf16.mxu1 %v11126_v50 }
 0x267   : > { %9860 = vmatpush3.bf16.msra.mxu0 %v11618_v19  ;;  %9892 = vmatpush3.bf16.msra.mxu1 %v11618_v19  ;;  %v11131_v19 = vld [vmem:[%s11558_s23 + $0x128] sm:$0xff]  }
 0x268   : > { %9861 = vmatprep.subr.bf16.mxu0 %v11636_v36  ;;  %9893 = vmatprep.subr.bf16.mxu1 %v11636_v36 }
 0x26a   : > { %9814 = vmatmul.mubr.bf16.gmra.mrb[52].mxu0 %v11127_v55  ;;  %9846 = vmatmul.mubr.bf16.gmra.mrb[52].mxu1 %v11128_v56 }
 0x26b   : > { %9862 = vmatpush3.bf16.msra.mxu0 %v11636_v36  ;;  %9894 = vmatpush3.bf16.msra.mxu1 %v11636_v36  ;;  %v11134_v36 = vld [vmem:[%s11558_s23 + $0x170] sm:$0xff]  }
 0x26c   : > { %9863 = vmatprep.subr.bf16.mxu0 %v11632_v35  ;;  %9895 = vmatprep.subr.bf16.mxu1 %v11632_v35 }
 0x26d   : > { %9817 = vmatprep.mubr.bf16.mxu0 %v11129_v57  ;;  %9849 = vmatprep.mubr.bf16.mxu1 %v11130_v20 }
 0x26f   : > { %9864 = vmatpush3.bf16.msra.mxu0 %v11632_v35  ;;  %9896 = vmatpush3.bf16.msra.mxu1 %v11632_v35  ;;  %v11135_v35 = vld [vmem:[%s11558_s23 + $0x138] sm:$0xff]  }
 0x270   : > { %9865 = vmatprep.subr.bf16.mxu0 %v11652_v54  ;;  %9897 = vmatprep.subr.bf16.mxu1 %v11652_v54 }
 0x272   : > { %9818 = vmatmul.mubr.bf16.gmra.mrb[56].mxu0 %v11131_v19  ;;  %9850 = vmatmul.mubr.bf16.gmra.mrb[56].mxu1 %v11132_v58 }
 0x273   : > { %9866 = vmatpush3.bf16.msra.mxu0 %v11652_v54  ;;  %9898 = vmatpush3.bf16.msra.mxu1 %v11652_v54  ;;  %v11137_v54 = vld [vmem:[%s11558_s23 + $0x180] sm:$0xff]  }
 0x274   : > { %9867 = vmatprep.subr.bf16.mxu0 %v11648_v51  ;;  %9899 = vmatprep.subr.bf16.mxu1 %v11648_v51 }
 0x275   : > { %9821 = vmatprep.mubr.bf16.mxu0 %v11133_v59  ;;  %9853 = vmatprep.mubr.bf16.mxu1 %v11134_v36 }
 0x277   : > { %9868 = vmatpush3.bf16.msra.mxu0 %v11648_v51  ;;  %9900 = vmatpush3.bf16.msra.mxu1 %v11648_v51  ;;  %v11139_v51 = vld [vmem:[%s11558_s23 + $0x188] sm:$0xff]  }
 0x278   : > { %9869 = vmatprep.subr.bf16.mxu0 %v11668_v7  ;;  %9901 = vmatprep.subr.bf16.mxu1 %v11668_v7 }
 0x27a   : > { %9822 = vmatmul.mubr.bf16.gmra.mrb[60].mxu0 %v11135_v35  ;;  %9854 = vmatmul.mubr.bf16.gmra.mrb[60].mxu1 %v11136_v60 }
 0x27b   : > { %9870 = vmatpush3.bf16.msra.mxu0 %v11668_v7  ;;  %9902 = vmatpush3.bf16.msra.mxu1 %v11668_v7  ;;  %v11144_v7 = vld [vmem:[%s11558_s23 + $0x1d8] sm:$0xff]  }
 0x27c   : > { %9871 = vmatprep.subr.bf16.mxu0 %v11664_v5  ;;  %9903 = vmatprep.subr.bf16.mxu1 %v11664_v5 }
 0x27d   : > { %9873 = vmatprep.mubr.bf16.mxu0 %v11137_v54  ;;  %9905 = vmatprep.mubr.bf16.mxu1 %v11138_v61 }
 0x27f   : > { %9872 = vmatpush3.bf16.msra.mxu0 %v11664_v5  ;;  %9904 = vmatpush3.bf16.msra.mxu1 %v11664_v5  ;;  %v11146_v5 = vld [vmem:[%s11558_s23 + $0x1e0] sm:$0xff]  }
 0x280   : > { %9921 = vmatprep.subr.bf16.mxu0 %v11153_v62  ;;  %10947 = vmatprep.subr.bf16.mxu1 %v11153_v62 }
 0x282   : > { %9874 = vmatmul.mubr.bf16.vlgmr.msra.gmra.mrb[64].mxu0 %v11139_v51  ;;  %9906 = vmatmul.mubr.bf16.vlgmr.msra.gmra.mrb[64].mxu1 %v11140_v63 }
 0x283   : > { %9877 = vmatprep.mubr.bf16.mxu0 %v11141_v0  ;;  %9909 = vmatprep.mubr.bf16.mxu1 %v11142_v1 }
 0x284   : > { %9922 = vmatpush3.bf16.msra.mxu0 %v11153_v62  ;;  %10948 = vmatpush3.bf16.msra.mxu1 %v11153_v62 }
 0x285   : > { %9957 = vmatprep.subr.bf16.mxu1 %v11155_v37 }
 0x28a   : > { %9878 = vmatmul.mubr.bf16.gmra.mrb[68].mxu0 %v11143_v4  ;;  %9910 = vmatmul.mubr.bf16.gmra.mrb[68].mxu1 %v11144_v7 }
 0x28b   : > { %9881 = vmatprep.mubr.bf16.mxu0 %v11145_v6  ;;  %9913 = vmatprep.mubr.bf16.mxu1 %v11146_v5 }
 0x292   : > { %9882 = vmatmul.mubr.bf16.gmra.mrb[72].mxu0 %v11147_v8  ;;  %9914 = vmatmul.mubr.bf16.gmra.mrb[72].mxu1 %v11148_v9 }
 0x293   : > { %9885 = vmatprep.mubr.bf16.mxu0 %v11149_v10  ;;  %9917 = vmatprep.mubr.bf16.mxu1 %v11150_v11 }
 0x29a   : > { %9886 = vmatmul.mubr.bf16.gmra.mrb[76].mxu0 %v11151_v12  ;;  %9918 = vmatmul.mubr.bf16.gmra.mrb[76].mxu1 %v11152_v13 }
 0x29b   : > { %9923 = vmatprep.mubr.msk.bf16.mxu0 %vm1353_vm2, %v11579_v26  ;;  %9931 = vmatprep.mubr.msk.bf16.mxu1 %vm1353_vm2, %v11595_v53  ;;  %v11154_v26 = vld [vmem:[%s11428_s30] sm:$0xff]  }
 0x29c   : > { %9939 = vmatprep.subr.bf16.mxu0 %v11154_v26 }
 0x2a2   : > { %9924 = vmatmul.mubr.msk.bf16.vlgmr.msra.gmra.mrb[80].mxu0 %vm1353_vm2, %v11577_v24  ;;  %9932 = vmatmul.mubr.msk.bf16.vlgmr.msra.gmra.mrb[80].mxu1 %vm1353_vm2, %v11593_v52 }
 0x2a3   : > { %9927 = vmatprep.mubr.msk.bf16.mxu0 %vm1353_vm2, %v11587_v39  ;;  %9935 = vmatprep.mubr.msk.bf16.mxu1 %vm1353_vm2, %v11603_v3 }
 0x2a4   : > { %9940 = vmatpush3.bf16.msra.mxu0 %v11154_v26  ;;  %9958 = vmatpush3.bf16.msra.mxu1 %v11155_v37 }
 0x2aa   : > { %9928 = vmatmul.mubr.msk.bf16.gmra.mrb[84].mxu0 %vm1353_vm2, %v11585_v38  ;;  %9936 = vmatmul.mubr.msk.bf16.gmra.mrb[84].mxu1 %vm1353_vm2, %v11601_v2 }
 0x2f5   : > { %v9683_v53 = vpop.f32.mrb[16].mxu0  ;;  %v9715_v24 = vpop.f32.mrb[16].mxu1 }
 0x2f6   : > { %v1824_v14 = vmax.f32 %v9683_v53, %v9715_v24  ;;  %v1597_v15 = vpop.f32.mrb[17].mxu0  ;;  %v1759_v52 = vpop.f32.mrb[17].mxu1 }
 0x2f7   : > { %v1822_v16 = vmax.f32 %v1597_v15, %v1759_v52  ;;  %v9684_v17 = vpop.f32.mrb[18].mxu0  ;;  %v9716_v39 = vpop.f32.mrb[18].mxu1 }
 0x2f8   : > { %v1825_v18 = vmax.f32 %v9684_v17, %v9716_v39  ;;  %v1600_v3 = vpop.f32.mrb[19].mxu0  ;;  %v1762_v21 = vpop.f32.mrb[19].mxu1 }
 0x2f9   : > { %v1823_v22 = vmax.f32 %v1600_v3, %v1762_v21 }
 0x2fd   : > { %v9687_v38 = vpop.f32.mrb[20].mxu0  ;;  %v9719_v23 = vpop.f32.mrb[20].mxu1 }
 0x2fe   : > { %v1828_v25 = vmax.f32 %v9687_v38, %v9719_v23  ;;  %v1613_v2 = vpop.f32.mrb[21].mxu0  ;;  %v1775_v27 = vpop.f32.mrb[21].mxu1 }
 0x2ff   : > { %v1826_v28 = vmax.f32 %v1613_v2, %v1775_v27  ;;  %v9688_v29 = vpop.f32.mrb[22].mxu0  ;;  %v9720_v30 = vpop.f32.mrb[22].mxu1 }
 0x300   : > { %v1829_v31 = vmax.f32 %v9688_v29, %v9720_v30  ;;  %v1616_v32 = vpop.f32.mrb[23].mxu0  ;;  %v1778_v33 = vpop.f32.mrb[23].mxu1 }
 0x301   : > { %v1827_v34 = vmax.f32 %v1616_v32, %v1778_v33 }
 0x305   : > { %v9691_v40 = vpop.f32.mrb[24].mxu0  ;;  %v9723_v41 = vpop.f32.mrb[24].mxu1 }
 0x306   : > { %v1832_v42 = vmax.f32 %v9691_v40, %v9723_v41  ;;  %v1629_v43 = vpop.f32.mrb[25].mxu0  ;;  %v1791_v44 = vpop.f32.mrb[25].mxu1 }
 0x307   : > { %v1830_v45 = vmax.f32 %v1629_v43, %v1791_v44  ;;  %v9692_v46 = vpop.f32.mrb[26].mxu0  ;;  %v9724_v47 = vpop.f32.mrb[26].mxu1 }
 0x308   : > { %v1833_v48 = vmax.f32 %v9692_v46, %v9724_v47  ;;  %v1632_v49 = vpop.f32.mrb[27].mxu0  ;;  %v1794_v50 = vpop.f32.mrb[27].mxu1 }
 0x309   : > { %v1831_v55 = vmax.f32 %v1632_v49, %v1794_v50 }
 0x30d   : > { %v11855_v56 = vpop.f32.mrb[28].mxu0  ;;  %v9727_v57 = vpop.f32.mrb[28].mxu1 }
 0x30e   : > { %v1836_v20 = vmax.f32 %v11855_v56, %v9727_v57  ;;  %v11858_v19 = vpop.f32.mrb[29].mxu0  ;;  %v1807_v58 = vpop.f32.mrb[29].mxu1 }
 0x30f   : > { %v1834_v59 = vmax.f32 %v11858_v19, %v1807_v58  ;;  %v11861_v36 = vpop.f32.mrb[30].mxu0  ;;  %v9728_v35 = vpop.f32.mrb[30].mxu1 }
 0x310   : > { %v1837_v60 = vmax.f32 %v11861_v36, %v9728_v35  ;;  %v11864_v54 = vpop.f32.mrb[31].mxu0  ;;  %v11866_v61 = vpop.f32.mrb[31].mxu1 }
 0x311   : > { %v1835_v62 = vmax.f32 %v11864_v54, %v11866_v61 }
 0x315   : > { %v9747_v51 = vpop.f32.mrb[32].mxu0  ;;  %v11870_v63 = vpop.f32.mrb[32].mxu1 }
 0x316   : > { %v11872_v0 = vmax.f32 %v1824_v14, %v9747_v51  ;;  %v1937_v1 = vpop.f32.mrb[33].mxu0  ;;  %v11874_v4 = vpop.f32.mrb[33].mxu1 }
 0x317   : > { %v11876_v7 = vmax.f32 %v1822_v16, %v1937_v1  ;;  %v9748_v6 = vpop.f32.mrb[34].mxu0  ;;  %v11878_v5 = vpop.f32.mrb[34].mxu1 }
 0x318   : > { %v2180_v8 = vmax.f32 %v11872_v0, %v11870_v63  ;;  %v11882_v9 = vmax.f32 %v1825_v18, %v9748_v6  ;;  %v1940_v10 = vpop.f32.mrb[35].mxu0  ;;  %v11884_v11 = vpop.f32.mrb[35].mxu1 }
 0x319   : > { %v2178_v12 = vmax.f32 %v11876_v7, %v11874_v4  ;;  %v11888_v13 = vmax.f32 %v1823_v22, %v1940_v10 }
 0x31a   : > { %v2181_v26 = vmax.f32 %v11882_v9, %v11878_v5 }
 0x31b   : > { %v2179_v53 = vmax.f32 %v11888_v13, %v11884_v11 }
 0x31d   : > { %v9751_v24 = vpop.f32.mrb[36].mxu0  ;;  %v11894_v14 = vpop.f32.mrb[36].mxu1 }
 0x31e   : > { %v11896_v15 = vmax.f32 %v1828_v25, %v9751_v24  ;;  %v1953_v52 = vpop.f32.mrb[37].mxu0  ;;  %v11898_v16 = vpop.f32.mrb[37].mxu1 }
 0x31f   : > { %v11900_v17 = vmax.f32 %v1826_v28, %v1953_v52  ;;  %v9752_v39 = vpop.f32.mrb[38].mxu0  ;;  %v11902_v18 = vpop.f32.mrb[38].mxu1 }
 0x320   : > { %v2184_v3 = vmax.f32 %v11896_v15, %v11894_v14  ;;  %v11906_v21 = vmax.f32 %v1829_v31, %v9752_v39  ;;  %v1956_v22 = vpop.f32.mrb[39].mxu0  ;;  %v11908_v38 = vpop.f32.mrb[39].mxu1 }
 0x321   : > { %v2182_v23 = vmax.f32 %v11900_v17, %v11898_v16  ;;  %v11912_v25 = vmax.f32 %v1827_v34, %v1956_v22 }
 0x322   : > { %v2185_v2 = vmax.f32 %v11906_v21, %v11902_v18 }
 0x323   : > { %v2183_v27 = vmax.f32 %v11912_v25, %v11908_v38 }
 0x325   : > { %v9755_v28 = vpop.f32.mrb[40].mxu0  ;;  %v11918_v29 = vpop.f32.mrb[40].mxu1 }
 0x326   : > { %v11920_v30 = vmax.f32 %v1832_v42, %v9755_v28  ;;  %v1969_v31 = vpop.f32.mrb[41].mxu0  ;;  %v11922_v32 = vpop.f32.mrb[41].mxu1 }
 0x327   : > { %v11924_v33 = vmax.f32 %v1830_v45, %v1969_v31  ;;  %v9756_v37 = vpop.f32.mrb[42].mxu0  ;;  %v11926_v40 = vpop.f32.mrb[42].mxu1 }
 0x328   : > { %v11928_v34 = vmax.f32 %v1833_v48, %v9756_v37  ;;  %v1972_v41 = vpop.f32.mrb[43].mxu0  ;;  %v11930_v43 = vpop.f32.mrb[43].mxu1  ;;  %v2188_v44 = vmax.f32 %v11920_v30, %v11918_v29 }
 0x329   : > { %v11934_v46 = vmax.f32 %v1831_v55, %v1972_v41  ;;  %v2186_v42 = vmax.f32 %v11924_v33, %v11922_v32 }
 0x32a   : > { %v2189_v45 = vmax.f32 %v11928_v34, %v11926_v40 }
 0x32b   : > { %v2187_v47 = vmax.f32 %v11934_v46, %v11930_v43 }
 0x32d   : > { %v9759_v49 = vpop.f32.mrb[44].mxu0  ;;  %v11942_v48 = vpop.f32.mrb[44].mxu1 }
 0x32e   : > { %v11944_v50 = vmax.f32 %v1836_v20, %v9759_v49  ;;  %v1985_v56 = vpop.f32.mrb[45].mxu0  ;;  %v11946_v57 = vpop.f32.mrb[45].mxu1 }
 0x32f   : > { %v11948_v19 = vmax.f32 %v1834_v59, %v1985_v56  ;;  %v9760_v55 = vpop.f32.mrb[46].mxu0  ;;  %v11950_v58 = vpop.f32.mrb[46].mxu1 }
 0x330   : > { %v11952_v36 = vmax.f32 %v1837_v60, %v9760_v55  ;;  %v1988_v35 = vpop.f32.mrb[47].mxu0  ;;  %v11954_v54 = vpop.f32.mrb[47].mxu1  ;;  %v2192_v61 = vmax.f32 %v11944_v50, %v11942_v48 }
 0x331   : > { %v11958_v51 = vmax.f32 %v1835_v62, %v1988_v35  ;;  %v2190_v20 = vmax.f32 %v11948_v19, %v11946_v57 }
 0x332   : > { %v2193_v59 = vmax.f32 %v11952_v36, %v11950_v58 }
 0x333   : > { %v2191_v63 = vmax.f32 %v11958_v51, %v11954_v54 }
 0x335   : > { %v9811_v0 = vpop.f32.mrb[48].mxu0  ;;  %v11966_v60 = vpop.f32.mrb[48].mxu1 }
 0x336   : > { %v11968_v1 = vmax.f32 %v2180_v8, %v9811_v0  ;;  %v2293_v4 = vpop.f32.mrb[49].mxu0  ;;  %v11970_v7 = vpop.f32.mrb[49].mxu1 }
 0x337   : > { %v11972_v6 = vmax.f32 %v2178_v12, %v2293_v4  ;;  %v9812_v62 = vpop.f32.mrb[50].mxu0  ;;  %v11974_v5 = vpop.f32.mrb[50].mxu1 }
 0x338   : > { %v11976_v9 = vmax.f32 %v2181_v26, %v9812_v62  ;;  %v2296_v10 = vpop.f32.mrb[51].mxu0  ;;  %v11978_v11 = vpop.f32.mrb[51].mxu1  ;;  %v2536_v13 = vmax.f32 %v11968_v1, %v11966_v60 }
 0x339   : > { %v11982_v24 = vmax.f32 %v2179_v53, %v2296_v10  ;;  %v2534_v8 = vmax.f32 %v11972_v6, %v11970_v7 }
 0x33a   : > { %v2537_v12 = vmax.f32 %v11976_v9, %v11974_v5 }
 0x33b   : > { %v2535_v14 = vmax.f32 %v11982_v24, %v11978_v11 }
 0x33d   : > { %v9815_v15 = vpop.f32.mrb[52].mxu0  ;;  %v11990_v26 = vpop.f32.mrb[52].mxu1 }
 0x33e   : > { %v11992_v52 = vmax.f32 %v2184_v3, %v9815_v15  ;;  %v2309_v16 = vpop.f32.mrb[53].mxu0  ;;  %v11994_v17 = vpop.f32.mrb[53].mxu1 }
 0x33f   : > { %v11996_v39 = vmax.f32 %v2182_v23, %v2309_v16  ;;  %v9816_v53 = vpop.f32.mrb[54].mxu0  ;;  %v11998_v18 = vpop.f32.mrb[54].mxu1 }
 0x340   : > { %v12000_v21 = vmax.f32 %v2185_v2, %v9816_v53  ;;  %v2312_v22 = vpop.f32.mrb[55].mxu0  ;;  %v12002_v38 = vpop.f32.mrb[55].mxu1  ;;  %v2540_v25 = vmax.f32 %v11992_v52, %v11990_v26 }
 0x341   : > { %v12006_v28 = vmax.f32 %v2183_v27, %v2312_v22  ;;  %v2538_v3 = vmax.f32 %v11996_v39, %v11994_v17 }
 0x342   : > { %v2541_v23 = vmax.f32 %v12000_v21, %v11998_v18 }
 0x343   : > { %v2539_v29 = vmax.f32 %v12006_v28, %v12002_v38 }
 0x345   : > { %v9819_v30 = vpop.f32.mrb[56].mxu0  ;;  %v12014_v2 = vpop.f32.mrb[56].mxu1 }
 0x346   : > { %v12016_v31 = vmax.f32 %v2188_v44, %v9819_v30  ;;  %v2325_v32 = vpop.f32.mrb[57].mxu0  ;;  %v12018_v33 = vpop.f32.mrb[57].mxu1 }
 0x347   : > { %v12020_v37 = vmax.f32 %v2186_v42, %v2325_v32  ;;  %v9820_v27 = vpop.f32.mrb[58].mxu0  ;;  %v12022_v40 = vpop.f32.mrb[58].mxu1 }
 0x348   : > { %v2544_v34 = vmax.f32 %v12016_v31, %v12014_v2  ;;  %v12026_v41 = vmax.f32 %v2189_v45, %v9820_v27  ;;  %v2328_v43 = vpop.f32.mrb[59].mxu0  ;;  %v12028_v46 = vpop.f32.mrb[59].mxu1 }
 0x349   : > { %v2542_v44 = vmax.f32 %v12020_v37, %v12018_v33  ;;  %v12032_v49 = vmax.f32 %v2187_v47, %v2328_v43 }
 0x34a   : > { %v2545_v42 = vmax.f32 %v12026_v41, %v12022_v40 }
 0x34b   : > { %v2543_v48 = vmax.f32 %v12032_v49, %v12028_v46 }
 0x34d   : > { %v9823_v50 = vpop.f32.mrb[60].mxu0  ;;  %v12038_v56 = vpop.f32.mrb[60].mxu1 }
 0x34e   : > { %v12040_v57 = vmax.f32 %v2192_v61, %v9823_v50  ;;  %v2341_v45 = vpop.f32.mrb[61].mxu0  ;;  %v12042_v19 = vpop.f32.mrb[61].mxu1 }
 0x34f   : > { %v12044_v55 = vmax.f32 %v2190_v20, %v2341_v45  ;;  %v9824_v58 = vpop.f32.mrb[62].mxu0  ;;  %v12046_v36 = vpop.f32.mrb[62].mxu1 }
 0x350   : > { %v2548_v47 = vmax.f32 %v12040_v57, %v12038_v56  ;;  %v12050_v35 = vmax.f32 %v2193_v59, %v9824_v58  ;;  %v2344_v54 = vpop.f32.mrb[63].mxu0  ;;  %v12052_v51 = vpop.f32.mrb[63].mxu1 }
 0x351   : > { %v2546_v61 = vmax.f32 %v12044_v55, %v12042_v19  ;;  %v12056_v0 = vmax.f32 %v2191_v63, %v2344_v54 }
 0x352   : > { %v2549_v20 = vmax.f32 %v12050_v35, %v12046_v36 }
 0x353   : > { %v2547_v60 = vmax.f32 %v12056_v0, %v12052_v51 }
 0x355   : > { %v9875_v1 = vpop.f32.mrb[64].mxu0  ;;  %v9907_v4 = vpop.f32.mrb[64].mxu1 }
 0x356   : > { %v2714_v7 = vmax.f32 %v2536_v13, %v9875_v1  ;;  %v2649_v6 = vpop.f32.mrb[65].mxu0  ;;  %v2827_v59 = vpop.f32.mrb[65].mxu1 }
 0x357   : > { %v2712_v62 = vmax.f32 %v2534_v8, %v2649_v6  ;;  %v9876_v5 = vpop.f32.mrb[66].mxu0  ;;  %v9908_v9 = vpop.f32.mrb[66].mxu1 }
 0x358   : > { %v2892_v10 = vmax.f32 %v2714_v7, %v9907_v4  ;;  %v2715_v11 = vmax.f32 %v2537_v12, %v9876_v5  ;;  %v2652_v24 = vpop.f32.mrb[67].mxu0  ;;  %v2830_v15 = vpop.f32.mrb[67].mxu1 }
 0x359   : > { %v2890_v63 = vmax.f32 %v2712_v62, %v2827_v59  ;;  %v2713_v26 = vmax.f32 %v2535_v14, %v2652_v24 }
 0x35a   : > { %v2893_v52 = vmax.f32 %v2715_v11, %v9908_v9 }
 0x35b   : > { %v2891_v16 = vmax.f32 %v2713_v26, %v2830_v15 }
 0x35c   : > { %v3021_v17 = vpack.c.bf16 %v2893_v52, %v2892_v10 }
 0x35d   : > { %v3020_v39 = vpack.c.bf16 %v2891_v16, %v2890_v63  ;;  %v9879_v53 = vpop.f32.mrb[68].mxu0  ;;  %v9911_v18 = vpop.f32.mrb[68].mxu1  ;;  %v11254_v16 = vld [vmem:[%s11558_s23 + $0x40] sm:$0xff]  }
 0x35e   : > { %v2718_v21 = vmax.f32 %v2540_v25, %v9879_v53  ;;  %v2665_v22 = vpop.f32.mrb[69].mxu0  ;;  %v2843_v13 = vpop.f32.mrb[69].mxu1  ;;  %v8609_v53 = vld [vmem:[%s11433_s6] ss:$0 sm:$0xff] }
 0x35f   : > { %v2716_v30 = vmax.f32 %v2538_v3, %v2665_v22  ;;  %v9880_v32 = vpop.f32.mrb[70].mxu0  ;;  %v9912_v8 = vpop.f32.mrb[70].mxu1  ;;  %9941 = vmatprep.mubr.msk.bf16.mxu0 %vm1353_vm2, %v3020_v39  ;;  %v11156_v39 = vld [vmem:[%s11448_s27 + $0x8] sm:$0xff]  }
 0x360   : > { %v2896_v27 = vmax.f32 %v2718_v21, %v9911_v18  ;;  %v2719_v12 = vmax.f32 %v2541_v23, %v9880_v32  ;;  %v2668_v43 = vpop.f32.mrb[71].mxu0  ;;  %v2846_v50 = vpop.f32.mrb[71].mxu1  ;;  %9942 = vmatmul.mubr.msk.bf16.vlgmr.msra.gmra.mrb[80].mxu0 %vm1353_vm2, %v3021_v17  ;;  %9959 = vmatprep.subr.bf16.mxu1 %v11156_v39  ;;  %v12101_v18 = vld [vmem:[%s11423_s24] ss:$0 sm:$0xff] }
 0x361   : > { %v2894_v14 = vmax.f32 %v2716_v30, %v2843_v13  ;;  %v2717_v45 = vmax.f32 %v2539_v29, %v2668_v43  ;;  %9960 = vmatpush3.bf16.msra.mxu1 %v11156_v39  ;;  %v10955_v21 = vadd.f32 %v12101_v18, %v8609_v53 }
 0x362   : > { %v2897_v58 = vmax.f32 %v2719_v12, %v9912_v8 }
 0x363   : > { %v2895_v25 = vmax.f32 %v2717_v45, %v2846_v50 }
 0x364   : > { %v3023_v54 = vpack.c.bf16 %v2897_v58, %v2896_v27 }
 0x365   : > { %v3022_v1 = vpack.c.bf16 %v2895_v25, %v2894_v14  ;;  %v9883_v3 = vpop.f32.mrb[72].mxu0  ;;  %v9915_v4 = vpop.f32.mrb[72].mxu1 }
 0x366   : > { %v2722_v7 = vmax.f32 %v2544_v34, %v9883_v3  ;;  %v2681_v23 = vpop.f32.mrb[73].mxu0  ;;  %v2859_v6 = vpop.f32.mrb[73].mxu1 }
 0x367   : > { %v2720_v59 = vmax.f32 %v2542_v44, %v2681_v23  ;;  %v9884_v62 = vpop.f32.mrb[74].mxu0  ;;  %v9916_v5 = vpop.f32.mrb[74].mxu1  ;;  %9945 = vmatprep.mubr.msk.bf16.mxu0 %vm1353_vm2, %v3022_v1 }
 0x368   : > { %v2900_v38 = vmax.f32 %v2722_v7, %v9915_v4  ;;  %v2723_v28 = vmax.f32 %v2545_v42, %v9884_v62  ;;  %v2684_v29 = vpop.f32.mrb[75].mxu0  ;;  %v2862_v9 = vpop.f32.mrb[75].mxu1  ;;  %9946 = vmatmul.mubr.msk.bf16.gmra.mrb[84].mxu0 %vm1353_vm2, %v3023_v54 }
 0x369   : > { %v2898_v2 = vmax.f32 %v2720_v59, %v2859_v6  ;;  %v2721_v31 = vmax.f32 %v2543_v48, %v2684_v29 }
 0x36a   : > { %v2901_v33 = vmax.f32 %v2723_v28, %v9916_v5 }
 0x36b   : > { %v2899_v37 = vmax.f32 %v2721_v31, %v2862_v9 }
 0x36c   : > { %v3025_v34 = vpack.c.bf16 %v2901_v33, %v2900_v38 }
 0x36d   : > { %v3024_v44 = vpack.c.bf16 %v2899_v37, %v2898_v2  ;;  %v9887_v10 = vpop.f32.mrb[76].mxu0  ;;  %v9919_v11 = vpop.f32.mrb[76].mxu1 }
 0x36e   : > { %v2726_v40 = vmax.f32 %v2548_v47, %v9887_v10  ;;  %v2697_v41 = vpop.f32.mrb[77].mxu0  ;;  %v2875_v42 = vpop.f32.mrb[77].mxu1 }
 0x36f   : > { %v2724_v24 = vmax.f32 %v2546_v61, %v2697_v41  ;;  %v9888_v15 = vpop.f32.mrb[78].mxu0  ;;  %v9920_v63 = vpop.f32.mrb[78].mxu1  ;;  %9949 = vmatprep.mubr.msk.bf16.mxu0 %vm1353_vm2, %v3024_v44 }
 0x370   : > { %v2904_v46 = vmax.f32 %v2726_v40, %v9919_v11  ;;  %v2727_v49 = vmax.f32 %v2549_v20, %v9888_v15  ;;  %v2700_v48 = vpop.f32.mrb[79].mxu0  ;;  %v2878_v26 = vpop.f32.mrb[79].mxu1  ;;  %9950 = vmatmul.mubr.msk.bf16.gmra.mrb[88].mxu0 %vm1353_vm2, %v3025_v34 }
 0x371   : > { %v2902_v56 = vmax.f32 %v2724_v24, %v2875_v42  ;;  %v2725_v57 = vmax.f32 %v2547_v60, %v2700_v48 }
 0x372   : > { %v2905_v19 = vmax.f32 %v2727_v49, %v9920_v63 }
 0x373   : > { %v2903_v55 = vmax.f32 %v2725_v57, %v2878_v26 }
 0x374   : > { %v3027_v47 = vpack.c.bf16 %v2905_v19, %v2904_v46 }
 0x375   : > { %v3026_v61 = vpack.c.bf16 %v2903_v55, %v2902_v56  ;;  %v9933_v52 = vpop.f32.mrb[80].mxu1 }
 0x376   : > { %v2987_v36 = vpop.f32.mrb[81].mxu1  ;;  %v2996_v59 = vadd.f32 %v9933_v52, %v8609_v53 }
 0x377   : > { %v9934_v35 = vpop.f32.mrb[82].mxu1  ;;  %9953 = vmatprep.mubr.msk.bf16.mxu0 %vm1353_vm2, %v3026_v61  ;;  %v2988_v28 = vadd.f32 %v8609_v53, %v2987_v36 }
 0x378   : > { %v2990_v20 = vpop.f32.mrb[83].mxu1  ;;  %9954 = vmatmul.mubr.msk.bf16.gmra.mrb[92].mxu0 %vm1353_vm2, %v3027_v47  ;;  %v2999_v9 = vadd.f32 %v9934_v35, %v8609_v53  ;;  %v10966_v44 = vadd.f32 %v12101_v18, %v2996_v59  ;;  %v12204_v59 = vld [vmem:[%s13601_s7] ss:$0 sm:$0xff]  ;;  %s13635_s7 = sld [smem:[#allocation11_spill]] }
 0x379   : > { %10025 = vmatprep.mubr.bf16.mxu0 %v11254_v16  ;;  %v2991_v31 = vadd.f32 %v8609_v53, %v2990_v20  ;;  %v10969_v40 = vadd.f32 %v12101_v18, %v2988_v28 }
 0x37a   : > { %v10972_v15 = vadd.f32 %v12101_v18, %v2999_v9 }
 0x37b   : > { %v10975_v49 = vadd.f32 %v12101_v18, %v2991_v31 }
 0x37d   : > { %v9937_v17 = vpop.f32.mrb[84].mxu1 }
 0x37e   : > { %v3003_v51 = vpop.f32.mrb[85].mxu1  ;;  %v3012_v48 = vadd.f32 %v9937_v17, %v8609_v53 }
 0x37f   : > { %v9938_v0 = vpop.f32.mrb[86].mxu1  ;;  %v3004_v57 = vadd.f32 %v8609_v53, %v3003_v51 }
 0x380   : > { %v3006_v60 = vpop.f32.mrb[87].mxu1  ;;  %v3015_v55 = vadd.f32 %v9938_v0, %v8609_v53  ;;  %v10978_v20 = vadd.f32 %v12101_v18, %v3012_v48 }
 0x381   : > { %v3007_v61 = vadd.f32 %v8609_v53, %v3006_v60  ;;  %v10981_v51 = vadd.f32 %v12101_v18, %v3004_v57 }
 0x433   : > { %v9943_v22 = vpop.f32.mrb[80].mxu0 }
 0x434   : > { %v10949_v13 = vadd.f32 %v9943_v22, %v8609_v53  ;;  %v3099_v30 = vpop.f32.mrb[81].mxu0 }
 0x435   : > { %v10951_v32 = vadd.f32 %v8609_v53, %v3099_v30  ;;  %v9944_v8 = vpop.f32.mrb[82].mxu0  ;;  %v10984_v53 = vadd.f32 %v12101_v18, %v3015_v55 }
 0x436   : > { %v12105_v27 = vadd.f32 %v10949_v13, %v12101_v18  ;;  %v12107_v12 = vadd.f32 %v10955_v21, %v9944_v8  ;;  %v3102_v43 = vpop.f32.mrb[83].mxu0  ;;  %v10987_v13 = vadd.f32 %v12101_v18, %v3007_v61 }
 0x437   : > { %v12110_v50 = vadd.f32 %v10951_v32, %v12101_v18  ;;  %v12112_v14 = vadd.f32 %v10955_v21, %v3102_v43 }
 0x438   : > { %v13583_v45 = vmax.f32 %v12105_v27, 0.0  ;;  %v13581_v58 = vmax.f32 %v12107_v12, 0.0 }
 0x439   : > { %v13582_v25 = vmax.f32 %v12110_v50, 0.0  ;;  %v13580_v54 = vmax.f32 %v12112_v14, 0.0 }
 0x43a   : > { %v3199_v4 = vpack.c.bf16 %v13581_v58, %v13583_v45 }
 0x43b   : > { %v3198_v1 = vpack.c.bf16 %v13580_v54, %v13582_v25  ;;  %v9947_v3 = vpop.f32.mrb[84].mxu0 }
 0x43c   : > { %v3115_v7 = vpop.f32.mrb[85].mxu0  ;;  %v12129_v62 = vadd.f32 %v10955_v21, %v9947_v3 }
 0x43d   : > { %v12126_v23 = vadd.f32 %v10955_v21, %v3115_v7  ;;  %v9948_v6 = vpop.f32.mrb[86].mxu0  ;;  %9961 = vmatprep.mubr.msk.bf16.mxu1 %vm3225_vm3, %v3198_v1 }
 0x43e   : > { %v12131_v5 = vadd.f32 %v10955_v21, %v9948_v6  ;;  %v3118_v38 = vpop.f32.mrb[87].mxu0  ;;  %9962 = vmatmul.mubr.msk.bf16.vlgmr.msra.gmra.mrb[88].mxu1 %vm3225_vm3, %v3199_v4  ;;  %v13579_v34 = vmax.f32 %v12129_v62, 0.0  ;;  %v11255_v6 = vld [vmem:[%s11558_s23] sm:$0xff]  }
 0x43f   : > { %v12134_v29 = vadd.f32 %v10955_v21, %v3118_v38  ;;  %v13578_v33 = vmax.f32 %v12126_v23, 0.0 }
 0x440   : > { %v13577_v2 = vmax.f32 %v12131_v5, 0.0 }
 0x441   : > { %v13576_v37 = vmax.f32 %v12134_v29, 0.0 }
 0x442   : > { %v3201_v41 = vpack.c.bf16 %v13577_v2, %v13579_v34 }
 0x443   : > { %v3200_v10 = vpack.c.bf16 %v13576_v37, %v13578_v33  ;;  %v9951_v11 = vpop.f32.mrb[88].mxu0 }
 0x444   : > { %v12150_v42 = vadd.f32 %v10966_v44, %v9951_v11  ;;  %v3131_v24 = vpop.f32.mrb[89].mxu0 }
 0x445   : > { %v12153_v63 = vadd.f32 %v10969_v40, %v3131_v24  ;;  %v9952_v46 = vpop.f32.mrb[90].mxu0  ;;  %9965 = vmatprep.mubr.msk.bf16.mxu1 %vm3225_vm3, %v3200_v10 }
 0x446   : > { %v12157_v26 = vadd.f32 %v10972_v15, %v9952_v46  ;;  %v3134_v56 = vpop.f32.mrb[91].mxu0  ;;  %9966 = vmatmul.mubr.msk.bf16.gmra.mrb[92].mxu1 %vm3225_vm3, %v3201_v41  ;;  %v13575_v35 = vmax.f32 %v12150_v42, 0.0 }
 0x447   : > { %v12160_v19 = vadd.f32 %v10975_v49, %v3134_v56  ;;  %v13574_v52 = vmax.f32 %v12153_v63, 0.0 }
 0x448   : > { %v13573_v47 = vmax.f32 %v12157_v26, 0.0 }
 0x449   : > { %v13572_v36 = vmax.f32 %v12160_v19, 0.0 }
 0x44a   : > { %v3203_v0 = vpack.c.bf16 %v13573_v47, %v13575_v35 }
 0x44b   : > { %v3202_v16 = vpack.c.bf16 %v13572_v36, %v13574_v52  ;;  %v9955_v17 = vpop.f32.mrb[92].mxu0 }
 0x44c   : > { %v12176_v60 = vadd.f32 %v10978_v20, %v9955_v17  ;;  %v3147_v39 = vpop.f32.mrb[93].mxu0 }
 0x44d   : > { %v12179_v21 = vadd.f32 %v10981_v51, %v3147_v39  ;;  %v9956_v22 = vpop.f32.mrb[94].mxu0  ;;  %9969 = vmatprep.mubr.msk.bf16.mxu1 %vm3225_vm3, %v3202_v16 }
 0x44e   : > { %v12183_v30 = vadd.f32 %v10984_v53, %v9956_v22  ;;  %v3150_v32 = vpop.f32.mrb[95].mxu0  ;;  %9970 = vmatmul.mubr.msk.bf16.gmra.mrb[96].mxu1 %vm3225_vm3, %v3203_v0  ;;  %v13571_v4 = vmax.f32 %v12176_v60, 0.0 }
 0x44f   : > { %v12186_v8 = vadd.f32 %v10987_v13, %v3150_v32  ;;  %v13570_v1 = vmax.f32 %v12179_v21, 0.0 }
 0x450   : > { %v13569_v43 = vmax.f32 %v12183_v30, 0.0 }
 0x451   : > { %v13568_v3 = vmax.f32 %v12186_v8, 0.0 }
 0x452   : > { %v3205_v7 = vpack.c.bf16 %v13569_v43, %v13571_v4 }
 0x453   : > { %v3204_v18 = vpack.c.bf16 %v13568_v3, %v13570_v1 }
 0x455   : > { %9973 = vmatprep.mubr.msk.bf16.mxu1 %vm3225_vm3, %v3204_v18 }
 0x456   : > { %9974 = vmatmul.mubr.msk.bf16.gmra.mrb[100].mxu1 %vm3225_vm3, %v3205_v7 }
 0x457   : > { %9993 = vmatprep.mubr.bf16.mxu1 %v11255_v6 }
 0x511   : > { %v9963_v38 = vpop.f32.mrb[88].mxu1 }
 0x512   : > { %v3293_v28 = vadd.f32 %v9963_v38, %v12204_v59  ;;  %v3284_v9 = vpop.f32.mrb[89].mxu1 }
 0x513   : > { %v3285_v31 = vadd.f32 %v12204_v59, %v3284_v9  ;;  %v9964_v44 = vpop.f32.mrb[90].mxu1 }
 0x514   : > { %v3296_v10 = vadd.f32 %v9964_v44, %v12204_v59  ;;  %v3287_v11 = vpop.f32.mrb[91].mxu1  ;;  %v3349_v41 = vmax.f32 %v3293_v28, 0.0 }
 0x515   : > { %v3288_v40 = vadd.f32 %v12204_v59, %v3287_v11  ;;  %v3347_v15 = vmax.f32 %v3285_v31, 0.0 }
 0x516   : > { %v3350_v24 = vmax.f32 %v3296_v10, 0.0 }
 0x517   : > { %v3348_v46 = vmax.f32 %v3288_v40, 0.0 }
 0x518   : > { %v12210_v49 = vpack.c.bf16 %v3350_v24, %v3349_v41 }
 0x519   : > { %v12212_v48 = vpack.c.bf16 %v3348_v46, %v3347_v15  ;;  %v9967_v56 = vpop.f32.mrb[92].mxu1 }
 0x51a   : > { %v3309_v57 = vadd.f32 %v9967_v56, %v12204_v59  ;;  %v3300_v55 = vpop.f32.mrb[93].mxu1 }
 0x51b   : > { %v3301_v61 = vadd.f32 %v12204_v59, %v3300_v55  ;;  %v9968_v20 = vpop.f32.mrb[94].mxu1  ;;  %9977 = vmatprep.subr.bf16.mxu1 %v12212_v48  ;;  %10009 = vmatprep.subr.bf16.mxu0 %v12212_v48 }
 0x51c   : > { %v3312_v16 = vadd.f32 %v9968_v20, %v12204_v59  ;;  %v3303_v17 = vpop.f32.mrb[95].mxu1  ;;  %9978 = vmatpush3.bf16.msra.mxu1 %v12212_v48  ;;  %10010 = vmatpush3.bf16.msra.mxu0 %v12212_v48  ;;  %v3353_v0 = vmax.f32 %v3309_v57, 0.0 }
 0x51d   : > { %v3304_v51 = vadd.f32 %v12204_v59, %v3303_v17  ;;  %9979 = vmatprep.subr.bf16.mxu1 %v12210_v49  ;;  %10011 = vmatprep.subr.bf16.mxu0 %v12210_v49  ;;  %v3351_v53 = vmax.f32 %v3301_v61, 0.0 }
 0x51e   : > { %v3354_v39 = vmax.f32 %v3312_v16, 0.0 }
 0x51f   : > { %v3352_v22 = vmax.f32 %v3304_v51, 0.0 }
 0x520   : > { %v12224_v13 = vpack.c.bf16 %v3354_v39, %v3353_v0  ;;  %9980 = vmatpush3.bf16.msra.mxu1 %v12210_v49  ;;  %10012 = vmatpush3.bf16.msra.mxu0 %v12210_v49 }
 0x521   : > { %v12228_v32 = vpack.c.bf16 %v3352_v22, %v3351_v53  ;;  %v9971_v18 = vpop.f32.mrb[96].mxu1 }
 0x522   : > { %v3325_v7 = vadd.f32 %v9971_v18, %v12204_v59  ;;  %v3316_v6 = vpop.f32.mrb[97].mxu1 }
 0x523   : > { %v3317_v38 = vadd.f32 %v12204_v59, %v3316_v6  ;;  %v9972_v28 = vpop.f32.mrb[98].mxu1  ;;  %9981 = vmatprep.subr.bf16.mxu1 %v12228_v32  ;;  %10013 = vmatprep.subr.bf16.mxu0 %v12228_v32  ;;  %v11258_v6 = vld [vmem:[%s11558_s23 + $0x10] sm:$0xff]  }
 0x524   : > { %v3328_v9 = vadd.f32 %v9972_v28, %v12204_v59  ;;  %v3319_v31 = vpop.f32.mrb[99].mxu1  ;;  %9982 = vmatpush3.bf16.msra.mxu1 %v12228_v32  ;;  %10014 = vmatpush3.bf16.msra.mxu0 %v12228_v32  ;;  %v3357_v10 = vmax.f32 %v3325_v7, 0.0  ;;  %v11257_v7 = vld [vmem:[%s11558_s23 + $0x48] sm:$0xff]   ;;  %v11260_v28 = vld [vmem:[%s11558_s23 + $0x18] sm:$0xff]  }
 0x525   : > { %v3320_v44 = vadd.f32 %v12204_v59, %v3319_v31  ;;  %9983 = vmatprep.subr.bf16.mxu1 %v12224_v13  ;;  %10015 = vmatprep.subr.bf16.mxu0 %v12224_v13  ;;  %v3355_v40 = vmax.f32 %v3317_v38, 0.0  ;;  %v11259_v38 = vld [vmem:[%s11558_s23 + $0x50] sm:$0xff]   ;;  %v11262_v31 = vld [vmem:[%s11558_s23 + $0x20] sm:$0xff]  }
 0x526   : > { %v3358_v11 = vmax.f32 %v3328_v9, 0.0  ;;  %v11261_v9 = vld [vmem:[%s11558_s23 + $0x58] sm:$0xff]  }
 0x527   : > { %v3356_v41 = vmax.f32 %v3320_v44, 0.0  ;;  %v11263_v44 = vld [vmem:[%s11558_s23 + $0x60] sm:$0xff]  }
 0x528   : > { %v12240_v24 = vpack.c.bf16 %v3358_v11, %v3357_v10  ;;  %9984 = vmatpush3.bf16.msra.mxu1 %v12224_v13  ;;  %10016 = vmatpush3.bf16.msra.mxu0 %v12224_v13  ;;  %v11264_v10 = vld [vmem:[%s11558_s23 + $0x28] sm:$0xff]  }
 0x529   : > { %v12244_v15 = vpack.c.bf16 %v3356_v41, %v3355_v40  ;;  %v9975_v46 = vpop.f32.mrb[100].mxu1  ;;  %v11265_v11 = vld [vmem:[%s11558_s23 + $0x68] sm:$0xff]   ;;  %v11266_v40 = vld [vmem:[%s11558_s23 + $0x30] sm:$0xff]  }
 0x52a   : > { %v3341_v56 = vadd.f32 %v9975_v46, %v12204_v59  ;;  %v3332_v57 = vpop.f32.mrb[101].mxu1  ;;  %v11267_v41 = vld [vmem:[%s11558_s23 + $0x70] sm:$0xff]   ;;  %v11268_v46 = vld [vmem:[%s11558_s23 + $0x38] sm:$0xff]  }
 0x52b   : > { %v3333_v55 = vadd.f32 %v12204_v59, %v3332_v57  ;;  %v9976_v61 = vpop.f32.mrb[102].mxu1  ;;  %9985 = vmatprep.subr.bf16.mxu1 %v12244_v15  ;;  %10017 = vmatprep.subr.bf16.mxu0 %v12244_v15  ;;  %v11270_v57 = vld [vmem:[%s11558_s23 + $0x80] sm:$0xff]  }
 0x52c   : > { %v3344_v20 = vadd.f32 %v9976_v61, %v12204_v59  ;;  %v3335_v16 = vpop.f32.mrb[103].mxu1  ;;  %9986 = vmatpush3.bf16.msra.mxu1 %v12244_v15  ;;  %10018 = vmatpush3.bf16.msra.mxu0 %v12244_v15  ;;  %v3361_v51 = vmax.f32 %v3341_v56, 0.0  ;;  %v11269_v56 = vld [vmem:[%s11558_s23 + $0x78] sm:$0xff]   ;;  %v11272_v61 = vld [vmem:[%s11558_s23 + $0x88] sm:$0xff]  }
 0x52d   : > { %v3336_v17 = vadd.f32 %v12204_v59, %v3335_v16  ;;  %9987 = vmatprep.subr.bf16.mxu1 %v12240_v24  ;;  %10019 = vmatprep.subr.bf16.mxu0 %v12240_v24  ;;  %v3359_v39 = vmax.f32 %v3333_v55, 0.0  ;;  %v11256_v59 = vld [vmem:[%s11558_s23 + $0x8] sm:$0xff]   ;;  %v11271_v55 = vld [vmem:[%s11558_s23 + $0xc0] sm:$0xff]   ;;  %v11274_v16 = vld [vmem:[%s11558_s23 + $0x90] sm:$0xff]  }
 0x52e   : > { %v3362_v0 = vmax.f32 %v3344_v20, 0.0  ;;  %v11273_v20 = vld [vmem:[%s11558_s23 + $0xc8] sm:$0xff]  }
 0x52f   : > { %v3360_v53 = vmax.f32 %v3336_v17, 0.0  ;;  %v11275_v17 = vld [vmem:[%s11558_s23 + $0xd0] sm:$0xff]  }
 0x530   : > { %v12256_v22 = vpack.c.bf16 %v3362_v0, %v3361_v51  ;;  %9988 = vmatpush3.bf16.msra.mxu1 %v12240_v24  ;;  %10020 = vmatpush3.bf16.msra.mxu0 %v12240_v24  ;;  %v11276_v51 = vld [vmem:[%s11558_s23 + $0x98] sm:$0xff]  }
 0x531   : > { %v12260_v18 = vpack.c.bf16 %v3360_v53, %v3359_v39  ;;  %v11277_v0 = vld [vmem:[%s11558_s23 + $0xd8] sm:$0xff]   ;;  %v11278_v39 = vld [vmem:[%s11558_s23 + $0xa0] sm:$0xff]  }
 0x532   : > { %v11279_v53 = vld [vmem:[%s11558_s23 + $0xe0] sm:$0xff]  }
 0x533   : > { %9989 = vmatprep.subr.bf16.mxu1 %v12260_v18  ;;  %10021 = vmatprep.subr.bf16.mxu0 %v12260_v18 }
 0x534   : > { %9990 = vmatpush3.bf16.msra.mxu1 %v12260_v18  ;;  %10022 = vmatpush3.bf16.msra.mxu0 %v12260_v18 }
 0x535   : > { %9991 = vmatprep.subr.bf16.mxu1 %v12256_v22  ;;  %10023 = vmatprep.subr.bf16.mxu0 %v12256_v22 }
 0x538   : > { %9992 = vmatpush3.bf16.msra.mxu1 %v12256_v22  ;;  %10024 = vmatpush3.bf16.msra.mxu0 %v12256_v22 }
 0x539   : > { %10041 = vmatprep.subr.bf16.mxu1 %v12212_v48  ;;  %10073 = vmatprep.subr.bf16.mxu0 %v12212_v48 }
 0x53b   : > { %9994 = vmatmul.mubr.bf16.vlgmr.msra.gmra.mrb[104].mxu1 %v11256_v59  ;;  %10026 = vmatmul.mubr.bf16.vlgmr.msra.gmra.mrb[96].mxu0 %v11257_v7  ;;  %v11280_v59 = vld [vmem:[%s11558_s23 + $0xa8] sm:$0xff]  }
 0x53c   : > { %10042 = vmatpush3.bf16.msra.mxu1 %v12212_v48  ;;  %10074 = vmatpush3.bf16.msra.mxu0 %v12212_v48  ;;  %v11281_v7 = vld [vmem:[%s11558_s23 + $0xe8] sm:$0xff]  }
 0x53d   : > { %10043 = vmatprep.subr.bf16.mxu1 %v12210_v49  ;;  %10075 = vmatprep.subr.bf16.mxu0 %v12210_v49 }
 0x53e   : > { %9997 = vmatprep.mubr.bf16.mxu1 %v11258_v6  ;;  %10029 = vmatprep.mubr.bf16.mxu0 %v11259_v38  ;;  %v11282_v6 = vld [vmem:[%s11558_s23 + $0xb0] sm:$0xff]  }
 0x53f   : > { %v11283_v38 = vld [vmem:[%s11558_s23 + $0xf0] sm:$0xff]  }
 0x540   : > { %10044 = vmatpush3.bf16.msra.mxu1 %v12210_v49  ;;  %10076 = vmatpush3.bf16.msra.mxu0 %v12210_v49 }
 0x541   : > { %10045 = vmatprep.subr.bf16.mxu1 %v12228_v32  ;;  %10077 = vmatprep.subr.bf16.mxu0 %v12228_v32 }
 0x543   : > { %9998 = vmatmul.mubr.bf16.gmra.mrb[108].mxu1 %v11260_v28  ;;  %10030 = vmatmul.mubr.bf16.gmra.mrb[100].mxu0 %v11261_v9  ;;  %v11284_v28 = vld [vmem:[%s11558_s23 + $0xb8] sm:$0xff]  }
 0x544   : > { %10046 = vmatpush3.bf16.msra.mxu1 %v12228_v32  ;;  %10078 = vmatpush3.bf16.msra.mxu0 %v12228_v32  ;;  %v11285_v9 = vld [vmem:[%s11558_s23 + $0xf8] sm:$0xff]  }
 0x545   : > { %10047 = vmatprep.subr.bf16.mxu1 %v12224_v13  ;;  %10079 = vmatprep.subr.bf16.mxu0 %v12224_v13 }
 0x546   : > { %10001 = vmatprep.mubr.bf16.mxu1 %v11262_v31  ;;  %10033 = vmatprep.mubr.bf16.mxu0 %v11263_v44  ;;  %v11286_v31 = vld [vmem:[%s11558_s23 + $0x100] sm:$0xff]  }
 0x547   : > { %v11287_v44 = vld [vmem:[%s11558_s23 + $0x140] sm:$0xff]  }
 0x548   : > { %10048 = vmatpush3.bf16.msra.mxu1 %v12224_v13  ;;  %10080 = vmatpush3.bf16.msra.mxu0 %v12224_v13 }
 0x549   : > { %10049 = vmatprep.subr.bf16.mxu1 %v12244_v15  ;;  %10081 = vmatprep.subr.bf16.mxu0 %v12244_v15 }
 0x54b   : > { %10002 = vmatmul.mubr.bf16.gmra.mrb[112].mxu1 %v11264_v10  ;;  %10034 = vmatmul.mubr.bf16.gmra.mrb[104].mxu0 %v11265_v11  ;;  %v11288_v10 = vld [vmem:[%s11558_s23 + $0x108] sm:$0xff]  }
 0x54c   : > { %10050 = vmatpush3.bf16.msra.mxu1 %v12244_v15  ;;  %10082 = vmatpush3.bf16.msra.mxu0 %v12244_v15  ;;  %v11289_v11 = vld [vmem:[%s11558_s23 + $0x148] sm:$0xff]  }
 0x54d   : > { %10051 = vmatprep.subr.bf16.mxu1 %v12240_v24  ;;  %10083 = vmatprep.subr.bf16.mxu0 %v12240_v24 }
 0x54e   : > { %10005 = vmatprep.mubr.bf16.mxu1 %v11266_v40  ;;  %10037 = vmatprep.mubr.bf16.mxu0 %v11267_v41  ;;  %v11290_v40 = vld [vmem:[%s11558_s23 + $0x110] sm:$0xff]  }
 0x54f   : > { %v11291_v41 = vld [vmem:[%s11558_s23 + $0x150] sm:$0xff]  }
 0x550   : > { %10052 = vmatpush3.bf16.msra.mxu1 %v12240_v24  ;;  %10084 = vmatpush3.bf16.msra.mxu0 %v12240_v24 }
 0x551   : > { %10053 = vmatprep.subr.bf16.mxu1 %v12260_v18  ;;  %10085 = vmatprep.subr.bf16.mxu0 %v12260_v18 }
 0x553   : > { %10006 = vmatmul.mubr.bf16.gmra.mrb[116].mxu1 %v11268_v46  ;;  %10038 = vmatmul.mubr.bf16.gmra.mrb[108].mxu0 %v11269_v56  ;;  %v11292_v46 = vld [vmem:[%s11558_s23 + $0x118] sm:$0xff]   ;;  %v11294_v56 = vld [vmem:[%s11558_s23 + $0x120] sm:$0xff]  }
 0x554   : > { %10054 = vmatpush3.bf16.msra.mxu1 %v12260_v18  ;;  %10086 = vmatpush3.bf16.msra.mxu0 %v12260_v18 }
 0x555   : > { %10055 = vmatprep.subr.bf16.mxu1 %v12256_v22  ;;  %10087 = vmatprep.subr.bf16.mxu0 %v12256_v22 }
 0x556   : > { %10057 = vmatprep.mubr.bf16.mxu1 %v11270_v57  ;;  %10089 = vmatprep.mubr.bf16.mxu0 %v11271_v55  ;;  %v11296_v57 = vld [vmem:[%s11558_s23 + $0x128] sm:$0xff]   ;;  %v11298_v55 = vld [vmem:[%s11558_s23 + $0x130] sm:$0xff]  }
 0x558   : > { %10056 = vmatpush3.bf16.msra.mxu1 %v12256_v22  ;;  %10088 = vmatpush3.bf16.msra.mxu0 %v12256_v22 }
 0x559   : > { %10105 = vmatprep.subr.bf16.mxu1 %v12212_v48  ;;  %10137 = vmatprep.subr.bf16.mxu0 %v12212_v48 }
 0x55b   : > { %10058 = vmatmul.mubr.bf16.vlgmr.msra.gmra.mrb[120].mxu1 %v11272_v61  ;;  %10090 = vmatmul.mubr.bf16.vlgmr.msra.gmra.mrb[112].mxu0 %v11273_v20  ;;  %v11301_v61 = vld [vmem:[%s11558_s23 + $0x178] sm:$0xff]   ;;  %v11303_v20 = vld [vmem:[%s11558_s23 + $0x1c0] sm:$0xff]  }
 0x55c   : > { %10106 = vmatpush3.bf16.msra.mxu1 %v12212_v48  ;;  %10138 = vmatpush3.bf16.msra.mxu0 %v12212_v48 }
 0x55d   : > { %10107 = vmatprep.subr.bf16.mxu1 %v12210_v49  ;;  %10139 = vmatprep.subr.bf16.mxu0 %v12210_v49 }
 0x55e   : > { %10061 = vmatprep.mubr.bf16.mxu1 %v11274_v16  ;;  %10093 = vmatprep.mubr.bf16.mxu0 %v11275_v17  ;;  %v11304_v16 = vld [vmem:[%s11558_s23 + $0x188] sm:$0xff]   ;;  %v11306_v17 = vld [vmem:[%s11558_s23 + $0x190] sm:$0xff]  }
 0x560   : > { %10108 = vmatpush3.bf16.msra.mxu1 %v12210_v49  ;;  %10140 = vmatpush3.bf16.msra.mxu0 %v12210_v49 }
 0x561   : > { %10109 = vmatprep.subr.bf16.mxu1 %v12228_v32  ;;  %10141 = vmatprep.subr.bf16.mxu0 %v12228_v32 }
 0x563   : > { %10062 = vmatmul.mubr.bf16.gmra.mrb[124].mxu1 %v11276_v51  ;;  %10094 = vmatmul.mubr.bf16.gmra.mrb[116].mxu0 %v11277_v0  ;;  %v11307_v51 = vld [vmem:[%s11558_s23 + $0x1d0] sm:$0xff]   ;;  %v11308_v0 = vld [vmem:[%s11558_s23 + $0x198] sm:$0xff]  }
 0x564   : > { %10110 = vmatpush3.bf16.msra.mxu1 %v12228_v32  ;;  %10142 = vmatpush3.bf16.msra.mxu0 %v12228_v32 }
 0x565   : > { %10111 = vmatprep.subr.bf16.mxu1 %v12224_v13  ;;  %10143 = vmatprep.subr.bf16.mxu0 %v12224_v13 }
 0x566   : > { %10065 = vmatprep.mubr.bf16.mxu1 %v11278_v39  ;;  %10097 = vmatprep.mubr.bf16.mxu0 %v11279_v53  ;;  %v11309_v39 = vld [vmem:[%s11558_s23 + $0x1d8] sm:$0xff]   ;;  %v11310_v53 = vld [vmem:[%s11558_s23 + $0x1a0] sm:$0xff]  }
 0x568   : > { %10112 = vmatpush3.bf16.msra.mxu1 %v12224_v13  ;;  %10144 = vmatpush3.bf16.msra.mxu0 %v12224_v13 }
 0x569   : > { %10113 = vmatprep.subr.bf16.mxu1 %v12244_v15  ;;  %10145 = vmatprep.subr.bf16.mxu0 %v12244_v15 }
 0x56b   : > { %10066 = vmatmul.mubr.bf16.gmra.mrb[128].mxu1 %v11280_v59  ;;  %10098 = vmatmul.mubr.bf16.gmra.mrb[120].mxu0 %v11281_v7  ;;  %v11312_v59 = vld [vmem:[%s11558_s23 + $0x1a8] sm:$0xff]  }
 0x56c   : > { %10114 = vmatpush3.bf16.msra.mxu1 %v12244_v15  ;;  %10146 = vmatpush3.bf16.msra.mxu0 %v12244_v15  ;;  %v11313_v7 = vld [vmem:[%s11558_s23 + $0x1e8] sm:$0xff]  }
 0x56d   : > { %10115 = vmatprep.subr.bf16.mxu1 %v12240_v24  ;;  %10147 = vmatprep.subr.bf16.mxu0 %v12240_v24 }
 0x56e   : > { %10069 = vmatprep.mubr.bf16.mxu1 %v11282_v6  ;;  %10101 = vmatprep.mubr.bf16.mxu0 %v11283_v38  ;;  %v11314_v6 = vld [vmem:[%s11558_s23 + $0x1b0] sm:$0xff]  }
 0x56f   : > { %v11315_v38 = vld [vmem:[%s11558_s23 + $0x1f0] sm:$0xff]  }
 0x570   : > { %10116 = vmatpush3.bf16.msra.mxu1 %v12240_v24  ;;  %10148 = vmatpush3.bf16.msra.mxu0 %v12240_v24 }
 0x571   : > { %10117 = vmatprep.subr.bf16.mxu1 %v12260_v18  ;;  %10149 = vmatprep.subr.bf16.mxu0 %v12260_v18 }
 0x573   : > { %10070 = vmatmul.mubr.bf16.gmra.mrb[132].mxu1 %v11284_v28  ;;  %10102 = vmatmul.mubr.bf16.gmra.mrb[124].mxu0 %v11285_v9  ;;  %v11316_v28 = vld [vmem:[%s11558_s23 + $0x1b8] sm:$0xff]  }
 0x574   : > { %10118 = vmatpush3.bf16.msra.mxu1 %v12260_v18  ;;  %10150 = vmatpush3.bf16.msra.mxu0 %v12260_v18  ;;  %v11317_v9 = vld [vmem:[%s11558_s23 + $0x1f8] sm:$0xff]  }
 0x575   : > { %10119 = vmatprep.subr.bf16.mxu1 %v12256_v22  ;;  %10151 = vmatprep.subr.bf16.mxu0 %v12256_v22 }
 0x576   : > { %10121 = vmatprep.mubr.bf16.mxu1 %v11286_v31  ;;  %10153 = vmatprep.mubr.bf16.mxu0 %v11287_v44  ;;  %v11157_v31 = vld [vmem:[%s13602_s10] sm:$0xff]   ;;  %s13636_s10 = sld [smem:[#allocation15_spill]] }
 0x578   : > { %10120 = vmatpush3.bf16.msra.mxu1 %v12256_v22  ;;  %10152 = vmatpush3.bf16.msra.mxu0 %v12256_v22 }
 0x579   : > { %10169 = vmatprep.subr.bf16.mxu1 %v12212_v48  ;;  %10201 = vmatprep.subr.bf16.mxu0 %v12212_v48 }
 0x57b   : > { %10122 = vmatmul.mubr.bf16.vlgmr.msra.gmra.mrb[136].mxu1 %v11288_v10  ;;  %10154 = vmatmul.mubr.bf16.vlgmr.msra.gmra.mrb[128].mxu0 %v11289_v11 }
 0x57c   : > { %10170 = vmatpush3.bf16.msra.mxu1 %v12212_v48  ;;  %10202 = vmatpush3.bf16.msra.mxu0 %v12212_v48  ;;  %v11293_v48 = vld [vmem:[%s11558_s23 + $0x158] sm:$0xff]  }
 0x57d   : > { %10171 = vmatprep.subr.bf16.mxu1 %v12210_v49  ;;  %10203 = vmatprep.subr.bf16.mxu0 %v12210_v49 }
 0x57e   : > { %10125 = vmatprep.mubr.bf16.mxu1 %v11290_v40  ;;  %10157 = vmatprep.mubr.bf16.mxu0 %v11291_v41 }
 0x580   : > { %10172 = vmatpush3.bf16.msra.mxu1 %v12210_v49  ;;  %10204 = vmatpush3.bf16.msra.mxu0 %v12210_v49  ;;  %v11295_v49 = vld [vmem:[%s11558_s23 + $0x160] sm:$0xff]  }
 0x581   : > { %10173 = vmatprep.subr.bf16.mxu1 %v12228_v32  ;;  %10205 = vmatprep.subr.bf16.mxu0 %v12228_v32 }
 0x583   : > { %10126 = vmatmul.mubr.bf16.gmra.mrb[140].mxu1 %v11292_v46  ;;  %10158 = vmatmul.mubr.bf16.gmra.mrb[132].mxu0 %v11293_v48 }
 0x584   : > { %10174 = vmatpush3.bf16.msra.mxu1 %v12228_v32  ;;  %10206 = vmatpush3.bf16.msra.mxu0 %v12228_v32  ;;  %v11297_v32 = vld [vmem:[%s11558_s23 + $0x168] sm:$0xff]  }
 0x585   : > { %10175 = vmatprep.subr.bf16.mxu1 %v12224_v13  ;;  %10207 = vmatprep.subr.bf16.mxu0 %v12224_v13 }
 0x586   : > { %10129 = vmatprep.mubr.bf16.mxu1 %v11294_v56  ;;  %10161 = vmatprep.mubr.bf16.mxu0 %v11295_v49 }
 0x588   : > { %10176 = vmatpush3.bf16.msra.mxu1 %v12224_v13  ;;  %10208 = vmatpush3.bf16.msra.mxu0 %v12224_v13  ;;  %v11299_v13 = vld [vmem:[%s11558_s23 + $0x170] sm:$0xff]  }
 0x589   : > { %10177 = vmatprep.subr.bf16.mxu1 %v12244_v15  ;;  %10209 = vmatprep.subr.bf16.mxu0 %v12244_v15 }
 0x58b   : > { %10130 = vmatmul.mubr.bf16.gmra.mrb[144].mxu1 %v11296_v57  ;;  %10162 = vmatmul.mubr.bf16.gmra.mrb[136].mxu0 %v11297_v32 }
 0x58c   : > { %10178 = vmatpush3.bf16.msra.mxu1 %v12244_v15  ;;  %10210 = vmatpush3.bf16.msra.mxu0 %v12244_v15  ;;  %v11300_v15 = vld [vmem:[%s11558_s23 + $0x138] sm:$0xff]  }
 0x58d   : > { %10179 = vmatprep.subr.bf16.mxu1 %v12240_v24  ;;  %10211 = vmatprep.subr.bf16.mxu0 %v12240_v24 }
 0x58e   : > { %10133 = vmatprep.mubr.bf16.mxu1 %v11298_v55  ;;  %10165 = vmatprep.mubr.bf16.mxu0 %v11299_v13  ;;  %v11158_v55 = vld [vmem:[%s13603_s11] sm:$0xff]   ;;  %v11159_v13 = vld [vmem:[%s13603_s11 + $0x8] sm:$0xff]  }
 0x590   : > { %10180 = vmatpush3.bf16.msra.mxu1 %v12240_v24  ;;  %10212 = vmatpush3.bf16.msra.mxu0 %v12240_v24  ;;  %v11302_v24 = vld [vmem:[%s11558_s23 + $0x180] sm:$0xff]  }
 0x591   : > { %10181 = vmatprep.subr.bf16.mxu1 %v12260_v18  ;;  %10213 = vmatprep.subr.bf16.mxu0 %v12260_v18 }
 0x593   : > { %10134 = vmatmul.mubr.bf16.gmra.mrb[148].mxu1 %v11300_v15  ;;  %10166 = vmatmul.mubr.bf16.gmra.mrb[140].mxu0 %v11301_v61 }
 0x594   : > { %10182 = vmatpush3.bf16.msra.mxu1 %v12260_v18  ;;  %10214 = vmatpush3.bf16.msra.mxu0 %v12260_v18  ;;  %v11305_v18 = vld [vmem:[%s11558_s23 + $0x1c8] sm:$0xff]  }
 0x595   : > { %10183 = vmatprep.subr.bf16.mxu1 %v12256_v22  ;;  %10215 = vmatprep.subr.bf16.mxu0 %v12256_v22 }
 0x596   : > { %10185 = vmatprep.mubr.bf16.mxu1 %v11302_v24  ;;  %10217 = vmatprep.mubr.bf16.mxu0 %v11303_v20 }
 0x598   : > { %10184 = vmatpush3.bf16.msra.mxu1 %v12256_v22  ;;  %10216 = vmatpush3.bf16.msra.mxu0 %v12256_v22  ;;  %v11311_v22 = vld [vmem:[%s11558_s23 + $0x1e0] sm:$0xff]   ;;  %s13632_s23 = sld [smem:[#allocation12_spill]] }
 0x599   : > { %10233 = vmatprep.subr.bf16.mxu1 %v11157_v31  ;;  %10251 = vmatprep.subr.bf16.mxu0 %v11158_v55 }
 0x59b   : > { %10186 = vmatmul.mubr.bf16.vlgmr.msra.gmra.mrb[152].mxu1 %v11304_v16  ;;  %10218 = vmatmul.mubr.bf16.vlgmr.msra.gmra.mrb[144].mxu0 %v11305_v18 }
 0x59c   : > { %10189 = vmatprep.mubr.bf16.mxu1 %v11306_v17  ;;  %10221 = vmatprep.mubr.bf16.mxu0 %v11307_v51 }
 0x59d   : > { %10234 = vmatpush3.bf16.msra.mxu1 %v11157_v31  ;;  %10252 = vmatpush3.bf16.msra.mxu0 %v11158_v55 }
 0x59e   : > { %10253 = vmatprep.subr.bf16.mxu0 %v11159_v13 }
 0x5a1   : > { %10254 = vmatpush3.bf16.msra.mxu0 %v11159_v13 }
 0x5a3   : > { %10190 = vmatmul.mubr.bf16.gmra.mrb[156].mxu1 %v11308_v0  ;;  %10222 = vmatmul.mubr.bf16.gmra.mrb[148].mxu0 %v11309_v39 }
 0x5a4   : > { %10193 = vmatprep.mubr.bf16.mxu1 %v11310_v53  ;;  %10225 = vmatprep.mubr.bf16.mxu0 %v11311_v22 }
 0x5ab   : > { %10194 = vmatmul.mubr.bf16.gmra.mrb[160].mxu1 %v11312_v59  ;;  %10226 = vmatmul.mubr.bf16.gmra.mrb[152].mxu0 %v11313_v7 }
 0x5ac   : > { %10197 = vmatprep.mubr.bf16.mxu1 %v11314_v6  ;;  %10229 = vmatprep.mubr.bf16.mxu0 %v11315_v38 }
 0x5b3   : > { %10198 = vmatmul.mubr.bf16.gmra.mrb[164].mxu1 %v11316_v28  ;;  %10230 = vmatmul.mubr.bf16.gmra.mrb[156].mxu0 %v11317_v9 }
 0x60e   : > { %v9995_v44 = vpop.f32.mrb[104].mxu1  ;;  %v10027_v10 = vpop.f32.mrb[96].mxu0 }
 0x60f   : > { %v3567_v11 = vmax.f32 %v9995_v44, %v10027_v10  ;;  %v3405_v40 = vpop.f32.mrb[105].mxu1  ;;  %v3502_v41 = vpop.f32.mrb[97].mxu0 }
 0x610   : > { %v3565_v46 = vmax.f32 %v3405_v40, %v3502_v41  ;;  %v9996_v48 = vpop.f32.mrb[106].mxu1  ;;  %v10028_v56 = vpop.f32.mrb[98].mxu0 }
 0x611   : > { %v3568_v49 = vmax.f32 %v9996_v48, %v10028_v56  ;;  %v3408_v57 = vpop.f32.mrb[107].mxu1  ;;  %v3505_v32 = vpop.f32.mrb[99].mxu0 }
 0x612   : > { %v3566_v15 = vmax.f32 %v3408_v57, %v3505_v32 }
 0x616   : > { %v9999_v61 = vpop.f32.mrb[108].mxu1  ;;  %v10031_v24 = vpop.f32.mrb[100].mxu0 }
 0x617   : > { %v3571_v20 = vmax.f32 %v9999_v61, %v10031_v24  ;;  %v3421_v16 = vpop.f32.mrb[109].mxu1  ;;  %v3518_v18 = vpop.f32.mrb[101].mxu0 }
 0x618   : > { %v3569_v17 = vmax.f32 %v3421_v16, %v3518_v18  ;;  %v10000_v51 = vpop.f32.mrb[110].mxu1  ;;  %v10032_v0 = vpop.f32.mrb[102].mxu0 }
 0x619   : > { %v3572_v39 = vmax.f32 %v10000_v51, %v10032_v0  ;;  %v3424_v53 = vpop.f32.mrb[111].mxu1  ;;  %v3521_v22 = vpop.f32.mrb[103].mxu0 }
 0x61a   : > { %v3570_v59 = vmax.f32 %v3424_v53, %v3521_v22 }
 0x61e   : > { %v10003_v7 = vpop.f32.mrb[112].mxu1  ;;  %v10035_v6 = vpop.f32.mrb[104].mxu0 }
 0x61f   : > { %v3575_v38 = vmax.f32 %v10003_v7, %v10035_v6  ;;  %v3437_v28 = vpop.f32.mrb[113].mxu1  ;;  %v3534_v9 = vpop.f32.mrb[105].mxu0 }
 0x620   : > { %v3573_v31 = vmax.f32 %v3437_v28, %v3534_v9  ;;  %v10004_v44 = vpop.f32.mrb[114].mxu1  ;;  %v10036_v10 = vpop.f32.mrb[106].mxu0 }
 0x621   : > { %v3576_v40 = vmax.f32 %v10004_v44, %v10036_v10  ;;  %v3440_v41 = vpop.f32.mrb[115].mxu1  ;;  %v3537_v48 = vpop.f32.mrb[107].mxu0 }
 0x622   : > { %v3574_v56 = vmax.f32 %v3440_v41, %v3537_v48 }
 0x626   : > { %v12431_v57 = vpop.f32.mrb[116].mxu1  ;;  %v10039_v32 = vpop.f32.mrb[108].mxu0 }
 0x627   : > { %v3579_v55 = vmax.f32 %v12431_v57, %v10039_v32  ;;  %v12434_v13 = vpop.f32.mrb[117].mxu1  ;;  %v3550_v61 = vpop.f32.mrb[109].mxu0 }
 0x628   : > { %v3577_v24 = vmax.f32 %v12434_v13, %v3550_v61  ;;  %v12437_v16 = vpop.f32.mrb[118].mxu1  ;;  %v12439_v18 = vpop.f32.mrb[110].mxu0 }
 0x629   : > { %v3580_v51 = vmax.f32 %v12437_v16, %v12439_v18  ;;  %v12443_v0 = vpop.f32.mrb[119].mxu1  ;;  %v12445_v53 = vpop.f32.mrb[111].mxu0 }
 0x62a   : > { %v3578_v22 = vmax.f32 %v12443_v0, %v12445_v53 }
 0x62e   : > { %v10059_v7 = vpop.f32.mrb[120].mxu1  ;;  %v12449_v6 = vpop.f32.mrb[112].mxu0 }
 0x62f   : > { %v12451_v28 = vmax.f32 %v3567_v11, %v10059_v7  ;;  %v3615_v9 = vpop.f32.mrb[121].mxu1  ;;  %v12453_v44 = vpop.f32.mrb[113].mxu0 }
 0x630   : > { %v12455_v10 = vmax.f32 %v3565_v46, %v3615_v9  ;;  %v10060_v41 = vpop.f32.mrb[122].mxu1  ;;  %v12457_v48 = vpop.f32.mrb[114].mxu0 }
 0x631   : > { %v3793_v57 = vmax.f32 %v12451_v28, %v12449_v6  ;;  %v12461_v32 = vmax.f32 %v3568_v49, %v10060_v41  ;;  %v3618_v13 = vpop.f32.mrb[123].mxu1  ;;  %v12463_v61 = vpop.f32.mrb[115].mxu0 }
 0x632   : > { %v3791_v11 = vmax.f32 %v12455_v10, %v12453_v44  ;;  %v12467_v16 = vmax.f32 %v3566_v15, %v3618_v13 }
 0x633   : > { %v3794_v46 = vmax.f32 %v12461_v32, %v12457_v48 }
 0x634   : > { %v3792_v18 = vmax.f32 %v12467_v16, %v12463_v61 }
 0x636   : > { %v10063_v0 = vpop.f32.mrb[124].mxu1  ;;  %v12473_v53 = vpop.f32.mrb[116].mxu0 }
 0x637   : > { %v12475_v7 = vmax.f32 %v3571_v20, %v10063_v0  ;;  %v3631_v49 = vpop.f32.mrb[125].mxu1  ;;  %v12477_v6 = vpop.f32.mrb[117].mxu0 }
 0x638   : > { %v12479_v28 = vmax.f32 %v3569_v17, %v3631_v49  ;;  %v10064_v9 = vpop.f32.mrb[126].mxu1  ;;  %v12481_v44 = vpop.f32.mrb[118].mxu0 }
 0x639   : > { %v3797_v15 = vmax.f32 %v12475_v7, %v12473_v53  ;;  %v12485_v10 = vmax.f32 %v3572_v39, %v10064_v9  ;;  %v3634_v41 = vpop.f32.mrb[127].mxu1  ;;  %v12487_v48 = vpop.f32.mrb[119].mxu0 }
 0x63a   : > { %v3795_v20 = vmax.f32 %v12479_v28, %v12477_v6  ;;  %v12491_v32 = vmax.f32 %v3570_v59, %v3634_v41 }
 0x63b   : > { %v3798_v17 = vmax.f32 %v12485_v10, %v12481_v44 }
 0x63c   : > { %v3796_v13 = vmax.f32 %v12491_v32, %v12487_v48 }
 0x63e   : > { %v10067_v61 = vpop.f32.mrb[128].mxu1  ;;  %v12497_v16 = vpop.f32.mrb[120].mxu0 }
 0x63f   : > { %v12499_v0 = vmax.f32 %v3575_v38, %v10067_v61  ;;  %v3647_v39 = vpop.f32.mrb[129].mxu1  ;;  %v12501_v53 = vpop.f32.mrb[121].mxu0 }
 0x640   : > { %v12503_v7 = vmax.f32 %v3573_v31, %v3647_v39  ;;  %v10068_v49 = vpop.f32.mrb[130].mxu1  ;;  %v12505_v6 = vpop.f32.mrb[122].mxu0 }
 0x641   : > { %v3801_v59 = vmax.f32 %v12499_v0, %v12497_v16  ;;  %v12509_v28 = vmax.f32 %v3576_v40, %v10068_v49  ;;  %v3650_v9 = vpop.f32.mrb[131].mxu1  ;;  %v12511_v44 = vpop.f32.mrb[123].mxu0 }
 0x642   : > { %v3799_v38 = vmax.f32 %v12503_v7, %v12501_v53  ;;  %v12515_v10 = vmax.f32 %v3574_v56, %v3650_v9 }
 0x643   : > { %v3802_v31 = vmax.f32 %v12509_v28, %v12505_v6 }
 0x644   : > { %v3800_v41 = vmax.f32 %v12515_v10, %v12511_v44 }
 0x646   : > { %v10071_v48 = vpop.f32.mrb[132].mxu1  ;;  %v12521_v32 = vpop.f32.mrb[124].mxu0 }
 0x647   : > { %v12523_v61 = vmax.f32 %v3579_v55, %v10071_v48  ;;  %v3663_v40 = vpop.f32.mrb[133].mxu1  ;;  %v12525_v16 = vpop.f32.mrb[125].mxu0 }
 0x648   : > { %v12527_v0 = vmax.f32 %v3577_v24, %v3663_v40  ;;  %v10072_v39 = vpop.f32.mrb[134].mxu1  ;;  %v12529_v53 = vpop.f32.mrb[126].mxu0 }
 0x649   : > { %v3805_v56 = vmax.f32 %v12523_v61, %v12521_v32  ;;  %v12533_v7 = vmax.f32 %v3580_v51, %v10072_v39  ;;  %v3666_v49 = vpop.f32.mrb[135].mxu1  ;;  %v12535_v6 = vpop.f32.mrb[127].mxu0 }
 0x64a   : > { %v3803_v55 = vmax.f32 %v12527_v0, %v12525_v16  ;;  %v12539_v28 = vmax.f32 %v3578_v22, %v3666_v49 }
 0x64b   : > { %v3806_v24 = vmax.f32 %v12533_v7, %v12529_v53 }
 0x64c   : > { %v3804_v9 = vmax.f32 %v12539_v28, %v12535_v6 }
 0x64e   : > { %v10123_v44 = vpop.f32.mrb[136].mxu1  ;;  %v12545_v10 = vpop.f32.mrb[128].mxu0 }
 0x64f   : > { %v12547_v48 = vmax.f32 %v3793_v57, %v10123_v44  ;;  %v3841_v51 = vpop.f32.mrb[137].mxu1  ;;  %v12549_v32 = vpop.f32.mrb[129].mxu0 }
 0x650   : > { %v12551_v61 = vmax.f32 %v3791_v11, %v3841_v51  ;;  %v10124_v40 = vpop.f32.mrb[138].mxu1  ;;  %v12553_v16 = vpop.f32.mrb[130].mxu0 }
 0x651   : > { %v4019_v22 = vmax.f32 %v12547_v48, %v12545_v10  ;;  %v12557_v0 = vmax.f32 %v3794_v46, %v10124_v40  ;;  %v3844_v39 = vpop.f32.mrb[139].mxu1  ;;  %v12559_v53 = vpop.f32.mrb[131].mxu0 }
 0x652   : > { %v4017_v57 = vmax.f32 %v12551_v61, %v12549_v32  ;;  %v12563_v7 = vmax.f32 %v3792_v18, %v3844_v39 }
 0x653   : > { %v4020_v11 = vmax.f32 %v12557_v0, %v12553_v16 }
 0x654   : > { %v4018_v49 = vmax.f32 %v12563_v7, %v12559_v53 }
 0x656   : > { %v10127_v6 = vpop.f32.mrb[140].mxu1  ;;  %v12569_v28 = vpop.f32.mrb[132].mxu0 }
 0x657   : > { %v12571_v44 = vmax.f32 %v3797_v15, %v10127_v6  ;;  %v3857_v46 = vpop.f32.mrb[141].mxu1  ;;  %v12573_v10 = vpop.f32.mrb[133].mxu0 }
 0x658   : > { %v12575_v48 = vmax.f32 %v3795_v20, %v3857_v46  ;;  %v10128_v51 = vpop.f32.mrb[142].mxu1  ;;  %v12577_v32 = vpop.f32.mrb[134].mxu0 }
 0x659   : > { %v4023_v18 = vmax.f32 %v12571_v44, %v12569_v28  ;;  %v12581_v61 = vmax.f32 %v3798_v17, %v10128_v51  ;;  %v3860_v40 = vpop.f32.mrb[143].mxu1  ;;  %v12583_v16 = vpop.f32.mrb[135].mxu0 }
 0x65a   : > { %v4021_v15 = vmax.f32 %v12575_v48, %v12573_v10  ;;  %v12587_v0 = vmax.f32 %v3796_v13, %v3860_v40 }
 0x65b   : > { %v4024_v20 = vmax.f32 %v12581_v61, %v12577_v32 }
 0x65e   : > { %v10131_v53 = vpop.f32.mrb[144].mxu1  ;;  %v12593_v7 = vpop.f32.mrb[136].mxu0 }
 0x65f   : > { %v12595_v6 = vmax.f32 %v3801_v59, %v10131_v53  ;;  %v3873_v17 = vpop.f32.mrb[145].mxu1  ;;  %v12597_v28 = vpop.f32.mrb[137].mxu0 }
 0x660   : > { %v12599_v44 = vmax.f32 %v3799_v38, %v3873_v17  ;;  %v10132_v46 = vpop.f32.mrb[146].mxu1  ;;  %v12601_v10 = vpop.f32.mrb[138].mxu0 }
 0x661   : > { %v12605_v48 = vmax.f32 %v3802_v31, %v10132_v46  ;;  %v3876_v51 = vpop.f32.mrb[147].mxu1  ;;  %v12607_v32 = vpop.f32.mrb[139].mxu0 }
 0x662   : > { %v12611_v61 = vmax.f32 %v3800_v41, %v3876_v51 }
 0x666   : > { %v10135_v53 = vpop.f32.mrb[148].mxu1  ;;  %v12617_v17 = vpop.f32.mrb[140].mxu0 }
 0x667   : > { %v12619_v3 = vmax.f32 %v3805_v56, %v10135_v53  ;;  %v3889_v31 = vpop.f32.mrb[149].mxu1  ;;  %v12621_v46 = vpop.f32.mrb[141].mxu0 }
 0x668   : > { %v12623_v43 = vmax.f32 %v3803_v55, %v3889_v31  ;;  %v10136_v1 = vpop.f32.mrb[150].mxu1  ;;  %v12625_v4 = vpop.f32.mrb[142].mxu0 }
 0x669   : > { %v12629_v51 = vmax.f32 %v3806_v24, %v10136_v1  ;;  %v3892_v36 = vpop.f32.mrb[151].mxu1  ;;  %v12631_v47 = vpop.f32.mrb[143].mxu0 }
 0x66a   : > { %v12635_v53 = vmax.f32 %v3804_v9, %v3892_v36 }
 0x66e   : > { %v10187_v52 = vpop.f32.mrb[152].mxu1  ;;  %v10219_v35 = vpop.f32.mrb[144].mxu0 }
 0x66f   : > { %v4132_v37 = vmax.f32 %v4019_v22, %v10187_v52  ;;  %v4067_v2 = vpop.f32.mrb[153].mxu1  ;;  %v4180_v1 = vpop.f32.mrb[145].mxu0 }
 0x670   : > { %v4130_v24 = vmax.f32 %v4017_v57, %v4067_v2  ;;  %v10188_v33 = vpop.f32.mrb[154].mxu1  ;;  %v10220_v34 = vpop.f32.mrb[146].mxu0 }
 0x671   : > { %v4245_v54 = vmax.f32 %v4132_v37, %v10219_v35  ;;  %v4133_v58 = vmax.f32 %v4020_v11, %v10188_v33  ;;  %v4070_v25 = vpop.f32.mrb[155].mxu1  ;;  %v4183_v45 = vpop.f32.mrb[147].mxu0 }
 0x672   : > { %v4243_v36 = vmax.f32 %v4130_v24, %v4180_v1  ;;  %v4131_v9 = vmax.f32 %v4018_v49, %v4070_v25 }
 0x673   : > { %v4246_v56 = vmax.f32 %v4133_v58, %v10220_v34 }
 0x674   : > { %v4244_v41 = vmax.f32 %v4131_v9, %v4183_v45  ;;  %v13604_v45 = vmax.f32 %v12587_v0, %v12583_v16  ;;  %v13607_v0 = vmax.f32 %v12605_v48, %v12601_v10 }
 0x675   : > { %v4262_v55 = vpack.c.bf16 %v4246_v56, %v4245_v54 }
 0x676   : > { %v4261_v40 = vpack.c.bf16 %v4244_v41, %v4243_v36  ;;  %v10191_v38 = vpop.f32.mrb[156].mxu1  ;;  %v10223_v31 = vpop.f32.mrb[148].mxu0 }
 0x677   : > { %v4136_v59 = vmax.f32 %v4023_v18, %v10191_v38  ;;  %v4083_v13 = vpop.f32.mrb[157].mxu1  ;;  %v4196_v52 = vpop.f32.mrb[149].mxu0  ;;  %v13606_v38 = vmax.f32 %v12599_v44, %v12597_v28 }
 0x678   : > { %v4134_v22 = vmax.f32 %v4021_v15, %v4083_v13  ;;  %v10192_v39 = vpop.f32.mrb[158].mxu1  ;;  %v10224_v2 = vpop.f32.mrb[150].mxu0  ;;  %10235 = vmatprep.mubr.msk.bf16.mxu1 %vm1353_vm2, %v4261_v40  ;;  %v13605_v13 = vmax.f32 %v12595_v6, %v12593_v7  ;;  %v13608_v6 = vmax.f32 %v12611_v61, %v12607_v32 }
 0x679   : > { %v4249_v37 = vmax.f32 %v4136_v59, %v10223_v31  ;;  %v4137_v33 = vmax.f32 %v4024_v20, %v10192_v39  ;;  %v4086_v35 = vpop.f32.mrb[159].mxu1  ;;  %v4199_v57 = vpop.f32.mrb[151].mxu0  ;;  %10236 = vmatmul.mubr.msk.bf16.vlgmr.msra.gmra.mrb[168].mxu1 %vm1353_vm2, %v4262_v55 }
 0x67a   : > { %v4247_v58 = vmax.f32 %v4134_v22, %v4196_v52  ;;  %v4135_v25 = vmax.f32 %v13604_v45, %v4086_v35 }
 0x67b   : > { %v4250_v54 = vmax.f32 %v4137_v33, %v10224_v2  ;;  %v13609_v2 = vmax.f32 %v12619_v3, %v12617_v17  ;;  %v13610_v33 = vmax.f32 %v12623_v43, %v12621_v46  ;;  %v13613_v17 = vmax.f32 %v12635_v53, %v12631_v47 }
 0x67c   : > { %v4248_v34 = vmax.f32 %v4135_v25, %v4199_v57  ;;  %v13614_v47 = vmax.f32 %v12105_v27, 0.0 }
 0x67d   : > { %v4264_v11 = vpack.c.bf16 %v4250_v54, %v4249_v37 }
 0x67e   : > { %v4263_v49 = vpack.c.bf16 %v4248_v34, %v4247_v58  ;;  %v10195_v18 = vpop.f32.mrb[160].mxu1  ;;  %v10227_v15 = vpop.f32.mrb[152].mxu0  ;;  %v13612_v58 = vmax.f32 %v12629_v51, %v12625_v4 }
 0x67f   : > { %v4140_v59 = vmax.f32 %v13605_v13, %v10195_v18  ;;  %v4099_v20 = vpop.f32.mrb[161].mxu1  ;;  %v4212_v39 = vpop.f32.mrb[153].mxu0  ;;  %v12677_v18 = vld [vmem:[%s13611_s0] ss:$0 sm:$0xff]  ;;  %s13637_s0 = sld [smem:[#allocation18_spill]] }
 0x680   : > { %v4138_v40 = vmax.f32 %v13606_v38, %v4099_v20  ;;  %v10196_v41 = vpop.f32.mrb[162].mxu1  ;;  %v10228_v56 = vpop.f32.mrb[154].mxu0  ;;  %10239 = vmatprep.mubr.msk.bf16.mxu1 %vm1353_vm2, %v4263_v49  ;;  %v13615_v38 = vmax.f32 %v12110_v50, 0.0 }
 0x681   : > { %v4253_v16 = vmax.f32 %v4140_v59, %v10227_v15  ;;  %v4141_v55 = vmax.f32 %v13607_v0, %v10196_v41  ;;  %v4102_v31 = vpop.f32.mrb[163].mxu1  ;;  %v4215_v1 = vpop.f32.mrb[155].mxu0  ;;  %10240 = vmatmul.mubr.msk.bf16.gmra.mrb[172].mxu1 %vm1353_vm2, %v4264_v11  ;;  %v13617_v0 = vmax.f32 %v12112_v14, 0.0 }
 0x682   : > { %v4251_v7 = vmax.f32 %v4138_v40, %v4212_v39  ;;  %v4139_v24 = vmax.f32 %v13608_v6, %v4102_v31 }
 0x683   : > { %v4254_v28 = vmax.f32 %v4141_v55, %v10228_v56  ;;  %v13616_v56 = vmax.f32 %v12107_v12, 0.0  ;;  %v13618_v12 = vmax.f32 %v12129_v62, 0.0  ;;  %v13621_v62 = vmax.f32 %v12134_v29, 0.0 }
 0x684   : > { %v4252_v44 = vmax.f32 %v4139_v24, %v4215_v1 }
 0x685   : > { %v4266_v36 = vpack.c.bf16 %v4254_v28, %v4253_v16 }
 0x686   : > { %v4265_v9 = vpack.c.bf16 %v4252_v44, %v4251_v7  ;;  %v10199_v52 = vpop.f32.mrb[164].mxu1  ;;  %v10231_v22 = vpop.f32.mrb[156].mxu0 }
 0x687   : > { %v4144_v10 = vmax.f32 %v13609_v2, %v10199_v52  ;;  %v4115_v48 = vpop.f32.mrb[165].mxu1  ;;  %v4228_v37 = vpop.f32.mrb[157].mxu0  ;;  %v13619_v2 = vmax.f32 %v12126_v23, 0.0 }
 0x688   : > { %v4142_v35 = vmax.f32 %v13610_v33, %v4115_v48  ;;  %v10200_v57 = vpop.f32.mrb[166].mxu1  ;;  %v10232_v32 = vpop.f32.mrb[158].mxu0  ;;  %10243 = vmatprep.mubr.msk.bf16.mxu1 %vm1353_vm2, %v4265_v9 }
 0x689   : > { %v4257_v61 = vmax.f32 %v4144_v10, %v10231_v22  ;;  %v4145_v45 = vmax.f32 %v13612_v58, %v10200_v57  ;;  %v4118_v25 = vpop.f32.mrb[167].mxu1  ;;  %v4231_v54 = vpop.f32.mrb[159].mxu0  ;;  %10244 = vmatmul.mubr.msk.bf16.gmra.mrb[176].mxu1 %vm1353_vm2, %v4266_v36 }
 0x68a   : > { %v4255_v3 = vmax.f32 %v4142_v35, %v4228_v37  ;;  %v4143_v43 = vmax.f32 %v13613_v17, %v4118_v25  ;;  %v13620_v37 = vmax.f32 %v12131_v5, 0.0 }
 0x68b   : > { %v4258_v46 = vmax.f32 %v4145_v45, %v10232_v32 }
 0x68c   : > { %v4256_v34 = vmax.f32 %v4143_v43, %v4231_v54  ;;  %v13622_v43 = vmax.f32 %v12150_v42, 0.0  ;;  %v13625_v42 = vmax.f32 %v12160_v19, 0.0 }
 0x68d   : > { %v4268_v11 = vpack.c.bf16 %v4258_v46, %v4257_v61 }
 0x68e   : > { %v4267_v49 = vpack.c.bf16 %v4256_v34, %v4255_v3 }
 0x690   : > { %10247 = vmatprep.mubr.msk.bf16.mxu1 %vm1353_vm2, %v4267_v49 }
 0x691   : > { %10248 = vmatmul.mubr.msk.bf16.gmra.mrb[180].mxu1 %vm1353_vm2, %v4268_v11  ;;  %v13623_v11 = vmax.f32 %v12153_v63, 0.0 }
 0x74c   : > { %v10237_v4 = vpop.f32.mrb[168].mxu1 }
 0x74d   : > { %v4349_v51 = vadd.f32 %v10237_v4, %v12677_v18  ;;  %v4340_v15 = vpop.f32.mrb[169].mxu1 }
 0x74e   : > { %v4341_v13 = vadd.f32 %v12677_v18, %v4340_v15  ;;  %v10238_v59 = vpop.f32.mrb[170].mxu1 }
 0x74f   : > { %v4405_v53 = vadd.f32 %v4349_v51, %v13614_v47  ;;  %v4352_v20 = vadd.f32 %v10238_v59, %v12677_v18  ;;  %v4343_v39 = vpop.f32.mrb[171].mxu1  ;;  %v13624_v51 = vmax.f32 %v12157_v26, 0.0 }
 0x750   : > { %v4403_v40 = vadd.f32 %v4341_v13, %v13615_v38  ;;  %v4344_v41 = vadd.f32 %v12677_v18, %v4343_v39 }
 0x751   : > { %v4406_v16 = vadd.f32 %v4352_v20, %v13616_v56  ;;  %v4421_v31 = vmax.f32 %v4405_v53, 0.0 }
 0x752   : > { %v4404_v55 = vadd.f32 %v4344_v41, %v13617_v0  ;;  %v4419_v7 = vmax.f32 %v4403_v40, 0.0 }
 0x753   : > { %v4422_v1 = vmax.f32 %v4406_v16, 0.0  ;;  %v13626_v16 = vmax.f32 %v12176_v60, 0.0  ;;  %v13630_v60 = vmax.f32 %v12186_v8, 0.0  ;;  %v12768_v8 = vld [vmem:[%s13629_s18] ss:$0 sm:$0xff]  ;;  %s13639_s18 = sld [smem:[#allocation5_spill]] }
 0x754   : > { %v4420_v6 = vmax.f32 %v4404_v55, 0.0  ;;  %v10241_v27 = vpop.f32.mrb[172].mxu1 }
 0x755   : > { %v12691_v24 = vpack.c.bf16 %v4422_v1, %v4421_v31  ;;  %v4365_v28 = vadd.f32 %v10241_v27, %v12677_v18  ;;  %v4356_v44 = vpop.f32.mrb[173].mxu1  ;;  %v13627_v31 = vmax.f32 %v12179_v21, 0.0 }
 0x756   : > { %v12694_v50 = vpack.c.bf16 %v4420_v6, %v4419_v7  ;;  %v4357_v36 = vadd.f32 %v12677_v18, %v4356_v44  ;;  %v10242_v9 = vpop.f32.mrb[174].mxu1  ;;  %v13628_v6 = vmax.f32 %v12183_v30, 0.0  ;;  %v12760_v30 = vld [vmem:[%s11567_s28] sm:$0xff]  }
 0x757   : > { %v4409_v52 = vadd.f32 %v4365_v28, %v13618_v12  ;;  %v4368_v14 = vadd.f32 %v10242_v9, %v12677_v18  ;;  %v4359_v22 = vpop.f32.mrb[175].mxu1  ;;  %10287 = vmatprep.mubr.bf16.mxu1 %v12760_v30 }
 0x758   : > { %v4407_v10 = vadd.f32 %v4357_v36, %v13619_v2  ;;  %v4360_v48 = vadd.f32 %v12677_v18, %v4359_v22  ;;  %10255 = vmatprep.mubr.msk.bf16.mxu0 %vm3225_vm3, %v12694_v50 }
 0x759   : > { %v4410_v33 = vadd.f32 %v4368_v14, %v13620_v37  ;;  %10256 = vmatmul.mubr.msk.bf16.vlgmr.msra.gmra.mrb[160].mxu0 %vm3225_vm3, %v12691_v24  ;;  %v4425_v57 = vmax.f32 %v4409_v52, 0.0  ;;  %v12763_v52 = vld [vmem:[%s11567_s28 + $0x20] sm:$0xff]  }
 0x75a   : > { %v4408_v35 = vadd.f32 %v4360_v48, %v13621_v62  ;;  %v4423_v61 = vmax.f32 %v4407_v10, 0.0 }
 0x75b   : > { %v4426_v32 = vmax.f32 %v4410_v33, 0.0 }
 0x75c   : > { %v4424_v58 = vmax.f32 %v4408_v35, 0.0  ;;  %v10245_v23 = vpop.f32.mrb[176].mxu1 }
 0x75d   : > { %v12711_v45 = vpack.c.bf16 %v4426_v32, %v4425_v57  ;;  %v4381_v25 = vadd.f32 %v10245_v23, %v12677_v18  ;;  %v4372_v54 = vpop.f32.mrb[177].mxu1 }
 0x75e   : > { %v12714_v3 = vpack.c.bf16 %v4424_v58, %v4423_v61  ;;  %v4373_v5 = vadd.f32 %v12677_v18, %v4372_v54  ;;  %v10246_v17 = vpop.f32.mrb[178].mxu1 }
 0x75f   : > { %v4413_v46 = vadd.f32 %v4381_v25, %v13622_v43  ;;  %v4384_v29 = vadd.f32 %v10246_v17, %v12677_v18  ;;  %v4375_v34 = vpop.f32.mrb[179].mxu1 }
 0x760   : > { %v4411_v49 = vadd.f32 %v4373_v5, %v13623_v11  ;;  %v4376_v4 = vadd.f32 %v12677_v18, %v4375_v34  ;;  %10259 = vmatprep.mubr.msk.bf16.mxu0 %vm3225_vm3, %v12714_v3 }
 0x761   : > { %v4414_v15 = vadd.f32 %v4384_v29, %v13624_v51  ;;  %10260 = vmatmul.mubr.msk.bf16.gmra.mrb[164].mxu0 %vm3225_vm3, %v12711_v45  ;;  %v4429_v59 = vmax.f32 %v4413_v46, 0.0 }
 0x762   : > { %v4412_v13 = vadd.f32 %v4376_v4, %v13625_v42  ;;  %v4427_v53 = vmax.f32 %v4411_v49, 0.0 }
 0x763   : > { %v4430_v47 = vmax.f32 %v4414_v15, 0.0 }
 0x764   : > { %v4428_v20 = vmax.f32 %v4412_v13, 0.0  ;;  %v10249_v63 = vpop.f32.mrb[180].mxu1 }
 0x765   : > { %v12731_v39 = vpack.c.bf16 %v4430_v47, %v4429_v59  ;;  %v4397_v38 = vadd.f32 %v10249_v63, %v12677_v18  ;;  %v4388_v40 = vpop.f32.mrb[181].mxu1 }
 0x766   : > { %v12734_v41 = vpack.c.bf16 %v4428_v20, %v4427_v53  ;;  %v4389_v26 = vadd.f32 %v12677_v18, %v4388_v40  ;;  %v10250_v56 = vpop.f32.mrb[182].mxu1 }
 0x767   : > { %v4417_v0 = vadd.f32 %v4397_v38, %v13626_v16  ;;  %v4400_v19 = vadd.f32 %v10250_v56, %v12677_v18  ;;  %v4391_v55 = vpop.f32.mrb[183].mxu1 }
 0x768   : > { %v4415_v1 = vadd.f32 %v4389_v26, %v13627_v31  ;;  %v4392_v7 = vadd.f32 %v12677_v18, %v4391_v55  ;;  %10263 = vmatprep.mubr.msk.bf16.mxu0 %vm3225_vm3, %v12734_v41 }
 0x769   : > { %v4418_v27 = vadd.f32 %v4400_v19, %v13628_v6  ;;  %10264 = vmatmul.mubr.msk.bf16.gmra.mrb[168].mxu0 %vm3225_vm3, %v12731_v39  ;;  %v4433_v44 = vmax.f32 %v4417_v0, 0.0 }
 0x76a   : > { %v4416_v28 = vadd.f32 %v4392_v7, %v13630_v60  ;;  %v4431_v21 = vmax.f32 %v4415_v1, 0.0 }
 0x76b   : > { %v4434_v36 = vmax.f32 %v4418_v27, 0.0 }
 0x76c   : > { %v4432_v9 = vmax.f32 %v4416_v28, 0.0 }
 0x76d   : > { %v12751_v12 = vpack.c.bf16 %v4434_v36, %v4433_v44 }
 0x76e   : > { %v12753_v18 = vpack.c.bf16 %v4432_v9, %v4431_v21 }
 0x770   : > { %10267 = vmatprep.mubr.msk.bf16.mxu0 %vm3225_vm3, %v12753_v18 }
 0x771   : > { %10268 = vmatmul.mubr.msk.bf16.gmra.mrb[172].mxu0 %vm3225_vm3, %v12751_v12 }
 0x772   : > { %10311 = vmatprep.mubr.bf16.mxu0 %v12763_v52 }
 0x82c   : > { %v10257_v14 = vpop.f32.mrb[160].mxu0 }
 0x82d   : > { %v4533_v22 = vadd.f32 %v10257_v14, %v12768_v8  ;;  %v4524_v2 = vpop.f32.mrb[161].mxu0 }
 0x82e   : > { %v4525_v10 = vadd.f32 %v12768_v8, %v4524_v2  ;;  %v10258_v48 = vpop.f32.mrb[162].mxu0 }
 0x82f   : > { %v4536_v37 = vadd.f32 %v10258_v48, %v12768_v8  ;;  %v4527_v33 = vpop.f32.mrb[163].mxu0  ;;  %v4589_v35 = vmax.f32 %v4533_v22, 0.0  ;;  %v12843_v48 = vld [vmem:[%s11567_s28 + $0x10] sm:$0xff]  }
 0x830   : > { %v4528_v62 = vadd.f32 %v12768_v8, %v4527_v33  ;;  %v4587_v32 = vmax.f32 %v4525_v10, 0.0  ;;  %v12836_v10 = vld [vmem:[%s11567_s28 + $0x28] sm:$0xff]   ;;  %v12857_v33 = vld [vmem:[%s11567_s28 + $0x18] sm:$0xff]  }
 0x831   : > { %v4590_v57 = vmax.f32 %v4536_v37, 0.0  ;;  %v12846_v37 = vld [vmem:[%s11567_s28 + $0x30] sm:$0xff]  }
 0x832   : > { %v4588_v61 = vmax.f32 %v4528_v62, 0.0  ;;  %v12860_v62 = vld [vmem:[%s11567_s28 + $0x38] sm:$0xff]  }
 0x833   : > { %v12774_v58 = vpack.c.bf16 %v4590_v57, %v4589_v35  ;;  %v12867_v35 = vld [vmem:[%s11567_s28 + $0x40] sm:$0xff]  }
 0x834   : > { %v12776_v23 = vpack.c.bf16 %v4588_v61, %v4587_v32  ;;  %v10261_v25 = vpop.f32.mrb[164].mxu0  ;;  %v12870_v57 = vld [vmem:[%s11567_s28 + $0x60] sm:$0xff]   ;;  %v12897_v32 = vld [vmem:[%s11567_s28 + $0x48] sm:$0xff]  }
 0x835   : > { %v4549_v54 = vadd.f32 %v10261_v25, %v12768_v8  ;;  %v4540_v5 = vpop.f32.mrb[165].mxu0  ;;  %v12900_v61 = vld [vmem:[%s11567_s28 + $0x68] sm:$0xff]   ;;  %v12907_v25 = vld [vmem:[%s11567_s28 + $0x50] sm:$0xff]  }
 0x836   : > { %v4541_v17 = vadd.f32 %v12768_v8, %v4540_v5  ;;  %v10262_v43 = vpop.f32.mrb[166].mxu0  ;;  %10271 = vmatprep.subr.bf16.mxu1 %v12776_v23  ;;  %10295 = vmatprep.subr.bf16.mxu0 %v12776_v23  ;;  %v12921_v5 = vld [vmem:[%s11567_s28 + $0x58] sm:$0xff]  }
 0x837   : > { %v4552_v46 = vadd.f32 %v10262_v43, %v12768_v8  ;;  %v4543_v29 = vpop.f32.mrb[167].mxu0  ;;  %10272 = vmatpush3.bf16.msra.mxu1 %v12776_v23  ;;  %10296 = vmatpush3.bf16.msra.mxu0 %v12776_v23  ;;  %v4593_v11 = vmax.f32 %v4549_v54, 0.0  ;;  %v12910_v54 = vld [vmem:[%s11567_s28 + $0x70] sm:$0xff]   ;;  %v12931_v43 = vld [vmem:[%s11567_s28 + $0x80] sm:$0xff]  }
 0x838   : > { %v4544_v34 = vadd.f32 %v12768_v8, %v4543_v29  ;;  %10273 = vmatprep.subr.bf16.mxu1 %v12774_v58  ;;  %10297 = vmatprep.subr.bf16.mxu0 %v12774_v58  ;;  %v4591_v4 = vmax.f32 %v4541_v17, 0.0  ;;  %v12924_v17 = vld [vmem:[%s11567_s28 + $0x78] sm:$0xff]   ;;  %v12961_v29 = vld [vmem:[%s11567_s28 + $0x88] sm:$0xff]  }
 0x839   : > { %v4594_v49 = vmax.f32 %v4552_v46, 0.0  ;;  %v12934_v46 = vld [vmem:[%s11567_s28 + $0xa0] sm:$0xff]  }
 0x83a   : > { %v4592_v51 = vmax.f32 %v4544_v34, 0.0  ;;  %v12964_v34 = vld [vmem:[%s11567_s28 + $0xa8] sm:$0xff]  }
 0x83b   : > { %v12788_v15 = vpack.c.bf16 %v4594_v49, %v4593_v11  ;;  %10274 = vmatpush3.bf16.msra.mxu1 %v12774_v58  ;;  %10298 = vmatpush3.bf16.msra.mxu0 %v12774_v58  ;;  %v12971_v11 = vld [vmem:[%s11567_s28 + $0x90] sm:$0xff]  }
 0x83c   : > { %v12792_v42 = vpack.c.bf16 %v4592_v51, %v4591_v4  ;;  %v10265_v13 = vpop.f32.mrb[168].mxu0  ;;  %v12974_v49 = vld [vmem:[%s11567_s28 + $0xb0] sm:$0xff]   ;;  %v12985_v4 = vld [vmem:[%s11567_s28 + $0x98] sm:$0xff]  }
 0x83d   : > { %v4565_v59 = vadd.f32 %v10265_v13, %v12768_v8  ;;  %v4556_v47 = vpop.f32.mrb[169].mxu0  ;;  %v12988_v51 = vld [vmem:[%s11567_s28 + $0xb8] sm:$0xff]   ;;  %v12998_v13 = vld [vmem:[%s11567_s28 + $0xe0] sm:$0xff]  }
 0x83e   : > { %v4557_v53 = vadd.f32 %v12768_v8, %v4556_v47  ;;  %v10266_v20 = vpop.f32.mrb[170].mxu0  ;;  %10275 = vmatprep.subr.bf16.mxu1 %v12792_v42  ;;  %10299 = vmatprep.subr.bf16.mxu0 %v12792_v42  ;;  %v13049_v47 = vld [vmem:[%s11567_s28 + $0xd8] sm:$0xff]  }
 0x83f   : > { %v4568_v63 = vadd.f32 %v10266_v20, %v12768_v8  ;;  %v4559_v38 = vpop.f32.mrb[171].mxu0  ;;  %10276 = vmatpush3.bf16.msra.mxu1 %v12792_v42  ;;  %10300 = vmatpush3.bf16.msra.mxu0 %v12792_v42  ;;  %v4597_v26 = vmax.f32 %v4565_v59, 0.0  ;;  %v13038_v59 = vld [vmem:[%s11567_s28 + $0xf0] sm:$0xff]  }
 0x840   : > { %v4560_v40 = vadd.f32 %v12768_v8, %v4559_v38  ;;  %10277 = vmatprep.subr.bf16.mxu1 %v12788_v15  ;;  %10301 = vmatprep.subr.bf16.mxu0 %v12788_v15  ;;  %v4595_v16 = vmax.f32 %v4557_v53, 0.0  ;;  %v13052_v53 = vld [vmem:[%s11567_s28 + $0xf8] sm:$0xff]  }
 0x841   : > { %v4598_v56 = vmax.f32 %v4568_v63, 0.0 }
 0x842   : > { %v4596_v0 = vmax.f32 %v4560_v40, 0.0 }
 0x843   : > { %v12804_v19 = vpack.c.bf16 %v4598_v56, %v4597_v26  ;;  %10278 = vmatpush3.bf16.msra.mxu1 %v12788_v15  ;;  %10302 = vmatpush3.bf16.msra.mxu0 %v12788_v15 }
 0x844   : > { %v12808_v55 = vpack.c.bf16 %v4596_v0, %v4595_v16  ;;  %v10269_v31 = vpop.f32.mrb[172].mxu0 }
 0x845   : > { %v4581_v1 = vadd.f32 %v10269_v31, %v12768_v8  ;;  %v4572_v7 = vpop.f32.mrb[173].mxu0 }
 0x846   : > { %v4573_v6 = vadd.f32 %v12768_v8, %v4572_v7  ;;  %v10270_v27 = vpop.f32.mrb[174].mxu0  ;;  %10279 = vmatprep.subr.bf16.mxu1 %v12808_v55  ;;  %10303 = vmatprep.subr.bf16.mxu0 %v12808_v55 }
 0x847   : > { %v4584_v60 = vadd.f32 %v10270_v27, %v12768_v8  ;;  %v4575_v28 = vpop.f32.mrb[175].mxu0  ;;  %10280 = vmatpush3.bf16.msra.mxu1 %v12808_v55  ;;  %10304 = vmatpush3.bf16.msra.mxu0 %v12808_v55  ;;  %v4601_v36 = vmax.f32 %v4581_v1, 0.0 }
 0x848   : > { %v4576_v44 = vadd.f32 %v12768_v8, %v4575_v28  ;;  %10281 = vmatprep.subr.bf16.mxu1 %v12804_v19  ;;  %10305 = vmatprep.subr.bf16.mxu0 %v12804_v19  ;;  %v4599_v9 = vmax.f32 %v4573_v6, 0.0  ;;  %v12833_v8 = vld [vmem:[%s11567_s28 + $0x8] sm:$0xff]  }
 0x849   : > { %v4602_v21 = vmax.f32 %v4584_v60, 0.0 }
 0x84a   : > { %v4600_v14 = vmax.f32 %v4576_v44, 0.0 }
 0x84b   : > { %v12820_v22 = vpack.c.bf16 %v4602_v21, %v4601_v36  ;;  %10282 = vmatpush3.bf16.msra.mxu1 %v12804_v19  ;;  %10306 = vmatpush3.bf16.msra.mxu0 %v12804_v19 }
 0x84c   : > { %v12824_v2 = vpack.c.bf16 %v4600_v14, %v4599_v9 }
 0x84e   : > { %10283 = vmatprep.subr.bf16.mxu1 %v12824_v2  ;;  %10307 = vmatprep.subr.bf16.mxu0 %v12824_v2 }
 0x84f   : > { %10284 = vmatpush3.bf16.msra.mxu1 %v12824_v2  ;;  %10308 = vmatpush3.bf16.msra.mxu0 %v12824_v2 }
 0x850   : > { %10285 = vmatprep.subr.bf16.mxu1 %v12820_v22  ;;  %10309 = vmatprep.subr.bf16.mxu0 %v12820_v22 }
 0x853   : > { %10286 = vmatpush3.bf16.msra.mxu1 %v12820_v22  ;;  %10310 = vmatpush3.bf16.msra.mxu0 %v12820_v22 }
 0x854   : > { %10319 = vmatprep.subr.bf16.mxu1 %v12776_v23  ;;  %10343 = vmatprep.subr.bf16.mxu0 %v12776_v23 }
 0x856   : > { %10288 = vmatmul.mubr.bf16.vlgmr.msra.gmra.mrb[184].mxu1 %v12833_v8  ;;  %10312 = vmatmul.mubr.bf16.vlgmr.msra.gmra.mrb[176].mxu0 %v12836_v10 }
 0x857   : > { %10320 = vmatpush3.bf16.msra.mxu1 %v12776_v23  ;;  %10344 = vmatpush3.bf16.msra.mxu0 %v12776_v23 }
 0x858   : > { %10321 = vmatprep.subr.bf16.mxu1 %v12774_v58  ;;  %10345 = vmatprep.subr.bf16.mxu0 %v12774_v58 }
 0x859   : > { %10291 = vmatprep.mubr.bf16.mxu1 %v12843_v48  ;;  %10315 = vmatprep.mubr.bf16.mxu0 %v12846_v37 }
 0x85b   : > { %10322 = vmatpush3.bf16.msra.mxu1 %v12774_v58  ;;  %10346 = vmatpush3.bf16.msra.mxu0 %v12774_v58 }
 0x85c   : > { %10323 = vmatprep.subr.bf16.mxu1 %v12792_v42  ;;  %10347 = vmatprep.subr.bf16.mxu0 %v12792_v42 }
 0x85e   : > { %10292 = vmatmul.mubr.bf16.gmra.mrb[188].mxu1 %v12857_v33  ;;  %10316 = vmatmul.mubr.bf16.gmra.mrb[180].mxu0 %v12860_v62 }
 0x85f   : > { %10324 = vmatpush3.bf16.msra.mxu1 %v12792_v42  ;;  %10348 = vmatpush3.bf16.msra.mxu0 %v12792_v42 }
 0x860   : > { %10325 = vmatprep.subr.bf16.mxu1 %v12788_v15  ;;  %10349 = vmatprep.subr.bf16.mxu0 %v12788_v15 }
 0x861   : > { %10335 = vmatprep.mubr.bf16.mxu1 %v12867_v35  ;;  %10359 = vmatprep.mubr.bf16.mxu0 %v12870_v57 }
 0x863   : > { %10326 = vmatpush3.bf16.msra.mxu1 %v12788_v15  ;;  %10350 = vmatpush3.bf16.msra.mxu0 %v12788_v15 }
 0x864   : > { %10327 = vmatprep.subr.bf16.mxu1 %v12808_v55  ;;  %10351 = vmatprep.subr.bf16.mxu0 %v12808_v55 }
 0x867   : > { %10328 = vmatpush3.bf16.msra.mxu1 %v12808_v55  ;;  %10352 = vmatpush3.bf16.msra.mxu0 %v12808_v55 }
 0x868   : > { %10329 = vmatprep.subr.bf16.mxu1 %v12804_v19  ;;  %10353 = vmatprep.subr.bf16.mxu0 %v12804_v19 }
 0x86b   : > { %10330 = vmatpush3.bf16.msra.mxu1 %v12804_v19  ;;  %10354 = vmatpush3.bf16.msra.mxu0 %v12804_v19 }
 0x86c   : > { %10331 = vmatprep.subr.bf16.mxu1 %v12824_v2  ;;  %10355 = vmatprep.subr.bf16.mxu0 %v12824_v2 }
 0x86f   : > { %10332 = vmatpush3.bf16.msra.mxu1 %v12824_v2  ;;  %10356 = vmatpush3.bf16.msra.mxu0 %v12824_v2 }
 0x870   : > { %10333 = vmatprep.subr.bf16.mxu1 %v12820_v22  ;;  %10357 = vmatprep.subr.bf16.mxu0 %v12820_v22 }
 0x873   : > { %10334 = vmatpush3.bf16.msra.mxu1 %v12820_v22  ;;  %10358 = vmatpush3.bf16.msra.mxu0 %v12820_v22 }
 0x874   : > { %10367 = vmatprep.subr.bf16.mxu1 %v12776_v23  ;;  %10391 = vmatprep.subr.bf16.mxu0 %v12776_v23 }
 0x876   : > { %10336 = vmatmul.mubr.bf16.vlgmr.msra.gmra.mrb[192].mxu1 %v12897_v32  ;;  %10360 = vmatmul.mubr.bf16.vlgmr.msra.gmra.mrb[184].mxu0 %v12900_v61 }
 0x877   : > { %10368 = vmatpush3.bf16.msra.mxu1 %v12776_v23  ;;  %10392 = vmatpush3.bf16.msra.mxu0 %v12776_v23 }
 0x878   : > { %10369 = vmatprep.subr.bf16.mxu1 %v12774_v58  ;;  %10393 = vmatprep.subr.bf16.mxu0 %v12774_v58 }
 0x879   : > { %10339 = vmatprep.mubr.bf16.mxu1 %v12907_v25  ;;  %10363 = vmatprep.mubr.bf16.mxu0 %v12910_v54 }
 0x87b   : > { %10370 = vmatpush3.bf16.msra.mxu1 %v12774_v58  ;;  %10394 = vmatpush3.bf16.msra.mxu0 %v12774_v58 }
 0x87c   : > { %10371 = vmatprep.subr.bf16.mxu1 %v12792_v42  ;;  %10395 = vmatprep.subr.bf16.mxu0 %v12792_v42 }
 0x87e   : > { %10340 = vmatmul.mubr.bf16.gmra.mrb[196].mxu1 %v12921_v5  ;;  %10364 = vmatmul.mubr.bf16.gmra.mrb[188].mxu0 %v12924_v17 }
 0x87f   : > { %10372 = vmatpush3.bf16.msra.mxu1 %v12792_v42  ;;  %10396 = vmatpush3.bf16.msra.mxu0 %v12792_v42 }
 0x880   : > { %10373 = vmatprep.subr.bf16.mxu1 %v12788_v15  ;;  %10397 = vmatprep.subr.bf16.mxu0 %v12788_v15 }
 0x881   : > { %10383 = vmatprep.mubr.bf16.mxu1 %v12931_v43  ;;  %10407 = vmatprep.mubr.bf16.mxu0 %v12934_v46 }
 0x883   : > { %10374 = vmatpush3.bf16.msra.mxu1 %v12788_v15  ;;  %10398 = vmatpush3.bf16.msra.mxu0 %v12788_v15 }
 0x884   : > { %10375 = vmatprep.subr.bf16.mxu1 %v12808_v55  ;;  %10399 = vmatprep.subr.bf16.mxu0 %v12808_v55 }
 0x887   : > { %10376 = vmatpush3.bf16.msra.mxu1 %v12808_v55  ;;  %10400 = vmatpush3.bf16.msra.mxu0 %v12808_v55 }
 0x888   : > { %10377 = vmatprep.subr.bf16.mxu1 %v12804_v19  ;;  %10401 = vmatprep.subr.bf16.mxu0 %v12804_v19 }
 0x88b   : > { %10378 = vmatpush3.bf16.msra.mxu1 %v12804_v19  ;;  %10402 = vmatpush3.bf16.msra.mxu0 %v12804_v19 }
 0x88c   : > { %10379 = vmatprep.subr.bf16.mxu1 %v12824_v2  ;;  %10403 = vmatprep.subr.bf16.mxu0 %v12824_v2 }
 0x88f   : > { %10380 = vmatpush3.bf16.msra.mxu1 %v12824_v2  ;;  %10404 = vmatpush3.bf16.msra.mxu0 %v12824_v2 }
 0x890   : > { %10381 = vmatprep.subr.bf16.mxu1 %v12820_v22  ;;  %10405 = vmatprep.subr.bf16.mxu0 %v12820_v22 }
 0x893   : > { %10382 = vmatpush3.bf16.msra.mxu1 %v12820_v22  ;;  %10406 = vmatpush3.bf16.msra.mxu0 %v12820_v22 }
 0x894   : > { %10415 = vmatprep.subr.bf16.mxu1 %v12776_v23  ;;  %10439 = vmatprep.subr.bf16.mxu0 %v12776_v23 }
 0x896   : > { %10384 = vmatmul.mubr.bf16.vlgmr.msra.gmra.mrb[200].mxu1 %v12961_v29  ;;  %10408 = vmatmul.mubr.bf16.vlgmr.msra.gmra.mrb[192].mxu0 %v12964_v34 }
 0x897   : > { %10416 = vmatpush3.bf16.msra.mxu1 %v12776_v23  ;;  %10440 = vmatpush3.bf16.msra.mxu0 %v12776_v23  ;;  %v12995_v23 = vld [vmem:[%s11567_s28 + $0xc0] sm:$0xff]  }
 0x898   : > { %10417 = vmatprep.subr.bf16.mxu1 %v12774_v58  ;;  %10441 = vmatprep.subr.bf16.mxu0 %v12774_v58 }
 0x899   : > { %10387 = vmatprep.mubr.bf16.mxu1 %v12971_v11  ;;  %10411 = vmatprep.mubr.bf16.mxu0 %v12974_v49 }
 0x89b   : > { %10418 = vmatpush3.bf16.msra.mxu1 %v12774_v58  ;;  %10442 = vmatpush3.bf16.msra.mxu0 %v12774_v58  ;;  %v13025_v58 = vld [vmem:[%s11567_s28 + $0xc8] sm:$0xff]  }
 0x89c   : > { %10419 = vmatprep.subr.bf16.mxu1 %v12792_v42  ;;  %10443 = vmatprep.subr.bf16.mxu0 %v12792_v42 }
 0x89e   : > { %10388 = vmatmul.mubr.bf16.gmra.mrb[204].mxu1 %v12985_v4  ;;  %10412 = vmatmul.mubr.bf16.gmra.mrb[196].mxu0 %v12988_v51 }
 0x89f   : > { %10420 = vmatpush3.bf16.msra.mxu1 %v12792_v42  ;;  %10444 = vmatpush3.bf16.msra.mxu0 %v12792_v42  ;;  %v13035_v42 = vld [vmem:[%s11567_s28 + $0xd0] sm:$0xff]  }
 0x8a0   : > { %10421 = vmatprep.subr.bf16.mxu1 %v12788_v15  ;;  %10445 = vmatprep.subr.bf16.mxu0 %v12788_v15 }
 0x8a1   : > { %10431 = vmatprep.mubr.bf16.mxu1 %v12995_v23  ;;  %10455 = vmatprep.mubr.bf16.mxu0 %v12998_v13 }
 0x8a3   : > { %10422 = vmatpush3.bf16.msra.mxu1 %v12788_v15  ;;  %10446 = vmatpush3.bf16.msra.mxu0 %v12788_v15  ;;  %v13028_v15 = vld [vmem:[%s11567_s28 + $0xe8] sm:$0xff]   ;;  %s13634_s28 = sld [smem:[#allocation13_spill]] }
 0x8a4   : > { %10423 = vmatprep.subr.bf16.mxu1 %v12808_v55  ;;  %10447 = vmatprep.subr.bf16.mxu0 %v12808_v55 }
 0x8a7   : > { %10424 = vmatpush3.bf16.msra.mxu1 %v12808_v55  ;;  %10448 = vmatpush3.bf16.msra.mxu0 %v12808_v55 }
 0x8a8   : > { %10425 = vmatprep.subr.bf16.mxu1 %v12804_v19  ;;  %10449 = vmatprep.subr.bf16.mxu0 %v12804_v19 }
 0x8ab   : > { %10426 = vmatpush3.bf16.msra.mxu1 %v12804_v19  ;;  %10450 = vmatpush3.bf16.msra.mxu0 %v12804_v19 }
 0x8ac   : > { %10427 = vmatprep.subr.bf16.mxu1 %v12824_v2  ;;  %10451 = vmatprep.subr.bf16.mxu0 %v12824_v2 }
 0x8af   : > { %10428 = vmatpush3.bf16.msra.mxu1 %v12824_v2  ;;  %10452 = vmatpush3.bf16.msra.mxu0 %v12824_v2 }
 0x8b0   : > { %10429 = vmatprep.subr.bf16.mxu1 %v12820_v22  ;;  %10453 = vmatprep.subr.bf16.mxu0 %v12820_v22 }
 0x8b3   : > { %10430 = vmatpush3.bf16.msra.mxu1 %v12820_v22  ;;  %10454 = vmatpush3.bf16.msra.mxu0 %v12820_v22 }
 0x8b4   : > { %10463 = vmatprep.subr.bf16.mxu1 %v12694_v50  ;;  %10487 = vmatprep.subr.bf16.mxu0 %v12694_v50 }
 0x8b6   : > { %10432 = vmatmul.mubr.bf16.vlgmr.msra.gmra.mrb[208].mxu1 %v13025_v58  ;;  %10456 = vmatmul.mubr.bf16.vlgmr.msra.gmra.mrb[200].mxu0 %v13028_v15 }
 0x8b7   : > { %10464 = vmatpush3.bf16.msra.mxu1 %v12694_v50  ;;  %10488 = vmatpush3.bf16.msra.mxu0 %v12694_v50 }
 0x8b8   : > { %10465 = vmatprep.subr.bf16.mxu1 %v12691_v24  ;;  %10489 = vmatprep.subr.bf16.mxu0 %v12691_v24 }
 0x8b9   : > { %10435 = vmatprep.mubr.bf16.mxu1 %v13035_v42  ;;  %10459 = vmatprep.mubr.bf16.mxu0 %v13038_v59 }
 0x8bb   : > { %10466 = vmatpush3.bf16.msra.mxu1 %v12691_v24  ;;  %10490 = vmatpush3.bf16.msra.mxu0 %v12691_v24 }
 0x8bc   : > { %10467 = vmatprep.subr.bf16.mxu1 %v12714_v3  ;;  %10491 = vmatprep.subr.bf16.mxu0 %v12714_v3 }
 0x8be   : > { %10436 = vmatmul.mubr.bf16.gmra.mrb[212].mxu1 %v13049_v47  ;;  %10460 = vmatmul.mubr.bf16.gmra.mrb[204].mxu0 %v13052_v53 }
 0x8bf   : > { %10468 = vmatpush3.bf16.msra.mxu1 %v12714_v3  ;;  %10492 = vmatpush3.bf16.msra.mxu0 %v12714_v3 }
 0x8c0   : > { %10469 = vmatprep.subr.bf16.mxu1 %v12711_v45  ;;  %10493 = vmatprep.subr.bf16.mxu0 %v12711_v45 }
 0x8c1   : > { %10479 = vmatprep.mubr.bf16.mxu1 %v12760_v30  ;;  %10503 = vmatprep.mubr.bf16.mxu0 %v12763_v52 }
 0x8c3   : > { %10470 = vmatpush3.bf16.msra.mxu1 %v12711_v45  ;;  %10494 = vmatpush3.bf16.msra.mxu0 %v12711_v45 }
 0x8c4   : > { %10471 = vmatprep.subr.bf16.mxu1 %v12734_v41  ;;  %10495 = vmatprep.subr.bf16.mxu0 %v12734_v41 }
 0x8c7   : > { %10472 = vmatpush3.bf16.msra.mxu1 %v12734_v41  ;;  %10496 = vmatpush3.bf16.msra.mxu0 %v12734_v41 }
 0x8c8   : > { %10473 = vmatprep.subr.bf16.mxu1 %v12731_v39  ;;  %10497 = vmatprep.subr.bf16.mxu0 %v12731_v39 }
 0x8cb   : > { %10474 = vmatpush3.bf16.msra.mxu1 %v12731_v39  ;;  %10498 = vmatpush3.bf16.msra.mxu0 %v12731_v39 }
 0x8cc   : > { %10475 = vmatprep.subr.bf16.mxu1 %v12753_v18  ;;  %10499 = vmatprep.subr.bf16.mxu0 %v12753_v18 }
 0x8cf   : > { %10476 = vmatpush3.bf16.msra.mxu1 %v12753_v18  ;;  %10500 = vmatpush3.bf16.msra.mxu0 %v12753_v18 }
 0x8d0   : > { %10477 = vmatprep.subr.bf16.mxu1 %v12751_v12  ;;  %10501 = vmatprep.subr.bf16.mxu0 %v12751_v12 }
 0x8d3   : > { %10478 = vmatpush3.bf16.msra.mxu1 %v12751_v12  ;;  %10502 = vmatpush3.bf16.msra.mxu0 %v12751_v12 }
 0x8d4   : > { %10511 = vmatprep.subr.bf16.mxu1 %v12694_v50  ;;  %10535 = vmatprep.subr.bf16.mxu0 %v12694_v50 }
 0x8d6   : > { %10480 = vmatmul.mubr.bf16.vlgmr.msra.gmra.mrb[216].mxu1 %v12833_v8  ;;  %10504 = vmatmul.mubr.bf16.vlgmr.msra.gmra.mrb[208].mxu0 %v12836_v10 }
 0x8d7   : > { %10512 = vmatpush3.bf16.msra.mxu1 %v12694_v50  ;;  %10536 = vmatpush3.bf16.msra.mxu0 %v12694_v50 }
 0x8d8   : > { %10513 = vmatprep.subr.bf16.mxu1 %v12691_v24  ;;  %10537 = vmatprep.subr.bf16.mxu0 %v12691_v24 }
 0x8d9   : > { %10483 = vmatprep.mubr.bf16.mxu1 %v12843_v48  ;;  %10507 = vmatprep.mubr.bf16.mxu0 %v12846_v37 }
 0x8db   : > { %10514 = vmatpush3.bf16.msra.mxu1 %v12691_v24  ;;  %10538 = vmatpush3.bf16.msra.mxu0 %v12691_v24 }
 0x8dc   : > { %10515 = vmatprep.subr.bf16.mxu1 %v12714_v3  ;;  %10539 = vmatprep.subr.bf16.mxu0 %v12714_v3 }
 0x8de   : > { %10484 = vmatmul.mubr.bf16.gmra.mrb[220].mxu1 %v12857_v33  ;;  %10508 = vmatmul.mubr.bf16.gmra.mrb[212].mxu0 %v12860_v62 }
 0x8df   : > { %10516 = vmatpush3.bf16.msra.mxu1 %v12714_v3  ;;  %10540 = vmatpush3.bf16.msra.mxu0 %v12714_v3 }
 0x8e0   : > { %10517 = vmatprep.subr.bf16.mxu1 %v12711_v45  ;;  %10541 = vmatprep.subr.bf16.mxu0 %v12711_v45 }
 0x8e1   : > { %10527 = vmatprep.mubr.bf16.mxu1 %v12867_v35  ;;  %10551 = vmatprep.mubr.bf16.mxu0 %v12870_v57 }
 0x8e3   : > { %10518 = vmatpush3.bf16.msra.mxu1 %v12711_v45  ;;  %10542 = vmatpush3.bf16.msra.mxu0 %v12711_v45 }
 0x8e4   : > { %10519 = vmatprep.subr.bf16.mxu1 %v12734_v41  ;;  %10543 = vmatprep.subr.bf16.mxu0 %v12734_v41 }
 0x8e7   : > { %10520 = vmatpush3.bf16.msra.mxu1 %v12734_v41  ;;  %10544 = vmatpush3.bf16.msra.mxu0 %v12734_v41 }
 0x8e8   : > { %10521 = vmatprep.subr.bf16.mxu1 %v12731_v39  ;;  %10545 = vmatprep.subr.bf16.mxu0 %v12731_v39 }
 0x8eb   : > { %10522 = vmatpush3.bf16.msra.mxu1 %v12731_v39  ;;  %10546 = vmatpush3.bf16.msra.mxu0 %v12731_v39 }
 0x8ec   : > { %10523 = vmatprep.subr.bf16.mxu1 %v12753_v18  ;;  %10547 = vmatprep.subr.bf16.mxu0 %v12753_v18 }
 0x8ef   : > { %10524 = vmatpush3.bf16.msra.mxu1 %v12753_v18  ;;  %10548 = vmatpush3.bf16.msra.mxu0 %v12753_v18 }
 0x8f0   : > { %10525 = vmatprep.subr.bf16.mxu1 %v12751_v12  ;;  %10549 = vmatprep.subr.bf16.mxu0 %v12751_v12 }
 0x8f3   : > { %10526 = vmatpush3.bf16.msra.mxu1 %v12751_v12  ;;  %10550 = vmatpush3.bf16.msra.mxu0 %v12751_v12 }
 0x8f4   : > { %10559 = vmatprep.subr.bf16.mxu1 %v12694_v50  ;;  %10583 = vmatprep.subr.bf16.mxu0 %v12694_v50 }
 0x8f6   : > { %10528 = vmatmul.mubr.bf16.vlgmr.msra.gmra.mrb[224].mxu1 %v12897_v32  ;;  %10552 = vmatmul.mubr.bf16.vlgmr.msra.gmra.mrb[216].mxu0 %v12900_v61 }
 0x8f7   : > { %10560 = vmatpush3.bf16.msra.mxu1 %v12694_v50  ;;  %10584 = vmatpush3.bf16.msra.mxu0 %v12694_v50 }
 0x8f8   : > { %10561 = vmatprep.subr.bf16.mxu1 %v12691_v24  ;;  %10585 = vmatprep.subr.bf16.mxu0 %v12691_v24 }
 0x8f9   : > { %10531 = vmatprep.mubr.bf16.mxu1 %v12907_v25  ;;  %10555 = vmatprep.mubr.bf16.mxu0 %v12910_v54 }
 0x8fb   : > { %10562 = vmatpush3.bf16.msra.mxu1 %v12691_v24  ;;  %10586 = vmatpush3.bf16.msra.mxu0 %v12691_v24 }
 0x8fc   : > { %10563 = vmatprep.subr.bf16.mxu1 %v12714_v3  ;;  %10587 = vmatprep.subr.bf16.mxu0 %v12714_v3 }
 0x8fe   : > { %10532 = vmatmul.mubr.bf16.gmra.mrb[228].mxu1 %v12921_v5  ;;  %10556 = vmatmul.mubr.bf16.gmra.mrb[220].mxu0 %v12924_v17 }
 0x8ff   : > { %10564 = vmatpush3.bf16.msra.mxu1 %v12714_v3  ;;  %10588 = vmatpush3.bf16.msra.mxu0 %v12714_v3 }
 0x900   : > { %10565 = vmatprep.subr.bf16.mxu1 %v12711_v45  ;;  %10589 = vmatprep.subr.bf16.mxu0 %v12711_v45 }
 0x901   : > { %10575 = vmatprep.mubr.bf16.mxu1 %v12931_v43  ;;  %10599 = vmatprep.mubr.bf16.mxu0 %v12934_v46 }
 0x903   : > { %10566 = vmatpush3.bf16.msra.mxu1 %v12711_v45  ;;  %10590 = vmatpush3.bf16.msra.mxu0 %v12711_v45 }
 0x904   : > { %10567 = vmatprep.subr.bf16.mxu1 %v12734_v41  ;;  %10591 = vmatprep.subr.bf16.mxu0 %v12734_v41 }
 0x907   : > { %10568 = vmatpush3.bf16.msra.mxu1 %v12734_v41  ;;  %10592 = vmatpush3.bf16.msra.mxu0 %v12734_v41 }
 0x908   : > { %10569 = vmatprep.subr.bf16.mxu1 %v12731_v39  ;;  %10593 = vmatprep.subr.bf16.mxu0 %v12731_v39 }
 0x90b   : > { %10570 = vmatpush3.bf16.msra.mxu1 %v12731_v39  ;;  %10594 = vmatpush3.bf16.msra.mxu0 %v12731_v39 }
 0x90c   : > { %10571 = vmatprep.subr.bf16.mxu1 %v12753_v18  ;;  %10595 = vmatprep.subr.bf16.mxu0 %v12753_v18 }
 0x90f   : > { %10572 = vmatpush3.bf16.msra.mxu1 %v12753_v18  ;;  %10596 = vmatpush3.bf16.msra.mxu0 %v12753_v18 }
 0x910   : > { %10573 = vmatprep.subr.bf16.mxu1 %v12751_v12  ;;  %10597 = vmatprep.subr.bf16.mxu0 %v12751_v12 }
 0x913   : > { %10574 = vmatpush3.bf16.msra.mxu1 %v12751_v12  ;;  %10598 = vmatpush3.bf16.msra.mxu0 %v12751_v12 }
 0x914   : > { %10607 = vmatprep.subr.bf16.mxu1 %v12694_v50  ;;  %10631 = vmatprep.subr.bf16.mxu0 %v12694_v50 }
 0x916   : > { %10576 = vmatmul.mubr.bf16.vlgmr.msra.gmra.mrb[232].mxu1 %v12961_v29  ;;  %10600 = vmatmul.mubr.bf16.vlgmr.msra.gmra.mrb[224].mxu0 %v12964_v34 }
 0x917   : > { %10608 = vmatpush3.bf16.msra.mxu1 %v12694_v50  ;;  %10632 = vmatpush3.bf16.msra.mxu0 %v12694_v50 }
 0x918   : > { %10609 = vmatprep.subr.bf16.mxu1 %v12691_v24  ;;  %10633 = vmatprep.subr.bf16.mxu0 %v12691_v24 }
 0x919   : > { %10579 = vmatprep.mubr.bf16.mxu1 %v12971_v11  ;;  %10603 = vmatprep.mubr.bf16.mxu0 %v12974_v49 }
 0x91b   : > { %10610 = vmatpush3.bf16.msra.mxu1 %v12691_v24  ;;  %10634 = vmatpush3.bf16.msra.mxu0 %v12691_v24 }
 0x91c   : > { %10611 = vmatprep.subr.bf16.mxu1 %v12714_v3  ;;  %10635 = vmatprep.subr.bf16.mxu0 %v12714_v3 }
 0x91e   : > { %10580 = vmatmul.mubr.bf16.gmra.mrb[236].mxu1 %v12985_v4  ;;  %10604 = vmatmul.mubr.bf16.gmra.mrb[228].mxu0 %v12988_v51 }
 0x91f   : > { %10612 = vmatpush3.bf16.msra.mxu1 %v12714_v3  ;;  %10636 = vmatpush3.bf16.msra.mxu0 %v12714_v3 }
 0x920   : > { %10613 = vmatprep.subr.bf16.mxu1 %v12711_v45  ;;  %10637 = vmatprep.subr.bf16.mxu0 %v12711_v45 }
 0x921   : > { %10623 = vmatprep.mubr.bf16.mxu1 %v12995_v23  ;;  %10647 = vmatprep.mubr.bf16.mxu0 %v12998_v13 }
 0x923   : > { %10614 = vmatpush3.bf16.msra.mxu1 %v12711_v45  ;;  %10638 = vmatpush3.bf16.msra.mxu0 %v12711_v45 }
 0x924   : > { %10615 = vmatprep.subr.bf16.mxu1 %v12734_v41  ;;  %10639 = vmatprep.subr.bf16.mxu0 %v12734_v41 }
 0x927   : > { %10616 = vmatpush3.bf16.msra.mxu1 %v12734_v41  ;;  %10640 = vmatpush3.bf16.msra.mxu0 %v12734_v41 }
 0x928   : > { %10617 = vmatprep.subr.bf16.mxu1 %v12731_v39  ;;  %10641 = vmatprep.subr.bf16.mxu0 %v12731_v39 }
 0x929   : > { %v10289_v30 = vpop.f32.mrb[184].mxu1  ;;  %v10313_v52 = vpop.f32.mrb[176].mxu0 }
 0x92a   : > { %v4808_v20 = vmax.f32 %v10289_v30, %v10313_v52  ;;  %v4677_v63 = vpop.f32.mrb[185].mxu1  ;;  %v4775_v38 = vpop.f32.mrb[177].mxu0 }
 0x92b   : > { %v4806_v40 = vmax.f32 %v4677_v63, %v4775_v38  ;;  %v10290_v26 = vpop.f32.mrb[186].mxu1  ;;  %v10314_v56 = vpop.f32.mrb[178].mxu0  ;;  %10618 = vmatpush3.bf16.msra.mxu1 %v12731_v39  ;;  %10642 = vmatpush3.bf16.msra.mxu0 %v12731_v39 }
 0x92c   : > { %v4809_v16 = vmax.f32 %v10290_v26, %v10314_v56  ;;  %v4680_v0 = vpop.f32.mrb[187].mxu1  ;;  %v4778_v19 = vpop.f32.mrb[179].mxu0  ;;  %10619 = vmatprep.subr.bf16.mxu1 %v12753_v18  ;;  %10643 = vmatprep.subr.bf16.mxu0 %v12753_v18 }
 0x92d   : > { %v4807_v55 = vmax.f32 %v4680_v0, %v4778_v19 }
 0x92f   : > { %10620 = vmatpush3.bf16.msra.mxu1 %v12753_v18  ;;  %10644 = vmatpush3.bf16.msra.mxu0 %v12753_v18 }
 0x930   : > { %10621 = vmatprep.subr.bf16.mxu1 %v12751_v12  ;;  %10645 = vmatprep.subr.bf16.mxu0 %v12751_v12 }
 0x931   : > { %v10293_v31 = vpop.f32.mrb[188].mxu1  ;;  %v10317_v1 = vpop.f32.mrb[180].mxu0 }
 0x932   : > { %v4812_v7 = vmax.f32 %v10293_v31, %v10317_v1  ;;  %v4693_v6 = vpop.f32.mrb[189].mxu1  ;;  %v4791_v27 = vpop.f32.mrb[181].mxu0 }
 0x933   : > { %10622 = vmatpush3.bf16.msra.mxu1 %v12751_v12  ;;  %10646 = vmatpush3.bf16.msra.mxu0 %v12751_v12  ;;  %v4810_v60 = vmax.f32 %v4693_v6, %v4791_v27  ;;  %v10294_v28 = vpop.f32.mrb[190].mxu1  ;;  %v10318_v44 = vpop.f32.mrb[182].mxu0 }
 0x934   : > { %v4813_v36 = vmax.f32 %v10294_v28, %v10318_v44  ;;  %v4696_v21 = vpop.f32.mrb[191].mxu1  ;;  %v4794_v9 = vpop.f32.mrb[183].mxu0 }
 0x935   : > { %v4811_v14 = vmax.f32 %v4696_v21, %v4794_v9 }
 0x936   : > { %10624 = vmatmul.mubr.bf16.vlgmr.msra.gmra.mrb[240].mxu1 %v13025_v58  ;;  %10648 = vmatmul.mubr.bf16.vlgmr.msra.gmra.mrb[232].mxu0 %v13028_v15 }
 0x937   : > { %10627 = vmatprep.mubr.bf16.mxu1 %v13035_v42  ;;  %10651 = vmatprep.mubr.bf16.mxu0 %v13038_v59 }
 0x93e   : > { %10628 = vmatmul.mubr.bf16.gmra.mrb[244].mxu1 %v13049_v47  ;;  %10652 = vmatmul.mubr.bf16.gmra.mrb[236].mxu0 %v13052_v53 }
 0x949   : > { %v10337_v22 = vpop.f32.mrb[192].mxu1  ;;  %v10361_v2 = vpop.f32.mrb[184].mxu0 }
 0x94a   : > { %v4914_v8 = vmax.f32 %v4808_v20, %v10337_v22  ;;  %v4881_v10 = vpop.f32.mrb[193].mxu1  ;;  %v4987_v48 = vpop.f32.mrb[185].mxu0 }
 0x94b   : > { %v4912_v37 = vmax.f32 %v4806_v40, %v4881_v10  ;;  %v10338_v33 = vpop.f32.mrb[194].mxu1  ;;  %v10362_v62 = vpop.f32.mrb[186].mxu0 }
 0x94c   : > { %v5020_v35 = vmax.f32 %v4914_v8, %v10361_v2  ;;  %v4915_v57 = vmax.f32 %v4809_v16, %v10338_v33  ;;  %v4884_v32 = vpop.f32.mrb[195].mxu1  ;;  %v4990_v61 = vpop.f32.mrb[187].mxu0 }
 0x94d   : > { %v5018_v25 = vmax.f32 %v4912_v37, %v4987_v48  ;;  %v4913_v54 = vmax.f32 %v4807_v55, %v4884_v32 }
 0x94e   : > { %v5021_v5 = vmax.f32 %v4915_v57, %v10362_v62 }
 0x94f   : > { %v5019_v17 = vmax.f32 %v4913_v54, %v4990_v61 }
 0x951   : > { %v10341_v43 = vpop.f32.mrb[196].mxu1  ;;  %v10365_v46 = vpop.f32.mrb[188].mxu0 }
 0x952   : > { %v4918_v29 = vmax.f32 %v4812_v7, %v10341_v43  ;;  %v4897_v34 = vpop.f32.mrb[197].mxu1  ;;  %v5003_v11 = vpop.f32.mrb[189].mxu0 }
 0x953   : > { %v4916_v49 = vmax.f32 %v4810_v60, %v4897_v34  ;;  %v10342_v4 = vpop.f32.mrb[198].mxu1  ;;  %v10366_v51 = vpop.f32.mrb[190].mxu0 }
 0x954   : > { %v4919_v23 = vmax.f32 %v4813_v36, %v10342_v4  ;;  %v5024_v13 = vmax.f32 %v4918_v29, %v10365_v46  ;;  %v4900_v58 = vpop.f32.mrb[199].mxu1  ;;  %v5006_v15 = vpop.f32.mrb[191].mxu0 }
 0x955   : > { %v4917_v42 = vmax.f32 %v4811_v14, %v4900_v58  ;;  %v5022_v59 = vmax.f32 %v4916_v49, %v5003_v11 }
 0x956   : > { %v5025_v47 = vmax.f32 %v4919_v23, %v10366_v51  ;;  %v11193_v23 = vld [vmem:[%s13631_s22 + $0x8] sm:$0xff]  }
 0x957   : > { %v5023_v53 = vmax.f32 %v4917_v42, %v5006_v15 }
 0x969   : > { %v10385_v30 = vpop.f32.mrb[200].mxu1  ;;  %v10409_v52 = vpop.f32.mrb[192].mxu0 }
 0x96a   : > { %v5126_v20 = vmax.f32 %v5020_v35, %v10385_v30  ;;  %v5093_v63 = vpop.f32.mrb[201].mxu1  ;;  %v5199_v38 = vpop.f32.mrb[193].mxu0  ;;  %v11192_v35 = vld [vmem:[%s13631_s22] sm:$0xff]  }
 0x96b   : > { %v5124_v40 = vmax.f32 %v5018_v25, %v5093_v63  ;;  %v10386_v26 = vpop.f32.mrb[202].mxu1  ;;  %v10410_v56 = vpop.f32.mrb[194].mxu0  ;;  %10655 = vmatprep.subr.bf16.mxu1 %v11192_v35 }
 0x96c   : > { %v5232_v16 = vmax.f32 %v5126_v20, %v10409_v52  ;;  %v5127_v0 = vmax.f32 %v5021_v5, %v10386_v26  ;;  %v5096_v19 = vpop.f32.mrb[203].mxu1  ;;  %v5202_v55 = vpop.f32.mrb[195].mxu0  ;;  %10656 = vmatpush3.bf16.msra.mxu1 %v11192_v35 }
 0x96d   : > { %v5230_v31 = vmax.f32 %v5124_v40, %v5199_v38  ;;  %v5125_v1 = vmax.f32 %v5019_v17, %v5096_v19  ;;  %10657 = vmatprep.subr.bf16.mxu1 %v11193_v23 }
 0x96e   : > { %v5233_v7 = vmax.f32 %v5127_v0, %v10410_v56 }
 0x96f   : > { %v5231_v6 = vmax.f32 %v5125_v1, %v5202_v55 }
 0x970   : > { %10658 = vmatpush3.bf16.msra.mxu1 %v11193_v23 }
 0x971   : > { %v10389_v27 = vpop.f32.mrb[204].mxu1  ;;  %v10413_v60 = vpop.f32.mrb[196].mxu0 }
 0x972   : > { %v5130_v28 = vmax.f32 %v5024_v13, %v10389_v27  ;;  %v5109_v44 = vpop.f32.mrb[205].mxu1  ;;  %v5215_v36 = vpop.f32.mrb[197].mxu0 }
 0x973   : > { %v5128_v21 = vmax.f32 %v5022_v59, %v5109_v44  ;;  %v10390_v9 = vpop.f32.mrb[206].mxu1  ;;  %v10414_v14 = vpop.f32.mrb[198].mxu0 }
 0x974   : > { %v5131_v22 = vmax.f32 %v5025_v47, %v10390_v9  ;;  %v5236_v2 = vmax.f32 %v5130_v28, %v10413_v60  ;;  %v5112_v8 = vpop.f32.mrb[207].mxu1  ;;  %v5218_v10 = vpop.f32.mrb[199].mxu0 }
 0x975   : > { %v5129_v48 = vmax.f32 %v5023_v53, %v5112_v8  ;;  %v5234_v37 = vmax.f32 %v5128_v21, %v5215_v36  ;;  %v11196_v8 = vld [vmem:[%s13633_s26] sm:$0xff]  }
 0x976   : > { %v5237_v33 = vmax.f32 %v5131_v22, %v10414_v14  ;;  %10679 = vmatprep.subr.bf16.mxu0 %v11196_v8 }
 0x977   : > { %v5235_v62 = vmax.f32 %v5129_v48, %v5218_v10  ;;  %v11197_v10 = vld [vmem:[%s13633_s26 + $0x8] sm:$0xff]   ;;  %10680 = vmatpush3.bf16.msra.mxu0 %v11196_v8 }
 0x978   : > { %10681 = vmatprep.subr.bf16.mxu0 %v11197_v10 }
 0x97b   : > { %10682 = vmatpush3.bf16.msra.mxu0 %v11197_v10 }
 0x989   : > { %v10433_v57 = vpop.f32.mrb[208].mxu1  ;;  %v10457_v32 = vpop.f32.mrb[200].mxu0 }
 0x98a   : > { %v5338_v61 = vmax.f32 %v5232_v16, %v10433_v57  ;;  %v5305_v25 = vpop.f32.mrb[209].mxu1  ;;  %v5411_v54 = vpop.f32.mrb[201].mxu0 }
 0x98b   : > { %v5336_v5 = vmax.f32 %v5230_v31, %v5305_v25  ;;  %v10434_v17 = vpop.f32.mrb[210].mxu1  ;;  %v10458_v43 = vpop.f32.mrb[202].mxu0 }
 0x98c   : > { %v5444_v46 = vmax.f32 %v5338_v61, %v10457_v32  ;;  %v5339_v29 = vmax.f32 %v5233_v7, %v10434_v17  ;;  %v5308_v34 = vpop.f32.mrb[211].mxu1  ;;  %v5414_v11 = vpop.f32.mrb[203].mxu0  ;;  %v13221_v7 = vld [vmem:[%s13632_s23] sm:$0xff]  }
 0x98d   : > { %v5442_v49 = vmax.f32 %v5336_v5, %v5411_v54  ;;  %v5337_v4 = vmax.f32 %v5231_v6, %v5308_v34  ;;  %10667 = vmatprep.subr.bf16.mxu1 %v13221_v7 }
 0x98e   : > { %v5445_v51 = vmax.f32 %v5339_v29, %v10458_v43 }
 0x98f   : > { %v5443_v13 = vmax.f32 %v5337_v4, %v5414_v11 }
 0x990   : > { %v13212_v58 = vpack.c.bf16 %v5445_v51, %v5444_v46 }
 0x991   : > { %v13214_v15 = vpack.c.bf16 %v5443_v13, %v5442_v49  ;;  %v10437_v42 = vpop.f32.mrb[212].mxu1  ;;  %v10461_v59 = vpop.f32.mrb[204].mxu0 }
 0x992   : > { %v5342_v47 = vmax.f32 %v5236_v2, %v10437_v42  ;;  %v5321_v53 = vpop.f32.mrb[213].mxu1  ;;  %v5427_v30 = vpop.f32.mrb[205].mxu0 }
 0x993   : > { %v5340_v52 = vmax.f32 %v5234_v37, %v5321_v53  ;;  %v10438_v20 = vpop.f32.mrb[214].mxu1  ;;  %v10462_v63 = vpop.f32.mrb[206].mxu0 }
 0x994   : > { %v5343_v38 = vmax.f32 %v5237_v33, %v10438_v20  ;;  %v5448_v40 = vmax.f32 %v5342_v47, %v10461_v59  ;;  %v5324_v26 = vpop.f32.mrb[215].mxu1  ;;  %v5430_v56 = vpop.f32.mrb[207].mxu0 }
 0x995   : > { %v5341_v16 = vmax.f32 %v5235_v62, %v5324_v26  ;;  %v5446_v0 = vmax.f32 %v5340_v52, %v5427_v30 }
 0x996   : > { %v5449_v19 = vmax.f32 %v5343_v38, %v10462_v63 }
 0x997   : > { %v5447_v55 = vmax.f32 %v5341_v16, %v5430_v56 }
 0x998   : > { %v13216_v31 = vpack.c.bf16 %v5449_v19, %v5448_v40 }
 0x999   : > { %v13218_v1 = vpack.c.bf16 %v5447_v55, %v5446_v0 }
 0x9a9   : > { %v10481_v6 = vpop.f32.mrb[216].mxu1  ;;  %v10505_v27 = vpop.f32.mrb[208].mxu0 }
 0x9aa   : > { %v5582_v60 = vmax.f32 %v10481_v6, %v10505_v27  ;;  %v5484_v28 = vpop.f32.mrb[217].mxu1  ;;  %v5549_v44 = vpop.f32.mrb[209].mxu0 }
 0x9ab   : > { %v5580_v36 = vmax.f32 %v5484_v28, %v5549_v44  ;;  %v10482_v21 = vpop.f32.mrb[218].mxu1  ;;  %v10506_v9 = vpop.f32.mrb[210].mxu0 }
 0x9ac   : > { %v5583_v14 = vmax.f32 %v10482_v21, %v10506_v9  ;;  %v5487_v22 = vpop.f32.mrb[219].mxu1  ;;  %v5552_v2 = vpop.f32.mrb[211].mxu0 }
 0x9ad   : > { %v5581_v48 = vmax.f32 %v5487_v22, %v5552_v2 }
 0x9b1   : > { %v10485_v37 = vpop.f32.mrb[220].mxu1  ;;  %v10509_v33 = vpop.f32.mrb[212].mxu0 }
 0x9b2   : > { %v5586_v62 = vmax.f32 %v10485_v37, %v10509_v33  ;;  %v5500_v35 = vpop.f32.mrb[221].mxu1  ;;  %v5565_v57 = vpop.f32.mrb[213].mxu0 }
 0x9b3   : > { %v5584_v32 = vmax.f32 %v5500_v35, %v5565_v57  ;;  %v10486_v61 = vpop.f32.mrb[222].mxu1  ;;  %v10510_v25 = vpop.f32.mrb[214].mxu0 }
 0x9b4   : > { %v5587_v54 = vmax.f32 %v10486_v61, %v10510_v25  ;;  %v5503_v5 = vpop.f32.mrb[223].mxu1  ;;  %v5568_v17 = vpop.f32.mrb[215].mxu0 }
 0x9b5   : > { %v5585_v43 = vmax.f32 %v5503_v5, %v5568_v17 }
 0x9c9   : > { %v10529_v46 = vpop.f32.mrb[224].mxu1  ;;  %v10553_v29 = vpop.f32.mrb[216].mxu0 }
 0x9ca   : > { %v5655_v34 = vmax.f32 %v5582_v60, %v10529_v46  ;;  %v5622_v11 = vpop.f32.mrb[225].mxu1  ;;  %v5695_v49 = vpop.f32.mrb[217].mxu0 }
 0x9cb   : > { %v5653_v4 = vmax.f32 %v5580_v36, %v5622_v11  ;;  %v10530_v51 = vpop.f32.mrb[226].mxu1  ;;  %v10554_v23 = vpop.f32.mrb[218].mxu0 }
 0x9cc   : > { %v5728_v13 = vmax.f32 %v5655_v34, %v10553_v29  ;;  %v5656_v42 = vmax.f32 %v5583_v14, %v10530_v51  ;;  %v5625_v59 = vpop.f32.mrb[227].mxu1  ;;  %v5698_v47 = vpop.f32.mrb[219].mxu0 }
 0x9cd   : > { %v5726_v53 = vmax.f32 %v5653_v4, %v5695_v49  ;;  %v5654_v30 = vmax.f32 %v5581_v48, %v5625_v59 }
 0x9ce   : > { %v5729_v52 = vmax.f32 %v5656_v42, %v10554_v23 }
 0x9cf   : > { %v5727_v20 = vmax.f32 %v5654_v30, %v5698_v47 }
 0x9d1   : > { %v10533_v63 = vpop.f32.mrb[228].mxu1  ;;  %v10557_v38 = vpop.f32.mrb[220].mxu0 }
 0x9d2   : > { %v5659_v40 = vmax.f32 %v5586_v62, %v10533_v63  ;;  %v5638_v26 = vpop.f32.mrb[229].mxu1  ;;  %v5711_v56 = vpop.f32.mrb[221].mxu0 }
 0x9d3   : > { %v5657_v16 = vmax.f32 %v5584_v32, %v5638_v26  ;;  %v10534_v0 = vpop.f32.mrb[230].mxu1  ;;  %v10558_v19 = vpop.f32.mrb[222].mxu0 }
 0x9d4   : > { %v5660_v55 = vmax.f32 %v5587_v54, %v10534_v0  ;;  %v5732_v6 = vmax.f32 %v5659_v40, %v10557_v38  ;;  %v5641_v27 = vpop.f32.mrb[231].mxu1  ;;  %v5714_v60 = vpop.f32.mrb[223].mxu0 }
 0x9d5   : > { %v5658_v28 = vmax.f32 %v5585_v43, %v5641_v27  ;;  %v5730_v44 = vmax.f32 %v5657_v16, %v5711_v56 }
 0x9d6   : > { %v5733_v36 = vmax.f32 %v5660_v55, %v10558_v19 }
 0x9d7   : > { %v5731_v21 = vmax.f32 %v5658_v28, %v5714_v60 }
 0x9e9   : > { %v10577_v9 = vpop.f32.mrb[232].mxu1  ;;  %v10601_v14 = vpop.f32.mrb[224].mxu0 }
 0x9ea   : > { %v5801_v22 = vmax.f32 %v5728_v13, %v10577_v9  ;;  %v5768_v2 = vpop.f32.mrb[233].mxu1  ;;  %v5841_v8 = vpop.f32.mrb[225].mxu0 }
 0x9eb   : > { %v5799_v10 = vmax.f32 %v5726_v53, %v5768_v2  ;;  %v10578_v48 = vpop.f32.mrb[234].mxu1  ;;  %v10602_v37 = vpop.f32.mrb[226].mxu0 }
 0x9ec   : > { %v5874_v33 = vmax.f32 %v5801_v22, %v10601_v14  ;;  %v5802_v62 = vmax.f32 %v5729_v52, %v10578_v48  ;;  %v5771_v35 = vpop.f32.mrb[235].mxu1  ;;  %v5844_v57 = vpop.f32.mrb[227].mxu0 }
 0x9ed   : > { %v5872_v32 = vmax.f32 %v5799_v10, %v5841_v8  ;;  %v5800_v61 = vmax.f32 %v5727_v20, %v5771_v35  ;;  %v11195_v8 = vld [vmem:[%s13632_s23 + $0x8] sm:$0xff]  }
 0x9ee   : > { %v5875_v25 = vmax.f32 %v5802_v62, %v10602_v37 }
 0x9ef   : > { %v5873_v54 = vmax.f32 %v5800_v61, %v5844_v57 }
 0x9f1   : > { %v10581_v5 = vpop.f32.mrb[236].mxu1  ;;  %v10605_v17 = vpop.f32.mrb[228].mxu0 }
 0x9f2   : > { %v5805_v43 = vmax.f32 %v5732_v6, %v10581_v5  ;;  %v5784_v46 = vpop.f32.mrb[237].mxu1  ;;  %v5857_v29 = vpop.f32.mrb[229].mxu0 }
 0x9f3   : > { %v5803_v34 = vmax.f32 %v5730_v44, %v5784_v46  ;;  %v10582_v11 = vpop.f32.mrb[238].mxu1  ;;  %v10606_v49 = vpop.f32.mrb[230].mxu0  ;;  %v8749_v46 = vld [vmem:[%s13634_s28] ss:$0 sm:$0xff]  ;;  %s13641_s28 = sld [smem:[#allocation4_spill]] }
 0x9f4   : > { %v5806_v4 = vmax.f32 %v5733_v36, %v10582_v11  ;;  %v5878_v51 = vmax.f32 %v5805_v43, %v10605_v17  ;;  %v5787_v23 = vpop.f32.mrb[239].mxu1  ;;  %v5860_v13 = vpop.f32.mrb[231].mxu0  ;;  %v11199_v43 = vld [vmem:[%s13633_s26 + $0x18] sm:$0xff]  }
 0x9f5   : > { %v5804_v42 = vmax.f32 %v5731_v21, %v5787_v23  ;;  %v5876_v59 = vmax.f32 %v5803_v34, %v5857_v29  ;;  %v8756_v29 = vld [vmem:[%s13635_s7] ss:$0 sm:$0xff]  ;;  %s13642_s7 = sld [smem:[#allocation2_spill]] }
 0x9f6   : > { %v5879_v47 = vmax.f32 %v5806_v4, %v10606_v49  ;;  %v10995_v34 = vadd.f32 %v8756_v29, %v8749_v46 }
 0x9f7   : > { %v5877_v53 = vmax.f32 %v5804_v42, %v5860_v13 }
 0xa09   : > { %v10625_v30 = vpop.f32.mrb[240].mxu1  ;;  %v10649_v52 = vpop.f32.mrb[232].mxu0 }
 0xa0a   : > { %v5947_v20 = vmax.f32 %v5874_v33, %v10625_v30  ;;  %v5914_v63 = vpop.f32.mrb[241].mxu1  ;;  %v5987_v38 = vpop.f32.mrb[233].mxu0 }
 0xa0b   : > { %v5945_v40 = vmax.f32 %v5872_v32, %v5914_v63  ;;  %v10626_v26 = vpop.f32.mrb[242].mxu1  ;;  %v10650_v56 = vpop.f32.mrb[234].mxu0 }
 0xa0c   : > { %v6020_v16 = vmax.f32 %v5947_v20, %v10649_v52  ;;  %v5948_v0 = vmax.f32 %v5875_v25, %v10626_v26  ;;  %v5917_v19 = vpop.f32.mrb[243].mxu1  ;;  %v5990_v55 = vpop.f32.mrb[235].mxu0 }
 0xa0d   : > { %v6018_v6 = vmax.f32 %v5945_v40, %v5987_v38  ;;  %v5946_v27 = vmax.f32 %v5873_v54, %v5917_v19 }
 0xa0e   : > { %v6021_v60 = vmax.f32 %v5948_v0, %v10650_v56 }
 0xa0f   : > { %v6019_v28 = vmax.f32 %v5946_v27, %v5990_v55 }
 0xa10   : > { %v6031_v44 = vpack.c.bf16 %v6021_v60, %v6020_v16 }
 0xa11   : > { %v6030_v36 = vpack.c.bf16 %v6019_v28, %v6018_v6  ;;  %v10629_v21 = vpop.f32.mrb[244].mxu1  ;;  %v10653_v9 = vpop.f32.mrb[236].mxu0 }
 0xa12   : > { %v5951_v14 = vmax.f32 %v5878_v51, %v10629_v21  ;;  %v5930_v22 = vpop.f32.mrb[245].mxu1  ;;  %v6003_v2 = vpop.f32.mrb[237].mxu0  ;;  %v8763_v21 = vld [vmem:[%s13636_s10] ss:$0 sm:$0xff]  ;;  %s8969_s10 = sshll.u32 %s13644_s16, 7 }
 0xa13   : > { %v5949_v10 = vmax.f32 %v5876_v59, %v5930_v22  ;;  %v10630_v48 = vpop.f32.mrb[246].mxu1  ;;  %v10654_v37 = vpop.f32.mrb[238].mxu0  ;;  %10659 = vmatprep.mubr.msk.bf16.mxu1 %vm3225_vm3, %v6030_v36  ;;  %v11201_v36 = vld [vmem:[%s11570_s1 + $0x20] sm:$0xff]  }
 0xa14   : > { %v6024_v33 = vmax.f32 %v5951_v14, %v10653_v9  ;;  %v5952_v62 = vmax.f32 %v5879_v47, %v10630_v48  ;;  %v5933_v35 = vpop.f32.mrb[247].mxu1  ;;  %v6006_v57 = vpop.f32.mrb[239].mxu0  ;;  %10660 = vmatmul.mubr.msk.bf16.vlgmr.msra.gmra.mrb[248].mxu1 %vm3225_vm3, %v6031_v44  ;;  %v11200_v44 = vld [vmem:[%s11570_s1] sm:$0xff]  }
 0xa15   : > { %v6022_v32 = vmax.f32 %v5949_v10, %v6003_v2  ;;  %v5950_v61 = vmax.f32 %v5877_v53, %v5933_v35  ;;  %10668 = vmatpush3.bf16.msra.mxu1 %v13221_v7  ;;  %v11198_v7 = vld [vmem:[%s13633_s26 + $0x10] sm:$0xff]  }
 0xa16   : > { %v6025_v25 = vmax.f32 %v5952_v62, %v10654_v37  ;;  %10669 = vmatprep.subr.bf16.mxu1 %v11195_v8  ;;  %10683 = vmatprep.subr.bf16.mxu0 %v11198_v7 }
 0xa17   : > { %v6023_v54 = vmax.f32 %v5950_v61, %v6006_v57  ;;  %10684 = vmatpush3.bf16.msra.mxu0 %v11198_v7 }
 0xa18   : > { %v6033_v5 = vpack.c.bf16 %v6025_v25, %v6024_v33  ;;  %10685 = vmatprep.subr.bf16.mxu0 %v11199_v43 }
 0xa19   : > { %v6032_v17 = vpack.c.bf16 %v6023_v54, %v6022_v32  ;;  %10670 = vmatpush3.bf16.msra.mxu1 %v11195_v8 }
 0xa1b   : > { %10663 = vmatprep.mubr.msk.bf16.mxu1 %vm3225_vm3, %v6032_v17  ;;  %10686 = vmatpush3.bf16.msra.mxu0 %v11199_v43 }
 0xa1c   : > { %10664 = vmatmul.mubr.msk.bf16.gmra.mrb[252].mxu1 %vm3225_vm3, %v6033_v5 }
 0xa1d   : > { %10671 = vmatprep.mubr.msk.bf16.mxu1 %vm3225_vm3, %v13214_v15 }
 0xa24   : > { %10672 = vmatmul.mubr.msk.bf16.vlgmr.msra.gmra.mrb[248].mxu1 %vm3225_vm3, %v13212_v58 }
 0xa25   : > { %10675 = vmatprep.mubr.msk.bf16.mxu1 %vm3225_vm3, %v13218_v1 }
 0xa2c   : > { %10676 = vmatmul.mubr.msk.bf16.gmra.mrb[252].mxu1 %vm3225_vm3, %v13216_v31 }
 0xa2d   : > { %10703 = vmatprep.mubr.msk.bf16.mxu1 %vm6293_vm4, %v11200_v44  ;;  %v11211_v44 = vld [vmem:[%s11570_s1 + $0x68] sm:$0xff]  }
 0xaf7   : > { %v10673_v11 = vpop.f32.mrb[248].mxu1 }
 0xaf8   : > { %v10989_v15 = vadd.f32 %v10673_v11, %v8749_v46  ;;  %v6203_v49 = vpop.f32.mrb[249].mxu1 }
 0xaf9   : > { %v10991_v4 = vadd.f32 %v8749_v46, %v6203_v49  ;;  %v10674_v58 = vpop.f32.mrb[250].mxu1 }
 0xafa   : > { %v13244_v51 = vadd.f32 %v10989_v15, %v8756_v29  ;;  %v13246_v1 = vadd.f32 %v10995_v34, %v10674_v58  ;;  %v6206_v23 = vpop.f32.mrb[251].mxu1 }
 0xafb   : > { %v13248_v31 = vadd.f32 %v10991_v4, %v8756_v29  ;;  %v13250_v13 = vadd.f32 %v10995_v34, %v6206_v23  ;;  %v11202_v23 = vld [vmem:[%s11570_s1 + $0x8] sm:$0xff]  }
 0xafc   : > { %v6244_v42 = vmax.f32 %v13244_v51, 0.0  ;;  %v6245_v59 = vmax.f32 %v13246_v1, 0.0 }
 0xafd   : > { %v6242_v47 = vmax.f32 %v13248_v31, 0.0  ;;  %v6243_v53 = vmax.f32 %v13250_v13, 0.0 }
 0xafe   : > { %v6259_v20 = vpack.c.bf16 %v6245_v59, %v6244_v42 }
 0xaff   : > { %v6258_v30 = vpack.c.bf16 %v6243_v53, %v6242_v47  ;;  %v10677_v52 = vpop.f32.mrb[252].mxu1 }
 0xb00   : > { %v6219_v63 = vpop.f32.mrb[253].mxu1  ;;  %v13267_v26 = vadd.f32 %v10995_v34, %v10677_v52  ;;  %v11204_v52 = vld [vmem:[%s11570_s1 + $0x10] sm:$0xff]  }
 0xb01   : > { %v13264_v38 = vadd.f32 %v10995_v34, %v6219_v63  ;;  %v10678_v40 = vpop.f32.mrb[254].mxu1  ;;  %10687 = vmatprep.mubr.msk.bf16.mxu0 %vm6293_vm4, %v6258_v30  ;;  %v11203_v30 = vld [vmem:[%s11570_s1 + $0x28] sm:$0xff]   ;;  %v11206_v63 = vld [vmem:[%s11570_s1 + $0x18] sm:$0xff]  }
 0xb02   : > { %v13269_v56 = vadd.f32 %v10995_v34, %v10678_v40  ;;  %v6222_v16 = vpop.f32.mrb[255].mxu1  ;;  %10688 = vmatmul.mubr.msk.bf16.vlgmr.msra.gmra.mrb[240].mxu0 %vm6293_vm4, %v6259_v20  ;;  %v6248_v27 = vmax.f32 %v13267_v26, 0.0  ;;  %v11205_v20 = vld [vmem:[%s11570_s1 + $0x30] sm:$0xff]   ;;  %v11207_v40 = vld [vmem:[%s11570_s1 + $0x38] sm:$0xff]  }
 0xb03   : > { %v13272_v0 = vadd.f32 %v10995_v34, %v6222_v16  ;;  %v6246_v55 = vmax.f32 %v13264_v38, 0.0  ;;  %v11208_v16 = vld [vmem:[%s11570_s1 + $0x40] sm:$0xff]  }
 0xb04   : > { %v6249_v19 = vmax.f32 %v13269_v56, 0.0  ;;  %v11235_v56 = vld [vmem:[%s11574_s2 + $0x8] sm:$0xff]  }
 0xb05   : > { %v6247_v6 = vmax.f32 %v13272_v0, 0.0  ;;  %v11236_v0 = vld [vmem:[%s11574_s2 + $0x10] sm:$0xff]  }
 0xb06   : > { %v6261_v28 = vpack.c.bf16 %v6249_v19, %v6248_v27 }
 0xb07   : > { %v6260_v60 = vpack.c.bf16 %v6247_v6, %v6246_v55 }
 0xb09   : > { %10691 = vmatprep.mubr.msk.bf16.mxu0 %vm6293_vm4, %v6260_v60  ;;  %v11209_v60 = vld [vmem:[%s11570_s1 + $0x60] sm:$0xff]  }
 0xb0a   : > { %10692 = vmatmul.mubr.msk.bf16.gmra.mrb[244].mxu0 %vm6293_vm4, %v6261_v28  ;;  %v11210_v28 = vld [vmem:[%s11570_s1 + $0x48] sm:$0xff]  }
 0xb0b   : > { %10719 = vmatprep.mubr.msk.bf16.mxu0 %vm6293_vm4, %v11201_v36  ;;  %v11212_v36 = vld [vmem:[%s11570_s1 + $0x50] sm:$0xff]  }
 0xbd5   : > { %v10689_v9 = vpop.f32.mrb[240].mxu0 }
 0xbd6   : > { %v6349_v14 = vadd.f32 %v10689_v9, %v8763_v21  ;;  %v6340_v22 = vpop.f32.mrb[241].mxu0  ;;  %v11214_v9 = vld [vmem:[%s11570_s1 + $0x58] sm:$0xff]  }
 0xbd7   : > { %v6341_v2 = vadd.f32 %v8763_v21, %v6340_v22  ;;  %v10690_v8 = vpop.f32.mrb[242].mxu0  ;;  %v11216_v22 = vld [vmem:[%s11570_s1 + $0x80] sm:$0xff]  }
 0xbd8   : > { %v6352_v10 = vadd.f32 %v10690_v8, %v8763_v21  ;;  %v6343_v48 = vpop.f32.mrb[243].mxu0  ;;  %v6373_v33 = vmax.f32 %v6349_v14, 0.0  ;;  %v11215_v14 = vld [vmem:[%s11570_s1 + $0x78] sm:$0xff]   ;;  %v11218_v8 = vld [vmem:[%s11570_s1 + $0x88] sm:$0xff]  }
 0xbd9   : > { %v6344_v37 = vadd.f32 %v8763_v21, %v6343_v48  ;;  %v6371_v35 = vmax.f32 %v6341_v2, 0.0  ;;  %v11217_v2 = vld [vmem:[%s11570_s1 + $0xa0] sm:$0xff]   ;;  %v11220_v48 = vld [vmem:[%s11570_s1 + $0x90] sm:$0xff]  }
 0xbda   : > { %v6374_v62 = vmax.f32 %v6352_v10, 0.0  ;;  %v11219_v10 = vld [vmem:[%s11570_s1 + $0xa8] sm:$0xff]  }
 0xbdb   : > { %v6372_v57 = vmax.f32 %v6344_v37, 0.0  ;;  %v11221_v37 = vld [vmem:[%s11570_s1 + $0xb0] sm:$0xff]  }
 0xbdc   : > { %v13293_v32 = vpack.c.bf16 %v6374_v62, %v6373_v33  ;;  %v11222_v33 = vld [vmem:[%s11570_s1 + $0x98] sm:$0xff]  }
 0xbdd   : > { %v13295_v61 = vpack.c.bf16 %v6372_v57, %v6371_v35  ;;  %v10693_v25 = vpop.f32.mrb[244].mxu0  ;;  %v11223_v62 = vld [vmem:[%s11570_s1 + $0xb8] sm:$0xff]   ;;  %v11224_v35 = vld [vmem:[%s11570_s1 + $0xc0] sm:$0xff]  }
 0xbde   : > { %v6365_v54 = vadd.f32 %v10693_v25, %v8763_v21  ;;  %v6356_v5 = vpop.f32.mrb[245].mxu0  ;;  %v11225_v57 = vld [vmem:[%s11570_s1 + $0xe0] sm:$0xff]   ;;  %v11228_v25 = vld [vmem:[%s11570_s1 + $0xd0] sm:$0xff]  }
 0xbdf   : > { %v6357_v17 = vadd.f32 %v8763_v21, %v6356_v5  ;;  %v10694_v7 = vpop.f32.mrb[246].mxu0  ;;  %10695 = vmatprep.subr.bf16.mxu1 %v13295_v61  ;;  %10711 = vmatprep.subr.bf16.mxu0 %v13295_v61  ;;  %v11230_v5 = vld [vmem:[%s11570_s1 + $0xd8] sm:$0xff]  }
 0xbe0   : > { %v6368_v43 = vadd.f32 %v10694_v7, %v8763_v21  ;;  %v6359_v46 = vpop.f32.mrb[247].mxu0  ;;  %10696 = vmatpush3.bf16.msra.mxu1 %v13295_v61  ;;  %10712 = vmatpush3.bf16.msra.mxu0 %v13295_v61  ;;  %v6377_v34 = vmax.f32 %v6365_v54, 0.0  ;;  %v11229_v54 = vld [vmem:[%s11570_s1 + $0xf0] sm:$0xff]   ;;  %v11232_v7 = vld [vmem:[%s13637_s0] sm:$0xff]  }
 0xbe1   : > { %v6360_v29 = vadd.f32 %v8763_v21, %v6359_v46  ;;  %10697 = vmatprep.subr.bf16.mxu1 %v13293_v32  ;;  %10713 = vmatprep.subr.bf16.mxu0 %v13293_v32  ;;  %v6375_v15 = vmax.f32 %v6357_v17, 0.0  ;;  %v11213_v21 = vld [vmem:[%s11570_s1 + $0x70] sm:$0xff]   ;;  %v11231_v17 = vld [vmem:[%s11570_s1 + $0xf8] sm:$0xff]  }
 0xbe2   : > { %v6378_v11 = vmax.f32 %v6368_v43, 0.0  ;;  %v11233_v43 = vld [vmem:[%s13637_s0 + $0x8] sm:$0xff]  }
 0xbe3   : > { %v6376_v49 = vmax.f32 %v6360_v29, 0.0 }
 0xbe4   : > { %v13303_v4 = vpack.c.bf16 %v6378_v11, %v6377_v34  ;;  %10698 = vmatpush3.bf16.msra.mxu1 %v13293_v32  ;;  %10714 = vmatpush3.bf16.msra.mxu0 %v13293_v32 }
 0xbe5   : > { %v13307_v58 = vpack.c.bf16 %v6376_v49, %v6375_v15 }
 0xbe7   : > { %10699 = vmatprep.subr.bf16.mxu1 %v13307_v58  ;;  %10715 = vmatprep.subr.bf16.mxu0 %v13307_v58 }
 0xbe8   : > { %10700 = vmatpush3.bf16.msra.mxu1 %v13307_v58  ;;  %10716 = vmatpush3.bf16.msra.mxu0 %v13307_v58 }
 0xbe9   : > { %10701 = vmatprep.subr.bf16.mxu1 %v13303_v4  ;;  %10717 = vmatprep.subr.bf16.mxu0 %v13303_v4 }
 0xbec   : > { %10702 = vmatpush3.bf16.msra.mxu1 %v13303_v4  ;;  %10718 = vmatpush3.bf16.msra.mxu0 %v13303_v4 }
 0xbed   : > { %10727 = vmatprep.subr.bf16.mxu1 %v13295_v61  ;;  %10743 = vmatprep.subr.bf16.mxu0 %v13295_v61 }
 0xbef   : > { %10704 = vmatmul.mubr.msk.bf16.vlgmr.msra.gmra.mrb[0].mxu1 %vm6293_vm4, %v11202_v23  ;;  %10720 = vmatmul.mubr.msk.bf16.vlgmr.msra.gmra.mrb[248].mxu0 %vm6293_vm4, %v11203_v30 }
 0xbf0   : > { %10728 = vmatpush3.bf16.msra.mxu1 %v13295_v61  ;;  %10744 = vmatpush3.bf16.msra.mxu0 %v13295_v61 }
 0xbf1   : > { %10729 = vmatprep.subr.bf16.mxu1 %v13293_v32  ;;  %10745 = vmatprep.subr.bf16.mxu0 %v13293_v32 }
 0xbf2   : > { %10707 = vmatprep.mubr.msk.bf16.mxu1 %vm6293_vm4, %v11204_v52  ;;  %10723 = vmatprep.mubr.msk.bf16.mxu0 %vm6293_vm4, %v11205_v20 }
 0xbf4   : > { %10730 = vmatpush3.bf16.msra.mxu1 %v13293_v32  ;;  %10746 = vmatpush3.bf16.msra.mxu0 %v13293_v32 }
 0xbf5   : > { %10731 = vmatprep.subr.bf16.mxu1 %v13307_v58  ;;  %10747 = vmatprep.subr.bf16.mxu0 %v13307_v58 }
 0xbf7   : > { %10708 = vmatmul.mubr.msk.bf16.gmra.mrb[4].mxu1 %vm6293_vm4, %v11206_v63  ;;  %10724 = vmatmul.mubr.msk.bf16.gmra.mrb[252].mxu0 %vm6293_vm4, %v11207_v40 }
 0xbf8   : > { %10732 = vmatpush3.bf16.msra.mxu1 %v13307_v58  ;;  %10748 = vmatpush3.bf16.msra.mxu0 %v13307_v58 }
 0xbf9   : > { %10733 = vmatprep.subr.bf16.mxu1 %v13303_v4  ;;  %10749 = vmatprep.subr.bf16.mxu0 %v13303_v4 }
 0xbfa   : > { %10735 = vmatprep.mubr.msk.bf16.mxu1 %vm6293_vm4, %v11208_v16  ;;  %10751 = vmatprep.mubr.msk.bf16.mxu0 %vm6293_vm4, %v11209_v60 }
 0xbfc   : > { %10734 = vmatpush3.bf16.msra.mxu1 %v13303_v4  ;;  %10750 = vmatpush3.bf16.msra.mxu0 %v13303_v4 }
 0xbfd   : > { %10759 = vmatprep.subr.bf16.mxu1 %v13295_v61  ;;  %10775 = vmatprep.subr.bf16.mxu0 %v13295_v61 }
 0xbff   : > { %10736 = vmatmul.mubr.msk.bf16.vlgmr.msra.gmra.mrb[8].mxu1 %vm6293_vm4, %v11210_v28  ;;  %10752 = vmatmul.mubr.msk.bf16.vlgmr.msra.gmra.mrb[0].mxu0 %vm6293_vm4, %v11211_v44 }
 0xc00   : > { %10760 = vmatpush3.bf16.msra.mxu1 %v13295_v61  ;;  %10776 = vmatpush3.bf16.msra.mxu0 %v13295_v61 }
 0xc01   : > { %10761 = vmatprep.subr.bf16.mxu1 %v13293_v32  ;;  %10777 = vmatprep.subr.bf16.mxu0 %v13293_v32 }
 0xc02   : > { %10739 = vmatprep.mubr.msk.bf16.mxu1 %vm6293_vm4, %v11212_v36  ;;  %10755 = vmatprep.mubr.msk.bf16.mxu0 %vm6293_vm4, %v11213_v21 }
 0xc04   : > { %10762 = vmatpush3.bf16.msra.mxu1 %v13293_v32  ;;  %10778 = vmatpush3.bf16.msra.mxu0 %v13293_v32 }
 0xc05   : > { %10763 = vmatprep.subr.bf16.mxu1 %v13307_v58  ;;  %10779 = vmatprep.subr.bf16.mxu0 %v13307_v58 }
 0xc07   : > { %10740 = vmatmul.mubr.msk.bf16.gmra.mrb[12].mxu1 %vm6293_vm4, %v11214_v9  ;;  %10756 = vmatmul.mubr.msk.bf16.gmra.mrb[4].mxu0 %vm6293_vm4, %v11215_v14 }
 0xc08   : > { %10764 = vmatpush3.bf16.msra.mxu1 %v13307_v58  ;;  %10780 = vmatpush3.bf16.msra.mxu0 %v13307_v58 }
 0xc09   : > { %10765 = vmatprep.subr.bf16.mxu1 %v13303_v4  ;;  %10781 = vmatprep.subr.bf16.mxu0 %v13303_v4 }
 0xc0a   : > { %10767 = vmatprep.mubr.msk.bf16.mxu1 %vm6293_vm4, %v11216_v22  ;;  %10783 = vmatprep.mubr.msk.bf16.mxu0 %vm6293_vm4, %v11217_v2 }
 0xc0c   : > { %10766 = vmatpush3.bf16.msra.mxu1 %v13303_v4  ;;  %10782 = vmatpush3.bf16.msra.mxu0 %v13303_v4 }
 0xc0d   : > { %10791 = vmatprep.subr.bf16.mxu1 %v13295_v61  ;;  %10807 = vmatprep.subr.bf16.mxu0 %v13295_v61 }
 0xc0f   : > { %10768 = vmatmul.mubr.msk.bf16.vlgmr.msra.gmra.mrb[16].mxu1 %vm6293_vm4, %v11218_v8  ;;  %10784 = vmatmul.mubr.msk.bf16.vlgmr.msra.gmra.mrb[8].mxu0 %vm6293_vm4, %v11219_v10 }
 0xc10   : > { %10792 = vmatpush3.bf16.msra.mxu1 %v13295_v61  ;;  %10808 = vmatpush3.bf16.msra.mxu0 %v13295_v61  ;;  %v11227_v61 = vld [vmem:[%s11570_s1 + $0xe8] sm:$0xff]  }
 0xc11   : > { %10793 = vmatprep.subr.bf16.mxu1 %v13293_v32  ;;  %10809 = vmatprep.subr.bf16.mxu0 %v13293_v32 }
 0xc12   : > { %10771 = vmatprep.mubr.msk.bf16.mxu1 %vm6293_vm4, %v11220_v48  ;;  %10787 = vmatprep.mubr.msk.bf16.mxu0 %vm6293_vm4, %v11221_v37 }
 0xc14   : > { %10794 = vmatpush3.bf16.msra.mxu1 %v13293_v32  ;;  %10810 = vmatpush3.bf16.msra.mxu0 %v13293_v32  ;;  %v11226_v32 = vld [vmem:[%s11570_s1 + $0xc8] sm:$0xff]   ;;  %s13638_s1 = sld [smem:[#allocation17_spill]] }
 0xc15   : > { %10795 = vmatprep.subr.bf16.mxu1 %v13307_v58  ;;  %10811 = vmatprep.subr.bf16.mxu0 %v13307_v58 }
 0xc17   : > { %10772 = vmatmul.mubr.msk.bf16.gmra.mrb[20].mxu1 %vm6293_vm4, %v11222_v33  ;;  %10788 = vmatmul.mubr.msk.bf16.gmra.mrb[12].mxu0 %vm6293_vm4, %v11223_v62 }
 0xc18   : > { %10796 = vmatpush3.bf16.msra.mxu1 %v13307_v58  ;;  %10812 = vmatpush3.bf16.msra.mxu0 %v13307_v58 }
 0xc19   : > { %10797 = vmatprep.subr.bf16.mxu1 %v13303_v4  ;;  %10813 = vmatprep.subr.bf16.mxu0 %v13303_v4 }
 0xc1a   : > { %10799 = vmatprep.mubr.msk.bf16.mxu1 %vm6293_vm4, %v11224_v35  ;;  %10815 = vmatprep.mubr.msk.bf16.mxu0 %vm6293_vm4, %v11225_v57 }
 0xc1c   : > { %10798 = vmatpush3.bf16.msra.mxu1 %v13303_v4  ;;  %10814 = vmatpush3.bf16.msra.mxu0 %v13303_v4 }
 0xc1d   : > { %10823 = vmatprep.subr.bf16.mxu1 %v11232_v7 }
 0xc1f   : > { %10800 = vmatmul.mubr.msk.bf16.vlgmr.msra.gmra.mrb[24].mxu1 %vm6293_vm4, %v11226_v32  ;;  %10816 = vmatmul.mubr.msk.bf16.vlgmr.msra.gmra.mrb[16].mxu0 %vm6293_vm4, %v11227_v61 }
 0xc20   : > { %10803 = vmatprep.mubr.msk.bf16.mxu1 %vm6293_vm4, %v11228_v25  ;;  %10819 = vmatprep.mubr.msk.bf16.mxu0 %vm6293_vm4, %v11229_v54 }
 0xc21   : > { %10824 = vmatpush3.bf16.msra.mxu1 %v11232_v7 }
 0xc22   : > { %10825 = vmatprep.subr.bf16.mxu1 %v11233_v43 }
 0xc25   : > { %10826 = vmatpush3.bf16.msra.mxu1 %v11233_v43 }
 0xc27   : > { %10804 = vmatmul.mubr.msk.bf16.gmra.mrb[28].mxu1 %vm6293_vm4, %v11230_v5  ;;  %10820 = vmatmul.mubr.msk.bf16.gmra.mrb[20].mxu0 %vm6293_vm4, %v11231_v17 }
 0xcc2   : > { %v10705_v46 = vpop.f32.mrb[0].mxu1  ;;  %v10721_v29 = vpop.f32.mrb[248].mxu0 }
 0xcc3   : > { %v6596_v34 = vmax.f32 %v10705_v46, %v10721_v29  ;;  %v6457_v11 = vpop.f32.mrb[1].mxu1  ;;  %v6563_v15 = vpop.f32.mrb[249].mxu0 }
 0xcc4   : > { %v6594_v49 = vmax.f32 %v6457_v11, %v6563_v15  ;;  %v10706_v4 = vpop.f32.mrb[2].mxu1  ;;  %v10722_v58 = vpop.f32.mrb[250].mxu0 }
 0xcc5   : > { %v6597_v23 = vmax.f32 %v10706_v4, %v10722_v58  ;;  %v6460_v30 = vpop.f32.mrb[3].mxu1  ;;  %v6566_v52 = vpop.f32.mrb[251].mxu0 }
 0xcc6   : > { %v6595_v20 = vmax.f32 %v6460_v30, %v6566_v52 }
 0xcca   : > { %v10709_v63 = vpop.f32.mrb[4].mxu1  ;;  %v10725_v40 = vpop.f32.mrb[252].mxu0 }
 0xccb   : > { %v6600_v16 = vmax.f32 %v10709_v63, %v10725_v40  ;;  %v6473_v60 = vpop.f32.mrb[5].mxu1  ;;  %v6579_v28 = vpop.f32.mrb[253].mxu0 }
 0xccc   : > { %v6598_v44 = vmax.f32 %v6473_v60, %v6579_v28  ;;  %v10710_v36 = vpop.f32.mrb[6].mxu1  ;;  %v10726_v21 = vpop.f32.mrb[254].mxu0 }
 0xccd   : > { %v6601_v9 = vmax.f32 %v10710_v36, %v10726_v21  ;;  %v6476_v14 = vpop.f32.mrb[7].mxu1  ;;  %v6582_v22 = vpop.f32.mrb[255].mxu0 }
 0xcce   : > { %v6599_v2 = vmax.f32 %v6476_v14, %v6582_v22 }
 0xcd2   : > { %v10737_v8 = vpop.f32.mrb[8].mxu1  ;;  %v10753_v10 = vpop.f32.mrb[0].mxu0 }
 0xcd3   : > { %v6710_v48 = vmax.f32 %v6596_v34, %v10737_v8  ;;  %v6677_v37 = vpop.f32.mrb[9].mxu1  ;;  %v6791_v33 = vpop.f32.mrb[1].mxu0 }
 0xcd4   : > { %v6708_v62 = vmax.f32 %v6594_v49, %v6677_v37  ;;  %v10738_v35 = vpop.f32.mrb[10].mxu1  ;;  %v10754_v57 = vpop.f32.mrb[2].mxu0 }
 0xcd5   : > { %v6824_v32 = vmax.f32 %v6710_v48, %v10753_v10  ;;  %v6711_v61 = vmax.f32 %v6597_v23, %v10738_v35  ;;  %v6680_v25 = vpop.f32.mrb[11].mxu1  ;;  %v6794_v54 = vpop.f32.mrb[3].mxu0 }
 0xcd6   : > { %v6822_v5 = vmax.f32 %v6708_v62, %v6791_v33  ;;  %v6709_v17 = vmax.f32 %v6595_v20, %v6680_v25 }
 0xcd7   : > { %v6825_v7 = vmax.f32 %v6711_v61, %v10754_v57 }
 0xcd8   : > { %v6823_v43 = vmax.f32 %v6709_v17, %v6794_v54 }
 0xcda   : > { %v10741_v46 = vpop.f32.mrb[12].mxu1  ;;  %v10757_v29 = vpop.f32.mrb[4].mxu0 }
 0xcdb   : > { %v6714_v11 = vmax.f32 %v6600_v16, %v10741_v46  ;;  %v6693_v15 = vpop.f32.mrb[13].mxu1  ;;  %v6807_v4 = vpop.f32.mrb[5].mxu0 }
 0xcdc   : > { %v6712_v58 = vmax.f32 %v6598_v44, %v6693_v15  ;;  %v10742_v34 = vpop.f32.mrb[14].mxu1  ;;  %v10758_v30 = vpop.f32.mrb[6].mxu0 }
 0xcdd   : > { %v6828_v52 = vmax.f32 %v6714_v11, %v10757_v29  ;;  %v6715_v49 = vmax.f32 %v6601_v9, %v10742_v34  ;;  %v6696_v63 = vpop.f32.mrb[15].mxu1  ;;  %v6810_v40 = vpop.f32.mrb[7].mxu0 }
 0xcde   : > { %v6826_v60 = vmax.f32 %v6712_v58, %v6807_v4  ;;  %v6713_v23 = vmax.f32 %v6599_v2, %v6696_v63 }
 0xcdf   : > { %v6829_v28 = vmax.f32 %v6715_v49, %v10758_v30 }
 0xce0   : > { %v6827_v36 = vmax.f32 %v6713_v23, %v6810_v40 }
 0xce2   : > { %v10769_v21 = vpop.f32.mrb[16].mxu1  ;;  %v10785_v20 = vpop.f32.mrb[8].mxu0 }
 0xce3   : > { %v6938_v14 = vmax.f32 %v6824_v32, %v10769_v21  ;;  %v6905_v22 = vpop.f32.mrb[17].mxu1  ;;  %v7019_v8 = vpop.f32.mrb[9].mxu0 }
 0xce4   : > { %v6936_v10 = vmax.f32 %v6822_v5, %v6905_v22  ;;  %v10770_v16 = vpop.f32.mrb[18].mxu1  ;;  %v10786_v48 = vpop.f32.mrb[10].mxu0 }
 0xce5   : > { %v7052_v37 = vmax.f32 %v6938_v14, %v10785_v20  ;;  %v6939_v44 = vmax.f32 %v6825_v7, %v10770_v16  ;;  %v6908_v33 = vpop.f32.mrb[19].mxu1  ;;  %v7022_v62 = vpop.f32.mrb[11].mxu0 }
 0xce6   : > { %v7050_v35 = vmax.f32 %v6936_v10, %v7019_v8  ;;  %v6937_v9 = vmax.f32 %v6823_v43, %v6908_v33 }
 0xce7   : > { %v7053_v57 = vmax.f32 %v6939_v44, %v10786_v48 }
 0xce8   : > { %v7051_v61 = vmax.f32 %v6937_v9, %v7022_v62 }
 0xcea   : > { %v10773_v25 = vpop.f32.mrb[20].mxu1  ;;  %v10789_v2 = vpop.f32.mrb[12].mxu0 }
 0xceb   : > { %v6942_v54 = vmax.f32 %v6828_v52, %v10773_v25  ;;  %v6921_v17 = vpop.f32.mrb[21].mxu1  ;;  %v7035_v46 = vpop.f32.mrb[13].mxu0 }
 0xcec   : > { %v6940_v29 = vmax.f32 %v6826_v60, %v6921_v17  ;;  %v10774_v32 = vpop.f32.mrb[22].mxu1  ;;  %v10790_v11 = vpop.f32.mrb[14].mxu0 }
 0xced   : > { %v7056_v15 = vmax.f32 %v6942_v54, %v10789_v2  ;;  %v6943_v5 = vmax.f32 %v6829_v28, %v10774_v32  ;;  %v6924_v4 = vpop.f32.mrb[23].mxu1  ;;  %v7038_v58 = vpop.f32.mrb[15].mxu0 }
 0xcee   : > { %v7054_v34 = vmax.f32 %v6940_v29, %v7035_v46  ;;  %v6941_v7 = vmax.f32 %v6827_v36, %v6924_v4 }
 0xcef   : > { %v7057_v30 = vmax.f32 %v6943_v5, %v10790_v11 }
 0xcf0   : > { %v7055_v49 = vmax.f32 %v6941_v7, %v7038_v58  ;;  %v11242_v7 = vld [vmem:[%s11533_s25] sm:$0xff]  }
 0xcf1   : > { %10859 = vmatprep.subr.bf16.mxu1 %v11242_v7 }
 0xcf2   : > { %v10801_v63 = vpop.f32.mrb[24].mxu1  ;;  %v10817_v43 = vpop.f32.mrb[16].mxu0 }
 0xcf3   : > { %v7166_v40 = vmax.f32 %v7052_v37, %v10801_v63  ;;  %v7133_v23 = vpop.f32.mrb[25].mxu1  ;;  %v7247_v21 = vpop.f32.mrb[17].mxu0  ;;  %v11244_v63 = vld [vmem:[%s11533_s25 + $0x10] sm:$0xff]  }
 0xcf4   : > { %v7164_v20 = vmax.f32 %v7050_v35, %v7133_v23  ;;  %v10802_v52 = vpop.f32.mrb[26].mxu1  ;;  %v10818_v14 = vpop.f32.mrb[18].mxu0 }
 0xcf5   : > { %v7280_v22 = vmax.f32 %v7166_v40, %v10817_v43  ;;  %v7167_v60 = vmax.f32 %v7053_v57, %v10802_v52  ;;  %v7136_v8 = vpop.f32.mrb[27].mxu1  ;;  %v7250_v10 = vpop.f32.mrb[19].mxu0 }
 0xcf6   : > { %v7278_v16 = vmax.f32 %v7164_v20, %v7247_v21  ;;  %v7165_v28 = vmax.f32 %v7051_v61, %v7136_v8 }
 0xcf7   : > { %v7281_v48 = vmax.f32 %v7167_v60, %v10818_v14 }
 0xcf8   : > { %v7279_v44 = vmax.f32 %v7165_v28, %v7250_v10 }
 0xcf9   : > { %v7291_v33 = vpack.c.bf16 %v7281_v48, %v7280_v22 }
 0xcfa   : > { %v7290_v36 = vpack.c.bf16 %v7279_v44, %v7278_v16  ;;  %v10805_v62 = vpop.f32.mrb[28].mxu1  ;;  %v10821_v9 = vpop.f32.mrb[20].mxu0 }
 0xcfb   : > { %v7170_v25 = vmax.f32 %v7056_v15, %v10805_v62  ;;  %v7149_v2 = vpop.f32.mrb[29].mxu1  ;;  %v7263_v37 = vpop.f32.mrb[21].mxu0 }
 0xcfc   : > { %v7168_v54 = vmax.f32 %v7054_v34, %v7149_v2  ;;  %v10806_v17 = vpop.f32.mrb[30].mxu1  ;;  %v10822_v35 = vpop.f32.mrb[22].mxu0  ;;  %10827 = vmatprep.mubr.msk.bf16.mxu1 %vm3225_vm3, %v7290_v36  ;;  %v11234_v34 = vld [vmem:[%s11574_s2] sm:$0xff]  }
 0xcfd   : > { %v7284_v57 = vmax.f32 %v7170_v25, %v10821_v9  ;;  %v7171_v46 = vmax.f32 %v7057_v30, %v10806_v17  ;;  %v7152_v61 = vpop.f32.mrb[31].mxu1  ;;  %v7266_v29 = vpop.f32.mrb[23].mxu0  ;;  %10828 = vmatmul.mubr.msk.bf16.vlgmr.msra.gmra.mrb[32].mxu1 %vm3225_vm3, %v7291_v33  ;;  %10843 = vmatprep.mubr.msk.bf16.mxu0 %vm6293_vm4, %v11234_v34  ;;  %v11243_v30 = vld [vmem:[%s11533_s25 + $0x8] sm:$0xff]  }
 0xcfe   : > { %v7282_v32 = vmax.f32 %v7168_v54, %v7263_v37  ;;  %v7169_v11 = vmax.f32 %v7055_v49, %v7152_v61  ;;  %10860 = vmatpush3.bf16.msra.mxu1 %v11242_v7  ;;  %v8892_v49 = vld [vmem:[%s13638_s1] ss:$0 sm:$0xff]  ;;  %v11245_v61 = vld [vmem:[%s11533_s25 + $0x18] sm:$0xff]   ;;  %s13539_s1 = scalar_lea.vmem %s11538_s20, %s8969_s10 }
 0xcff   : > { %v7285_v15 = vmax.f32 %v7171_v46, %v10822_v35  ;;  %10861 = vmatprep.subr.bf16.mxu1 %v11243_v30  ;;  %v11239_v35 = vld [vmem:[%s11574_s2 + $0x28] sm:$0xff]   ;;  %v11241_v46 = vld [vmem:[%s11574_s2 + $0x38] sm:$0xff]  }
 0xd00   : > { %v7283_v5 = vmax.f32 %v7169_v11, %v7266_v29  ;;  %v11246_v29 = vld [vmem:[%s11528_s29] sm:$0xff]   ;;  %v11249_v11 = vld [vmem:[%s13639_s18 + $0x8] sm:$0xff]  }
 0xd01   : > { %v7293_v4 = vpack.c.bf16 %v7285_v15, %v7284_v57  ;;  %v11240_v57 = vld [vmem:[%s11574_s2 + $0x30] sm:$0xff]  }
 0xd02   : > { %v7292_v58 = vpack.c.bf16 %v7283_v5, %v7282_v32  ;;  %10862 = vmatpush3.bf16.msra.mxu1 %v11243_v30  ;;  %v11248_v32 = vld [vmem:[%s13639_s18] sm:$0xff]   ;;  %v11247_v30 = vld [vmem:[%s11528_s29 + $0x8] sm:$0xff]  }
 0xd03   : > { %10863 = vmatprep.subr.bf16.mxu1 %v11244_v63 }
 0xd04   : > { %10831 = vmatprep.mubr.msk.bf16.mxu1 %vm3225_vm3, %v7292_v58 }
 0xd05   : > { %10832 = vmatmul.mubr.msk.bf16.gmra.mrb[36].mxu1 %vm3225_vm3, %v7293_v4 }
 0xd06   : > { %10864 = vmatpush3.bf16.msra.mxu1 %v11244_v63 }
 0xd07   : > { %10865 = vmatprep.subr.bf16.mxu1 %v11245_v61 }
 0xd0a   : > { %10866 = vmatpush3.bf16.msra.mxu1 %v11245_v61 }
 0xd0b   : > { %10883 = vmatprep.subr.bf16.mxu1 %v11246_v29 }
 0xdd0   : > { %v10829_v43 = vpop.f32.mrb[32].mxu1 }
 0xdd1   : > { %v7368_v40 = vadd.f32 %v10829_v43, %v8892_v49  ;;  %v7359_v23 = vpop.f32.mrb[33].mxu1 }
 0xdd2   : > { %v7360_v21 = vadd.f32 %v8892_v49, %v7359_v23  ;;  %v10830_v20 = vpop.f32.mrb[34].mxu1 }
 0xdd3   : > { %v7392_v52 = vadd.f32 %v7368_v40, %v6244_v42  ;;  %v7371_v14 = vadd.f32 %v10830_v20, %v8892_v49  ;;  %v7362_v22 = vpop.f32.mrb[35].mxu1 }
 0xdd4   : > { %v7390_v60 = vadd.f32 %v7360_v21, %v6242_v47  ;;  %v7363_v8 = vadd.f32 %v8892_v49, %v7362_v22 }
 0xdd5   : > { %v7393_v10 = vadd.f32 %v7371_v14, %v6245_v59  ;;  %v7400_v28 = vmax.f32 %v7392_v52, 0.0 }
 0xdd6   : > { %v7391_v16 = vadd.f32 %v7363_v8, %v6243_v53  ;;  %v7398_v44 = vmax.f32 %v7390_v60, 0.0 }
 0xdd7   : > { %v7401_v48 = vmax.f32 %v7393_v10, 0.0 }
 0xdd8   : > { %v7399_v33 = vmax.f32 %v7391_v16, 0.0  ;;  %v10833_v36 = vpop.f32.mrb[36].mxu1 }
 0xdd9   : > { %v7384_v62 = vadd.f32 %v10833_v36, %v8892_v49  ;;  %v7375_v51 = vpop.f32.mrb[37].mxu1  ;;  %v7423_v42 = vpack.c.bf16 %v7401_v48, %v7400_v28 }
 0xdda   : > { %v7376_v9 = vadd.f32 %v8892_v49, %v7375_v51  ;;  %v10834_v25 = vpop.f32.mrb[38].mxu1  ;;  %v7422_v2 = vpack.c.bf16 %v7399_v33, %v7398_v44 }
 0xddb   : > { %v7396_v31 = vadd.f32 %v7384_v62, %v6248_v27  ;;  %v7387_v47 = vadd.f32 %v10834_v25, %v8892_v49  ;;  %v7378_v1 = vpop.f32.mrb[39].mxu1 }
 0xddc   : > { %v7394_v13 = vadd.f32 %v7376_v9, %v6246_v55  ;;  %v7379_v59 = vadd.f32 %v8892_v49, %v7378_v1  ;;  %10835 = vmatprep.subr.bf16.mxu0 %v7422_v2 }
 0xddd   : > { %v7397_v53 = vadd.f32 %v7387_v47, %v6249_v19  ;;  %10836 = vmatpush3.bf16.msra.mxu0 %v7422_v2  ;;  %v7404_v26 = vmax.f32 %v7396_v31, 0.0  ;;  %v11237_v19 = vld [vmem:[%s11574_s2 + $0x18] sm:$0xff]  }
 0xdde   : > { %v7395_v37 = vadd.f32 %v7379_v59, %v6247_v6  ;;  %10837 = vmatprep.subr.bf16.mxu0 %v7423_v42  ;;  %v7402_v54 = vmax.f32 %v7394_v13, 0.0  ;;  %v11238_v6 = vld [vmem:[%s11574_s2 + $0x20] sm:$0xff]   ;;  %s13640_s2 = sld [smem:[#allocation3_spill]] }
 0xddf   : > { %v7405_v27 = vmax.f32 %v7397_v53, 0.0 }
 0xde0   : > { %v7403_v17 = vmax.f32 %v7395_v37, 0.0 }
 0xde1   : > { %10838 = vmatpush3.bf16.msra.mxu0 %v7423_v42  ;;  %v7425_v38 = vpack.c.bf16 %v7405_v27, %v7404_v26 }
 0xde2   : > { %v7424_v55 = vpack.c.bf16 %v7403_v17, %v7402_v54 }
 0xde4   : > { %10839 = vmatprep.subr.bf16.mxu0 %v7424_v55  ;;  %v11251_v59 = vld [vmem:[%s13640_s2 + $0x8] sm:$0xff]  }
 0xde5   : > { %10840 = vmatpush3.bf16.msra.mxu0 %v7424_v55  ;;  %v11252_v55 = vld [vmem:[%s13640_s2 + $0x10] sm:$0xff]  }
 0xde6   : > { %10841 = vmatprep.subr.bf16.mxu0 %v7425_v38 }
 0xde9   : > { %10842 = vmatpush3.bf16.msra.mxu0 %v7425_v38 }
 0xdea   : > { %10903 = vmatprep.subr.bf16.mxu0 %v11248_v32 }
 0xdec   : > { %10844 = vmatmul.mubr.msk.bf16.vlgmr.msra.gmra.mrb[24].mxu0 %vm6293_vm4, %v11235_v56 }
 0xded   : > { %10847 = vmatprep.mubr.msk.bf16.mxu0 %vm6293_vm4, %v11236_v0  ;;  %10904 = vmatpush3.bf16.msra.mxu0 %v11248_v32 }
 0xdee   : > { %10905 = vmatprep.subr.bf16.mxu0 %v11249_v11 }
 0xdf1   : > { %10906 = vmatpush3.bf16.msra.mxu0 %v11249_v11 }
 0xdf4   : > { %10848 = vmatmul.mubr.msk.bf16.gmra.mrb[28].mxu0 %vm6293_vm4, %v11237_v19 }
 0xdf5   : > { %10851 = vmatprep.mubr.msk.bf16.mxu0 %vm6293_vm4, %v11238_v6 }
 0xdfc   : > { %10852 = vmatmul.mubr.msk.bf16.gmra.mrb[32].mxu0 %vm6293_vm4, %v11239_v35 }
 0xdfd   : > { %10855 = vmatprep.mubr.msk.bf16.mxu0 %vm6293_vm4, %v11240_v57 }
 0xe04   : > { %10856 = vmatmul.mubr.msk.bf16.gmra.mrb[36].mxu0 %vm6293_vm4, %v11241_v46 }
 0xebf   : > { %v10845_v15 = vpop.f32.mrb[24].mxu0 }
 0xec0   : > { %v7524_v5 = vpop.f32.mrb[25].mxu0 }
 0xec1   : > { %v10846_v4 = vpop.f32.mrb[26].mxu0 }
 0xec2   : > { %v7600_v58 = vpack.c.bf16 %v10846_v4, %v10845_v15  ;;  %v7527_v34 = vpop.f32.mrb[27].mxu0 }
 0xec3   : > { %v7599_v7 = vpack.c.bf16 %v7527_v34, %v7524_v5 }
 0xec5   : > { %10867 = vmatprep.mubr.msk.bf16.mxu1 %vm6293_vm4, %v7599_v7 }
 0xec6   : > { %10868 = vmatmul.mubr.msk.bf16.vlgmr.msra.gmra.mrb[40].mxu1 %vm6293_vm4, %v7600_v58 }
 0xec7   : > { %v10849_v63 = vpop.f32.mrb[28].mxu0  ;;  %10884 = vmatpush3.bf16.msra.mxu1 %v11246_v29 }
 0xec8   : > { %v7540_v49 = vpop.f32.mrb[29].mxu0  ;;  %10885 = vmatprep.subr.bf16.mxu1 %v11247_v30 }
 0xec9   : > { %v10850_v43 = vpop.f32.mrb[30].mxu0 }
 0xeca   : > { %v7602_v40 = vpack.c.bf16 %v10850_v43, %v10849_v63  ;;  %v7543_v23 = vpop.f32.mrb[31].mxu0 }
 0xecb   : > { %v7601_v21 = vpack.c.bf16 %v7543_v23, %v7540_v49  ;;  %10886 = vmatpush3.bf16.msra.mxu1 %v11247_v30 }
 0xecd   : > { %10871 = vmatprep.mubr.msk.bf16.mxu1 %vm6293_vm4, %v7601_v21 }
 0xece   : > { %10872 = vmatmul.mubr.msk.bf16.gmra.mrb[44].mxu1 %vm6293_vm4, %v7602_v40 }
 0xecf   : > { %v10853_v20 = vpop.f32.mrb[32].mxu0 }
 0xed0   : > { %v7556_v52 = vpop.f32.mrb[33].mxu0 }
 0xed1   : > { %v10854_v14 = vpop.f32.mrb[34].mxu0 }
 0xed2   : > { %v7604_v22 = vpack.c.bf16 %v10854_v14, %v10853_v20  ;;  %v7559_v60 = vpop.f32.mrb[35].mxu0 }
 0xed3   : > { %v7603_v8 = vpack.c.bf16 %v7559_v60, %v7556_v52 }
 0xed5   : > { %10875 = vmatprep.mubr.msk.bf16.mxu1 %vm6293_vm4, %v7603_v8 }
 0xed6   : > { %10876 = vmatmul.mubr.msk.bf16.gmra.mrb[48].mxu1 %vm6293_vm4, %v7604_v22 }
 0xed7   : > { %v10857_v10 = vpop.f32.mrb[36].mxu0 }
 0xed8   : > { %v7572_v16 = vpop.f32.mrb[37].mxu0 }
 0xed9   : > { %v10858_v28 = vpop.f32.mrb[38].mxu0 }
 0xeda   : > { %v7606_v48 = vpack.c.bf16 %v10858_v28, %v10857_v10  ;;  %v7575_v44 = vpop.f32.mrb[39].mxu0  ;;  %v11253_v28 = vld [vmem:[%s13640_s2 + $0x18] sm:$0xff]  }
 0xedb   : > { %v7605_v33 = vpack.c.bf16 %v7575_v44, %v7572_v16 }
 0xedd   : > { %10879 = vmatprep.mubr.msk.bf16.mxu1 %vm6293_vm4, %v7605_v33 }
 0xede   : > { %10880 = vmatmul.mubr.msk.bf16.gmra.mrb[52].mxu1 %vm6293_vm4, %v7606_v48  ;;  %v8938_v48 = vld [vmem:[%s13641_s28] ss:$0 sm:$0xff] }
 0xedf   : > { %10887 = vmatprep.mubr.msk.bf16.mxu1 %vm3225_vm3, %v12694_v50  ;;  %v11250_v50 = vld [vmem:[%s13640_s2] sm:$0xff]  }
 0xee0   : > { %10923 = vmatprep.subr.bf16.mxu0 %v11250_v50 }
 0xee6   : > { %10888 = vmatmul.mubr.msk.bf16.vlgmr.msra.gmra.mrb[40].mxu1 %vm3225_vm3, %v12691_v24  ;;  %v13498_v24 = vld [vmem:[%s11523_s3] ss:$0 sm:$0xff] }
 0xee7   : > { %10891 = vmatprep.mubr.msk.bf16.mxu1 %vm3225_vm3, %v12714_v3 }
 0xeee   : > { %10892 = vmatmul.mubr.msk.bf16.gmra.mrb[44].mxu1 %vm3225_vm3, %v12711_v45 }
 0xeef   : > { %10895 = vmatprep.mubr.msk.bf16.mxu1 %vm3225_vm3, %v12734_v41 }
 0xef6   : > { %10896 = vmatmul.mubr.msk.bf16.gmra.mrb[48].mxu1 %vm3225_vm3, %v12731_v39 }
 0xef7   : > { %10899 = vmatprep.mubr.msk.bf16.mxu1 %vm3225_vm3, %v12753_v18 }
 0xefe   : > { %10900 = vmatmul.mubr.msk.bf16.gmra.mrb[52].mxu1 %vm3225_vm3, %v12751_v12 }
 0xfb9   : > { %v10889_v3 = vpop.f32.mrb[40].mxu1 }
 0xfba   : > { %v7870_v36 = vadd.f32 %v10889_v3, %v13498_v24  ;;  %v7798_v45 = vpop.f32.mrb[41].mxu1 }
 0xfbb   : > { %v7868_v41 = vadd.f32 %v13498_v24, %v7798_v45  ;;  %v10890_v62 = vpop.f32.mrb[42].mxu1 }
 0xfbc   : > { %v7871_v39 = vadd.f32 %v10890_v62, %v13498_v24  ;;  %v7801_v51 = vpop.f32.mrb[43].mxu1  ;;  %v7886_v42 = vmax.f32 %v7870_v36, 0.0 }
 0xfbd   : > { %v7869_v18 = vadd.f32 %v13498_v24, %v7801_v51  ;;  %v7884_v12 = vmax.f32 %v7868_v41, 0.0 }
 0xfbe   : > { %v7887_v9 = vmax.f32 %v7871_v39, 0.0 }
 0xfbf   : > { %v7885_v25 = vmax.f32 %v7869_v18, 0.0 }
 0xfc0   : > { %v7905_v2 = vpack.c.bf16 %v7887_v9, %v7886_v42 }
 0xfc1   : > { %v7904_v31 = vpack.c.bf16 %v7885_v25, %v7884_v12  ;;  %v10893_v47 = vpop.f32.mrb[44].mxu1 }
 0xfc2   : > { %v7874_v1 = vadd.f32 %v10893_v47, %v13498_v24  ;;  %v7814_v13 = vpop.f32.mrb[45].mxu1 }
 0xfc3   : > { %v7872_v53 = vadd.f32 %v13498_v24, %v7814_v13  ;;  %v10894_v37 = vpop.f32.mrb[46].mxu1  ;;  %10907 = vmatprep.mubr.msk.bf16.mxu0 %vm3225_vm3, %v7904_v31 }
 0xfc4   : > { %v7875_v26 = vadd.f32 %v10894_v37, %v13498_v24  ;;  %v7817_v27 = vpop.f32.mrb[47].mxu1  ;;  %10908 = vmatmul.mubr.msk.bf16.vlgmr.msra.gmra.mrb[40].mxu0 %vm3225_vm3, %v7905_v2  ;;  %v7890_v17 = vmax.f32 %v7874_v1, 0.0 }
 0xfc5   : > { %v7873_v54 = vadd.f32 %v13498_v24, %v7817_v27  ;;  %10924 = vmatpush3.bf16.msra.mxu0 %v11250_v50  ;;  %v7888_v56 = vmax.f32 %v7872_v53, 0.0 }
 0xfc6   : > { %v7891_v38 = vmax.f32 %v7875_v26, 0.0  ;;  %10925 = vmatprep.subr.bf16.mxu0 %v11251_v59 }
 0xfc7   : > { %v7889_v0 = vmax.f32 %v7873_v54, 0.0 }
 0xfc8   : > { %v7907_v19 = vpack.c.bf16 %v7891_v38, %v7890_v17 }
 0xfc9   : > { %v7906_v6 = vpack.c.bf16 %v7889_v0, %v7888_v56  ;;  %v10897_v35 = vpop.f32.mrb[48].mxu1  ;;  %10926 = vmatpush3.bf16.msra.mxu0 %v11251_v59 }
 0xfca   : > { %v7878_v57 = vadd.f32 %v10897_v35, %v13498_v24  ;;  %v7830_v46 = vpop.f32.mrb[49].mxu1  ;;  %10927 = vmatprep.subr.bf16.mxu0 %v11252_v55 }
 0xfcb   : > { %v7876_v61 = vadd.f32 %v13498_v24, %v7830_v46  ;;  %v10898_v29 = vpop.f32.mrb[50].mxu1  ;;  %10911 = vmatprep.mubr.msk.bf16.mxu0 %vm3225_vm3, %v7906_v6 }
 0xfcc   : > { %v7879_v32 = vadd.f32 %v10898_v29, %v13498_v24  ;;  %v7833_v11 = vpop.f32.mrb[51].mxu1  ;;  %10912 = vmatmul.mubr.msk.bf16.gmra.mrb[44].mxu0 %vm3225_vm3, %v7907_v19  ;;  %v7894_v5 = vmax.f32 %v7878_v57, 0.0 }
 0xfcd   : > { %v7877_v15 = vadd.f32 %v13498_v24, %v7833_v11  ;;  %10928 = vmatpush3.bf16.msra.mxu0 %v11252_v55  ;;  %v7892_v58 = vmax.f32 %v7876_v61, 0.0 }
 0xfce   : > { %v7895_v4 = vmax.f32 %v7879_v32, 0.0  ;;  %10929 = vmatprep.subr.bf16.mxu0 %v11253_v28 }
 0xfcf   : > { %v7893_v34 = vmax.f32 %v7877_v15, 0.0 }
 0xfd0   : > { %v7909_v7 = vpack.c.bf16 %v7895_v4, %v7894_v5 }
 0xfd1   : > { %v7908_v30 = vpack.c.bf16 %v7893_v34, %v7892_v58  ;;  %v10901_v63 = vpop.f32.mrb[52].mxu1  ;;  %10930 = vmatpush3.bf16.msra.mxu0 %v11253_v28 }
 0xfd2   : > { %v7882_v49 = vadd.f32 %v10901_v63, %v13498_v24  ;;  %v7846_v43 = vpop.f32.mrb[53].mxu1 }
 0xfd3   : > { %v7880_v40 = vadd.f32 %v13498_v24, %v7846_v43  ;;  %v10902_v23 = vpop.f32.mrb[54].mxu1  ;;  %10915 = vmatprep.mubr.msk.bf16.mxu0 %vm3225_vm3, %v7908_v30 }
 0xfd4   : > { %v7883_v21 = vadd.f32 %v10902_v23, %v13498_v24  ;;  %v7849_v20 = vpop.f32.mrb[55].mxu1  ;;  %10916 = vmatmul.mubr.msk.bf16.gmra.mrb[48].mxu0 %vm3225_vm3, %v7909_v7  ;;  %v7898_v14 = vmax.f32 %v7882_v49, 0.0 }
 0xfd5   : > { %v7881_v52 = vadd.f32 %v13498_v24, %v7849_v20  ;;  %v7896_v60 = vmax.f32 %v7880_v40, 0.0 }
 0xfd6   : > { %v7899_v22 = vmax.f32 %v7883_v21, 0.0 }
 0xfd7   : > { %v7897_v8 = vmax.f32 %v7881_v52, 0.0 }
 0xfd8   : > { %v7911_v10 = vpack.c.bf16 %v7899_v22, %v7898_v14  ;;  %v8949_v14 = vld [vmem:[%s13642_s7] ss:$0 sm:$0xff] }
 0xfd9   : > { %v7910_v16 = vpack.c.bf16 %v7897_v8, %v7896_v60 }
 0xfdb   : > { %10919 = vmatprep.mubr.msk.bf16.mxu0 %vm3225_vm3, %v7910_v16 }
 0xfdc   : > { %10920 = vmatmul.mubr.msk.bf16.gmra.mrb[52].mxu0 %vm3225_vm3, %v7911_v10 }
0x1097   : > { %v10909_v44 = vpop.f32.mrb[40].mxu0 }
0x1098   : > { %v7998_v33 = vadd.f32 %v10909_v44, %v8938_v48  ;;  %v7989_v50 = vpop.f32.mrb[41].mxu0 }
0x1099   : > { %v7990_v3 = vadd.f32 %v8938_v48, %v7989_v50  ;;  %v10910_v36 = vpop.f32.mrb[42].mxu0 }
0x109a   : > { %v8001_v24 = vadd.f32 %v10910_v36, %v8938_v48  ;;  %v7992_v45 = vpop.f32.mrb[43].mxu0  ;;  %v8054_v62 = vmax.f32 %v7998_v33, 0.0 }
0x109b   : > { %v7993_v41 = vadd.f32 %v8938_v48, %v7992_v45  ;;  %v8052_v51 = vmax.f32 %v7990_v3, 0.0 }
0x109c   : > { %v8055_v39 = vmax.f32 %v8001_v24, 0.0 }
0x109d   : > { %v8053_v18 = vmax.f32 %v7993_v41, 0.0 }
0x109e   : > { %v8077_v42 = vpack.c.bf16 %v8055_v39, %v8054_v62 }
0x109f   : > { %v8076_v9 = vpack.c.bf16 %v8053_v18, %v8052_v51  ;;  %v10913_v12 = vpop.f32.mrb[44].mxu0 }
0x10a0   : > { %v8014_v25 = vadd.f32 %v10913_v12, %v8938_v48  ;;  %v8005_v2 = vpop.f32.mrb[45].mxu0 }
0x10a1   : > { %v8006_v31 = vadd.f32 %v8938_v48, %v8005_v2  ;;  %v10914_v47 = vpop.f32.mrb[46].mxu0  ;;  %10931 = vmatprep.mubr.msk.bf16.mxu0 %vm6293_vm4, %v8076_v9 }
0x10a2   : > { %v8017_v1 = vadd.f32 %v10914_v47, %v8938_v48  ;;  %v8008_v13 = vpop.f32.mrb[47].mxu0  ;;  %10932 = vmatmul.mubr.msk.bf16.vlgmr.msra.gmra.mrb[56].mxu0 %vm6293_vm4, %v8077_v42  ;;  %v8058_v53 = vmax.f32 %v8014_v25, 0.0 }
0x10a3   : > { %v8009_v59 = vadd.f32 %v8938_v48, %v8008_v13  ;;  %v8056_v26 = vmax.f32 %v8006_v31, 0.0 }
0x10a4   : > { %v8059_v37 = vmax.f32 %v8017_v1, 0.0 }
0x10a5   : > { %v8057_v27 = vmax.f32 %v8009_v59, 0.0 }
0x10a6   : > { %v8079_v54 = vpack.c.bf16 %v8059_v37, %v8058_v53 }
0x10a7   : > { %v8078_v17 = vpack.c.bf16 %v8057_v27, %v8056_v26  ;;  %v10917_v38 = vpop.f32.mrb[48].mxu0 }
0x10a8   : > { %v8030_v55 = vadd.f32 %v10917_v38, %v8938_v48  ;;  %v8021_v56 = vpop.f32.mrb[49].mxu0 }
0x10a9   : > { %v8022_v0 = vadd.f32 %v8938_v48, %v8021_v56  ;;  %v10918_v19 = vpop.f32.mrb[50].mxu0  ;;  %10935 = vmatprep.mubr.msk.bf16.mxu0 %vm6293_vm4, %v8078_v17 }
0x10aa   : > { %v8033_v6 = vadd.f32 %v10918_v19, %v8938_v48  ;;  %v8024_v35 = vpop.f32.mrb[51].mxu0  ;;  %10936 = vmatmul.mubr.msk.bf16.gmra.mrb[60].mxu0 %vm6293_vm4, %v8079_v54  ;;  %v8062_v46 = vmax.f32 %v8030_v55, 0.0 }
0x10ab   : > { %v8025_v57 = vadd.f32 %v8938_v48, %v8024_v35  ;;  %v8060_v29 = vmax.f32 %v8022_v0, 0.0 }
0x10ac   : > { %v8063_v61 = vmax.f32 %v8033_v6, 0.0 }
0x10ad   : > { %v8061_v32 = vmax.f32 %v8025_v57, 0.0 }
0x10ae   : > { %v8081_v11 = vpack.c.bf16 %v8063_v61, %v8062_v46 }
0x10af   : > { %v8080_v15 = vpack.c.bf16 %v8061_v32, %v8060_v29  ;;  %v10921_v5 = vpop.f32.mrb[52].mxu0 }
0x10b0   : > { %v8046_v4 = vadd.f32 %v10921_v5, %v8938_v48  ;;  %v8037_v58 = vpop.f32.mrb[53].mxu0 }
0x10b1   : > { %v8038_v34 = vadd.f32 %v8938_v48, %v8037_v58  ;;  %v10922_v7 = vpop.f32.mrb[54].mxu0  ;;  %10939 = vmatprep.mubr.msk.bf16.mxu0 %vm6293_vm4, %v8080_v15 }
0x10b2   : > { %v8049_v30 = vadd.f32 %v10922_v7, %v8938_v48  ;;  %v8040_v63 = vpop.f32.mrb[55].mxu0  ;;  %10940 = vmatmul.mubr.msk.bf16.gmra.mrb[64].mxu0 %vm6293_vm4, %v8081_v11  ;;  %v8066_v43 = vmax.f32 %v8046_v4, 0.0 }
0x10b3   : > { %v8041_v49 = vadd.f32 %v8938_v48, %v8040_v63  ;;  %v8064_v23 = vmax.f32 %v8038_v34, 0.0 }
0x10b4   : > { %v8067_v40 = vmax.f32 %v8049_v30, 0.0 }
0x10b5   : > { %v8065_v21 = vmax.f32 %v8041_v49, 0.0 }
0x10b6   : > { %v8083_v20 = vpack.c.bf16 %v8067_v40, %v8066_v43 }
0x10b7   : > { %v8082_v52 = vpack.c.bf16 %v8065_v21, %v8064_v23 }
0x10b9   : > { %10943 = vmatprep.mubr.msk.bf16.mxu0 %vm6293_vm4, %v8082_v52 }
0x10ba   : > { %10944 = vmatmul.mubr.msk.bf16.gmra.mrb[68].mxu0 %vm6293_vm4, %v8083_v20 }
0x1175   : > { %v10933_v22 = vpop.f32.mrb[56].mxu0 }
0x1176   : > { %v8182_v60 = vadd.f32 %v10933_v22, %v8949_v14  ;;  %v8173_v8 = vpop.f32.mrb[57].mxu0 }
0x1177   : > { %v8174_v10 = vadd.f32 %v8949_v14, %v8173_v8  ;;  %v10934_v16 = vpop.f32.mrb[58].mxu0 }
0x1178   : > { %8238 = vst [vmem:[%s13539_s1 + $0x10] sm:$0xff] %v8182_v60  ;;  %v8185_v28 = vadd.f32 %v10934_v16, %v8949_v14  ;;  %v8176_v48 = vpop.f32.mrb[59].mxu0 }
0x1179   : > { %8236 = vst [vmem:[%s13539_s1] sm:$0xff] %v8174_v10  ;;  %v8177_v44 = vadd.f32 %v8949_v14, %v8176_v48 }
0x117a   : > { %8239 = vst [vmem:[%s13539_s1 + $0x18] sm:$0xff] %v8185_v28 }
0x117b   : > { %8237 = vst [vmem:[%s13539_s1 + $0x8] sm:$0xff] %v8177_v44 }
0x117d   : > { %v10937_v33 = vpop.f32.mrb[60].mxu0 }
0x117e   : > { %v8198_v50 = vadd.f32 %v10937_v33, %v8949_v14  ;;  %v8189_v3 = vpop.f32.mrb[61].mxu0 }
0x117f   : > { %v8190_v36 = vadd.f32 %v8949_v14, %v8189_v3  ;;  %v10938_v24 = vpop.f32.mrb[62].mxu0 }
0x1180   : > { %8242 = vst [vmem:[%s13539_s1 + $0x30] sm:$0xff] %v8198_v50  ;;  %v8201_v45 = vadd.f32 %v10938_v24, %v8949_v14  ;;  %v8192_v41 = vpop.f32.mrb[63].mxu0 }
0x1181   : > { %8240 = vst [vmem:[%s13539_s1 + $0x20] sm:$0xff] %v8190_v36  ;;  %v8193_v62 = vadd.f32 %v8949_v14, %v8192_v41 }
0x1182   : > { %8243 = vst [vmem:[%s13539_s1 + $0x38] sm:$0xff] %v8201_v45 }
0x1183   : > { %8241 = vst [vmem:[%s13539_s1 + $0x28] sm:$0xff] %v8193_v62 }
0x1185   : > { %v10941_v39 = vpop.f32.mrb[64].mxu0 }
0x1186   : > { %v8214_v51 = vadd.f32 %v10941_v39, %v8949_v14  ;;  %v8205_v18 = vpop.f32.mrb[65].mxu0 }
0x1187   : > { %v8206_v42 = vadd.f32 %v8949_v14, %v8205_v18  ;;  %v10942_v9 = vpop.f32.mrb[66].mxu0 }
0x1188   : > { %8246 = vst [vmem:[%s13539_s1 + $0x50] sm:$0xff] %v8214_v51  ;;  %v8217_v12 = vadd.f32 %v10942_v9, %v8949_v14  ;;  %v8208_v25 = vpop.f32.mrb[67].mxu0 }
0x1189   : > { %8244 = vst [vmem:[%s13539_s1 + $0x40] sm:$0xff] %v8206_v42  ;;  %v8209_v2 = vadd.f32 %v8949_v14, %v8208_v25 }
0x118a   : > { %8247 = vst [vmem:[%s13539_s1 + $0x58] sm:$0xff] %v8217_v12 }
0x118b   : > { %8245 = vst [vmem:[%s13539_s1 + $0x48] sm:$0xff] %v8209_v2 }
0x118d   : > { %v10945_v31 = vpop.f32.mrb[68].mxu0 }
0x118e   : > { %v8230_v47 = vadd.f32 %v10945_v31, %v8949_v14  ;;  %v8221_v1 = vpop.f32.mrb[69].mxu0 }
0x118f   : > { %v8222_v13 = vadd.f32 %v8949_v14, %v8221_v1  ;;  %v10946_v59 = vpop.f32.mrb[70].mxu0 }
0x1190   : > { %8250 = vst [vmem:[%s13539_s1 + $0x70] sm:$0xff] %v8230_v47  ;;  %v8233_v53 = vadd.f32 %v10946_v59, %v8949_v14  ;;  %v8224_v37 = vpop.f32.mrb[71].mxu0 }
0x1191   : > { %8248 = vst [vmem:[%s13539_s1 + $0x60] sm:$0xff] %v8222_v13  ;;  %v8225_v26 = vadd.f32 %v8949_v14, %v8224_v37 }
0x1192   : > { %8251 = vst [vmem:[%s13539_s1 + $0x78] sm:$0xff] %v8233_v53 }
0x1193   : > { %8249 = vst [vmem:[%s13539_s1 + $0x68] sm:$0xff] %v8225_v26 }
0x1194 PF: > { %s79_s15 = sadd.s32 1, %s11324_s15  }
0x1195   : > { %p76_p4 = scmp.ge.s32.totalorder %s79_s15, 4  }
0x1197   :  { %78 = sbr.rel (!%p76_p4) target bundleno = 54 (0x36), region = 253 }

</bundles_post_ra>
